<compile_context>
chip_gen: v6e
topology: v6e:2x2x1
jax: 0.10.0
libtpu: 0.0.40
codegen_flags: <defaults>
</compile_context>

<pallas_src>
import functools

import jax
import jax.numpy as jnp
from jax.experimental import pallas as pl
from jax.experimental.pallas import tpu as pltpu  # noqa: F401  (TPU backend)

# ----------------------------- "model_config" --------------------------------
PAD = 0
MAX_SEQ_LEN = 16
D_MODEL = 32            # encoder_dim
D_INNER = 64            # encoder_conv1d_filter_size
N_HEAD = 2              # encoder_head
D_K = D_MODEL // N_HEAD
D_V = D_MODEL // N_HEAD
N_LAYERS = 2            # decoder_n_layer
TEMPERATURE = float(D_K) ** 0.5
LN_EPS = 1e-5
KSIZE = 9
KPAD = 4

WEIGHT_NAMES = ("wq", "bq", "wk", "bk", "wv", "bv", "wfc", "bfc",
                "ln1_g", "ln1_b", "w1", "b1", "w2", "b2", "ln2_g", "ln2_b")


# ------------------------------- in-kernel helpers -----------------------------
def _softmax_last(a):
    m = jnp.max(a, axis=-1, keepdims=True)
    e = jnp.exp(a - m)
    return e * pl.reciprocal(jnp.sum(e, axis=-1, keepdims=True), approx=True)


def _layer_norm(y, gamma, beta):
    mean = jnp.mean(y, axis=-1, keepdims=True)
    var = jnp.mean((y - mean) ** 2, axis=-1, keepdims=True)
    return (y - mean) * jax.lax.rsqrt(var + LN_EPS) * gamma + beta


# ---------------------------------- kernel -------------------------------------
def _decoder_kernel(B, T,
                    x_ref, mask_ref,
                    wq_ref, bq_ref, wk_ref, bk_ref, wv_ref, bv_ref,
                    wfc_ref, bfc_ref, g1_ref, be1_ref,
                    w1_ref, b1_ref, w2_ref, b2_ref, g2_ref, be2_ref,
                    o_ref):
    """Entire Decoder forward (all layers, all sublayers, whole batch) fused."""
    x = x_ref[...].astype(jnp.float32)          # (B*T, D)
    mask = mask_ref[...].astype(jnp.float32)    # (B*T, D)  lane-dense non_pad_mask

    for l in range(N_LAYERS):
        # -------------------- MultiHeadAttention sublayer --------------------
        q = jnp.dot(x, wq_ref[l], preferred_element_type=jnp.float32) + bq_ref[l]
        k = jnp.dot(x, wk_ref[l], preferred_element_type=jnp.float32) + bk_ref[l]
        v = jnp.dot(x, wv_ref[l], preferred_element_type=jnp.float32) + bv_ref[l]

        ctx_rows = []
        for b in range(B):                       # static loop over batch
            r0 = b * T
            heads = []
            for h in range(N_HEAD):              # static loop over heads
                c0 = h * D_K
                qh = q[r0:r0 + T, c0:c0 + D_K]
                kh = k[r0:r0 + T, c0:c0 + D_K]
                vh = v[r0:r0 + T, c0:c0 + D_V]
                s = jnp.dot(qh, kh.T, preferred_element_type=jnp.float32) / TEMPERATURE
                s = _softmax_last(_softmax_last(s))   # double softmax (as in ref)
                heads.append(jnp.dot(s, vh, preferred_element_type=jnp.float32))
            ctx_rows.append(jnp.concatenate(heads, axis=-1))   # (T, H*D_V)
        ctx = jnp.concatenate(ctx_rows, axis=0)                # (B*T, H*D_V)

        attn_out = jnp.dot(ctx, wfc_ref[l], preferred_element_type=jnp.float32)
        attn_out = attn_out + bfc_ref[l] + x                   # fc bias + residual
        attn_out = _layer_norm(attn_out, g1_ref[l], be1_ref[l])
        x = attn_out * mask                                    # non_pad_mask

        # ---------------- Position-wise FFN (Conv1d k=9 -> ReLU -> k=1) -------
        win_rows = []
        for b in range(B):                       # per-batch im2col (padding=4)
            xb = x[b * T:(b + 1) * T, :]                        # (T, D)
            zp = jnp.zeros((KPAD, D_MODEL), jnp.float32)
            xp = jnp.concatenate([zp, xb, zp], axis=0)          # (T+8, D)
            win = jnp.concatenate([xp[j:j + T, :] for j in range(KSIZE)],
                                  axis=-1)                      # (T, 9*D)
            win_rows.append(win)
        windows = jnp.concatenate(win_rows, axis=0)             # (B*T, 9*D)

        h1 = jnp.dot(windows, w1_ref[l], preferred_element_type=jnp.float32)
        h1 = jnp.maximum(h1 + b1_ref[l], 0.0)                   # ReLU
        out = jnp.dot(h1, w2_ref[l], preferred_element_type=jnp.float32)
        out = out + b2_ref[l] + x                               # residual
        out = _layer_norm(out, g2_ref[l], be2_ref[l])
        x = out * mask                                          # non_pad_mask

    o_ref[...] = x.astype(o_ref.dtype)


# ------------------------------ parameters ------------------------------------
def init_params(key):
    n_position = MAX_SEQ_LEN + 1
    keys = iter(jax.random.split(key, 8))
    L = N_LAYERS

    pos_emb = 0.02 * jax.random.normal(next(keys), (n_position, D_MODEL), jnp.float32)
    pos_emb = pos_emb.at[PAD].set(0.0)                      # padding_idx row = 0

    std_qk = (2.0 / (D_MODEL + D_K)) ** 0.5
    std_v = (2.0 / (D_MODEL + D_V)) ** 0.5
    std_fc = (2.0 / (N_HEAD * D_V + D_MODEL)) ** 0.5        # xavier_normal_

    return dict(
        pos_emb=pos_emb,
        wq=std_qk * jax.random.normal(next(keys), (L, D_MODEL, N_HEAD * D_K), jnp.float32),
        bq=jnp.zeros((L, 1, N_HEAD * D_K), jnp.float32),
        wk=std_qk * jax.random.normal(next(keys), (L, D_MODEL, N_HEAD * D_K), jnp.float32),
        bk=jnp.zeros((L, 1, N_HEAD * D_K), jnp.float32),
        wv=std_v * jax.random.normal(next(keys), (L, D_MODEL, N_HEAD * D_V), jnp.float32),
        bv=jnp.zeros((L, 1, N_HEAD * D_V), jnp.float32),
        wfc=std_fc * jax.random.normal(next(keys), (L, N_HEAD * D_V, D_MODEL), jnp.float32),
        bfc=jnp.zeros((L, 1, D_MODEL), jnp.float32),
        ln1_g=jnp.ones((L, 1, D_MODEL), jnp.float32),
        ln1_b=jnp.zeros((L, 1, D_MODEL), jnp.float32),
        # Conv1d(k=9) weight stored im2col-flattened: (L, KSIZE*D_MODEL, D_INNER)
        w1=0.05 * jax.random.normal(next(keys), (L, KSIZE * D_MODEL, D_INNER), jnp.float32),
        b1=jnp.zeros((L, 1, D_INNER), jnp.float32),
        w2=0.05 * jax.random.normal(next(keys), (L, D_INNER, D_MODEL), jnp.float32),
        b2=jnp.zeros((L, 1, D_MODEL), jnp.float32),
        ln2_g=jnp.ones((L, 1, D_MODEL), jnp.float32),
        ln2_b=jnp.zeros((L, 1, D_MODEL), jnp.float32),
    )


# ------------------------------- decoder forward -------------------------------
@jax.jit
def decoder_forward(enc_seq, enc_pos, params):
    B, T, D = enc_seq.shape
    # get_non_pad_mask: (B, T, 1) float -> broadcast lane-dense to (B*T, D)
    non_pad = (enc_pos != PAD).astype(enc_seq.dtype)[:, :, None]
    mask_flat = jnp.broadcast_to(non_pad, (B, T, D)).reshape(B * T, D)
    # get_attn_key_pad_mask is computed in the reference but never applied inside
    # ScaledDotProductAttention, so it is intentionally omitted.
    x = enc_seq + params["pos_emb"][enc_pos]                 # position embedding add
    x_flat = x.reshape(B * T, D)

    weights = tuple(params[name] for name in WEIGHT_NAMES)
    kernel = functools.partial(_decoder_kernel, B, T)

    out_flat = pl.pallas_call(
        kernel,
        out_shape=jax.ShapeDtypeStruct((B * T, D), enc_seq.dtype),
    )(x_flat, mask_flat, *weights)
    return out_flat.reshape(B, T, D)


# ----------------------------------- main --------------------------------------
if __name__ == "__main__":
    key = jax.random.PRNGKey(0)
    k_param, k_seq = jax.random.split(key)
    params = init_params(k_param)

    B, T = 2, MAX_SEQ_LEN
    enc_seq = jax.random.normal(k_seq, (B, T, D_MODEL), jnp.float32)
    lengths = jnp.array([T, T - 4])
    pos = jnp.arange(1, T + 1)[None, :]
    enc_pos = jnp.where(pos <= lengths[:, None], pos, PAD).astype(jnp.int32)

    out = decoder_forward(enc_seq, enc_pos, params)
    jax.block_until_ready(out)
    assert out.shape == (B, T, D_MODEL)
    print("KERNEL_OK")
</pallas_src>

<mosaic_0001>
module attributes {stable_mosaic.version = 11 : i64} {
  func.func @_decoder_kernel(%arg0: memref<32x32xf32, #tpu.memory_space<vmem>>, %arg1: memref<32x32xf32, #tpu.memory_space<vmem>>, %arg2: memref<2x32x32xf32, #tpu.memory_space<vmem>>, %arg3: memref<2x1x32xf32, #tpu.memory_space<vmem>>, %arg4: memref<2x32x32xf32, #tpu.memory_space<vmem>>, %arg5: memref<2x1x32xf32, #tpu.memory_space<vmem>>, %arg6: memref<2x32x32xf32, #tpu.memory_space<vmem>>, %arg7: memref<2x1x32xf32, #tpu.memory_space<vmem>>, %arg8: memref<2x32x32xf32, #tpu.memory_space<vmem>>, %arg9: memref<2x1x32xf32, #tpu.memory_space<vmem>>, %arg10: memref<2x1x32xf32, #tpu.memory_space<vmem>>, %arg11: memref<2x1x32xf32, #tpu.memory_space<vmem>>, %arg12: memref<2x288x64xf32, #tpu.memory_space<vmem>>, %arg13: memref<2x1x64xf32, #tpu.memory_space<vmem>>, %arg14: memref<2x64x32xf32, #tpu.memory_space<vmem>>, %arg15: memref<2x1x32xf32, #tpu.memory_space<vmem>>, %arg16: memref<2x1x32xf32, #tpu.memory_space<vmem>>, %arg17: memref<2x1x32xf32, #tpu.memory_space<vmem>>, %arg18: memref<32x32xf32, #tpu.memory_space<vmem>>) attributes {dimension_semantics = [], scalar_prefetch = 0 : i64, scratch_operands = 0 : i64, tpu.core_type = #tpu.core_type<tc>} {
    %c0 = arith.constant 0 : index
    %c0_0 = arith.constant 0 : index
    %0 = vector.load %arg0[%c0, %c0_0] : memref<32x32xf32, #tpu.memory_space<vmem>>, vector<32x32xf32>
    %c0_1 = arith.constant 0 : index
    %c0_2 = arith.constant 0 : index
    %1 = vector.load %arg1[%c0_1, %c0_2] : memref<32x32xf32, #tpu.memory_space<vmem>>, vector<32x32xf32>
    %c0_3 = arith.constant 0 : index
    %c0_4 = arith.constant 0 : index
    %c0_5 = arith.constant 0 : index
    %2 = vector.load %arg2[%c0_3, %c0_4, %c0_5] : memref<2x32x32xf32, #tpu.memory_space<vmem>>, vector<1x32x32xf32>
    %3 = vector.shape_cast %2 : vector<1x32x32xf32> to vector<32x32xf32>
    %cst = arith.constant dense<0.000000e+00> : vector<32x32xf32>
    %4 = tpu.matmul %0, %3, %cst {dimension_numbers = #tpu.dot_dimension_numbers<[1], [0], [0], [1], [0, 0, 1, 1], [], []>} : vector<32x32xf32>, vector<32x32xf32>, vector<32x32xf32> -> vector<32x32xf32>
    %c0_6 = arith.constant 0 : index
    %c0_7 = arith.constant 0 : index
    %c0_8 = arith.constant 0 : index
    %5 = vector.load %arg3[%c0_6, %c0_7, %c0_8] : memref<2x1x32xf32, #tpu.memory_space<vmem>>, vector<1x1x32xf32>
    %6 = vector.shape_cast %5 : vector<1x1x32xf32> to vector<1x32xf32>
    %7 = vector.broadcast %6 : vector<1x32xf32> to vector<32x32xf32>
    %8 = arith.addf %4, %7 : vector<32x32xf32>
    %c0_9 = arith.constant 0 : index
    %c0_10 = arith.constant 0 : index
    %c0_11 = arith.constant 0 : index
    %9 = vector.load %arg4[%c0_9, %c0_10, %c0_11] : memref<2x32x32xf32, #tpu.memory_space<vmem>>, vector<1x32x32xf32>
    %10 = vector.shape_cast %9 : vector<1x32x32xf32> to vector<32x32xf32>
    %cst_12 = arith.constant dense<0.000000e+00> : vector<32x32xf32>
    %11 = tpu.matmul %0, %10, %cst_12 {dimension_numbers = #tpu.dot_dimension_numbers<[1], [0], [0], [1], [0, 0, 1, 1], [], []>} : vector<32x32xf32>, vector<32x32xf32>, vector<32x32xf32> -> vector<32x32xf32>
    %c0_13 = arith.constant 0 : index
    %c0_14 = arith.constant 0 : index
    %c0_15 = arith.constant 0 : index
    %12 = vector.load %arg5[%c0_13, %c0_14, %c0_15] : memref<2x1x32xf32, #tpu.memory_space<vmem>>, vector<1x1x32xf32>
    %13 = vector.shape_cast %12 : vector<1x1x32xf32> to vector<1x32xf32>
    %14 = vector.broadcast %13 : vector<1x32xf32> to vector<32x32xf32>
    %15 = arith.addf %11, %14 : vector<32x32xf32>
    %c0_16 = arith.constant 0 : index
    %c0_17 = arith.constant 0 : index
    %c0_18 = arith.constant 0 : index
    %16 = vector.load %arg6[%c0_16, %c0_17, %c0_18] : memref<2x32x32xf32, #tpu.memory_space<vmem>>, vector<1x32x32xf32>
    %17 = vector.shape_cast %16 : vector<1x32x32xf32> to vector<32x32xf32>
    %cst_19 = arith.constant dense<0.000000e+00> : vector<32x32xf32>
    %18 = tpu.matmul %0, %17, %cst_19 {dimension_numbers = #tpu.dot_dimension_numbers<[1], [0], [0], [1], [0, 0, 1, 1], [], []>} : vector<32x32xf32>, vector<32x32xf32>, vector<32x32xf32> -> vector<32x32xf32>
    %c0_20 = arith.constant 0 : index
    %c0_21 = arith.constant 0 : index
    %c0_22 = arith.constant 0 : index
    %19 = vector.load %arg7[%c0_20, %c0_21, %c0_22] : memref<2x1x32xf32, #tpu.memory_space<vmem>>, vector<1x1x32xf32>
    %20 = vector.shape_cast %19 : vector<1x1x32xf32> to vector<1x32xf32>
    %21 = vector.broadcast %20 : vector<1x32xf32> to vector<32x32xf32>
    %22 = arith.addf %18, %21 : vector<32x32xf32>
    %23 = vector.extract_strided_slice %8 {offsets = [0, 0], sizes = [16, 16], strides = [1, 1]} : vector<32x32xf32> to vector<16x16xf32>
    %24 = vector.extract_strided_slice %15 {offsets = [0, 0], sizes = [16, 16], strides = [1, 1]} : vector<32x32xf32> to vector<16x16xf32>
    %25 = vector.extract_strided_slice %22 {offsets = [0, 0], sizes = [16, 16], strides = [1, 1]} : vector<32x32xf32> to vector<16x16xf32>
    %26 = tpu.transpose %24, [1, 0] : vector<16x16xf32> -> vector<16x16xf32>
    %cst_23 = arith.constant dense<0.000000e+00> : vector<16x16xf32>
    %27 = tpu.matmul %23, %26, %cst_23 {dimension_numbers = #tpu.dot_dimension_numbers<[1], [0], [0], [1], [0, 0, 1, 1], [], []>} : vector<16x16xf32>, vector<16x16xf32>, vector<16x16xf32> -> vector<16x16xf32>
    %cst_24 = arith.constant 4.000000e+00 : f32
    %28 = vector.broadcast %cst_24 : f32 to vector<16x16xf32>
    %29 = arith.divf %27, %28 : vector<16x16xf32>
    %cst_25 = arith.constant dense<0xFF800000> : vector<16xf32>
    %30 = vector.multi_reduction <maximumf>, %29, %cst_25 [1] : vector<16x16xf32> to vector<16xf32>
    %31 = vector.shape_cast %30 : vector<16xf32> to vector<16x1xf32>
    %32 = vector.broadcast %31 : vector<16x1xf32> to vector<16x16xf32>
    %33 = arith.subf %29, %32 : vector<16x16xf32>
    %34 = math.exp %33 : vector<16x16xf32>
    %cst_26 = arith.constant dense<0.000000e+00> : vector<16xf32>
    %35 = vector.multi_reduction <add>, %34, %cst_26 [1] : vector<16x16xf32> to vector<16xf32>
    %36 = vector.shape_cast %35 : vector<16xf32> to vector<16x1xf32>
    %37 = tpu.reciprocal %36 {approx = true} : vector<16x1xf32> -> vector<16x1xf32>
    %38 = vector.broadcast %37 : vector<16x1xf32> to vector<16x16xf32>
    %39 = arith.mulf %34, %38 : vector<16x16xf32>
    %cst_27 = arith.constant dense<0xFF800000> : vector<16xf32>
    %40 = vector.multi_reduction <maximumf>, %39, %cst_27 [1] : vector<16x16xf32> to vector<16xf32>
    %41 = vector.shape_cast %40 : vector<16xf32> to vector<16x1xf32>
    %42 = vector.broadcast %41 : vector<16x1xf32> to vector<16x16xf32>
    %43 = arith.subf %39, %42 : vector<16x16xf32>
    %44 = math.exp %43 : vector<16x16xf32>
    %cst_28 = arith.constant dense<0.000000e+00> : vector<16xf32>
    %45 = vector.multi_reduction <add>, %44, %cst_28 [1] : vector<16x16xf32> to vector<16xf32>
    %46 = vector.shape_cast %45 : vector<16xf32> to vector<16x1xf32>
    %47 = tpu.reciprocal %46 {approx = true} : vector<16x1xf32> -> vector<16x1xf32>
    %48 = vector.broadcast %47 : vector<16x1xf32> to vector<16x16xf32>
    %49 = arith.mulf %44, %48 : vector<16x16xf32>
    %cst_29 = arith.constant dense<0.000000e+00> : vector<16x16xf32>
    %50 = tpu.matmul %49, %25, %cst_29 {dimension_numbers = #tpu.dot_dimension_numbers<[1], [0], [0], [1], [0, 0, 1, 1], [], []>} : vector<16x16xf32>, vector<16x16xf32>, vector<16x16xf32> -> vector<16x16xf32>
    %51 = vector.extract_strided_slice %8 {offsets = [0, 16], sizes = [16, 16], strides = [1, 1]} : vector<32x32xf32> to vector<16x16xf32>
    %52 = vector.extract_strided_slice %15 {offsets = [0, 16], sizes = [16, 16], strides = [1, 1]} : vector<32x32xf32> to vector<16x16xf32>
    %53 = vector.extract_strided_slice %22 {offsets = [0, 16], sizes = [16, 16], strides = [1, 1]} : vector<32x32xf32> to vector<16x16xf32>
    %54 = tpu.transpose %52, [1, 0] : vector<16x16xf32> -> vector<16x16xf32>
    %cst_30 = arith.constant dense<0.000000e+00> : vector<16x16xf32>
    %55 = tpu.matmul %51, %54, %cst_30 {dimension_numbers = #tpu.dot_dimension_numbers<[1], [0], [0], [1], [0, 0, 1, 1], [], []>} : vector<16x16xf32>, vector<16x16xf32>, vector<16x16xf32> -> vector<16x16xf32>
    %cst_31 = arith.constant 4.000000e+00 : f32
    %56 = vector.broadcast %cst_31 : f32 to vector<16x16xf32>
    %57 = arith.divf %55, %56 : vector<16x16xf32>
    %cst_32 = arith.constant dense<0xFF800000> : vector<16xf32>
    %58 = vector.multi_reduction <maximumf>, %57, %cst_32 [1] : vector<16x16xf32> to vector<16xf32>
    %59 = vector.shape_cast %58 : vector<16xf32> to vector<16x1xf32>
    %60 = vector.broadcast %59 : vector<16x1xf32> to vector<16x16xf32>
    %61 = arith.subf %57, %60 : vector<16x16xf32>
    %62 = math.exp %61 : vector<16x16xf32>
    %cst_33 = arith.constant dense<0.000000e+00> : vector<16xf32>
    %63 = vector.multi_reduction <add>, %62, %cst_33 [1] : vector<16x16xf32> to vector<16xf32>
    %64 = vector.shape_cast %63 : vector<16xf32> to vector<16x1xf32>
    %65 = tpu.reciprocal %64 {approx = true} : vector<16x1xf32> -> vector<16x1xf32>
    %66 = vector.broadcast %65 : vector<16x1xf32> to vector<16x16xf32>
    %67 = arith.mulf %62, %66 : vector<16x16xf32>
    %cst_34 = arith.constant dense<0xFF800000> : vector<16xf32>
    %68 = vector.multi_reduction <maximumf>, %67, %cst_34 [1] : vector<16x16xf32> to vector<16xf32>
    %69 = vector.shape_cast %68 : vector<16xf32> to vector<16x1xf32>
    %70 = vector.broadcast %69 : vector<16x1xf32> to vector<16x16xf32>
    %71 = arith.subf %67, %70 : vector<16x16xf32>
    %72 = math.exp %71 : vector<16x16xf32>
    %cst_35 = arith.constant dense<0.000000e+00> : vector<16xf32>
    %73 = vector.multi_reduction <add>, %72, %cst_35 [1] : vector<16x16xf32> to vector<16xf32>
    %74 = vector.shape_cast %73 : vector<16xf32> to vector<16x1xf32>
    %75 = tpu.reciprocal %74 {approx = true} : vector<16x1xf32> -> vector<16x1xf32>
    %76 = vector.broadcast %75 : vector<16x1xf32> to vector<16x16xf32>
    %77 = arith.mulf %72, %76 : vector<16x16xf32>
    %cst_36 = arith.constant dense<0.000000e+00> : vector<16x16xf32>
    %78 = tpu.matmul %77, %53, %cst_36 {dimension_numbers = #tpu.dot_dimension_numbers<[1], [0], [0], [1], [0, 0, 1, 1], [], []>} : vector<16x16xf32>, vector<16x16xf32>, vector<16x16xf32> -> vector<16x16xf32>
    %79 = tpu.concatenate %50, %78 in 1 : vector<16x16xf32>, vector<16x16xf32> -> vector<16x32xf32>
    %80 = vector.extract_strided_slice %8 {offsets = [16, 0], sizes = [16, 16], strides = [1, 1]} : vector<32x32xf32> to vector<16x16xf32>
    %81 = vector.extract_strided_slice %15 {offsets = [16, 0], sizes = [16, 16], strides = [1, 1]} : vector<32x32xf32> to vector<16x16xf32>
    %82 = vector.extract_strided_slice %22 {offsets = [16, 0], sizes = [16, 16], strides = [1, 1]} : vector<32x32xf32> to vector<16x16xf32>
    %83 = tpu.transpose %81, [1, 0] : vector<16x16xf32> -> vector<16x16xf32>
    %cst_37 = arith.constant dense<0.000000e+00> : vector<16x16xf32>
    %84 = tpu.matmul %80, %83, %cst_37 {dimension_numbers = #tpu.dot_dimension_numbers<[1], [0], [0], [1], [0, 0, 1, 1], [], []>} : vector<16x16xf32>, vector<16x16xf32>, vector<16x16xf32> -> vector<16x16xf32>
    %cst_38 = arith.constant 4.000000e+00 : f32
    %85 = vector.broadcast %cst_38 : f32 to vector<16x16xf32>
    %86 = arith.divf %84, %85 : vector<16x16xf32>
    %cst_39 = arith.constant dense<0xFF800000> : vector<16xf32>
    %87 = vector.multi_reduction <maximumf>, %86, %cst_39 [1] : vector<16x16xf32> to vector<16xf32>
    %88 = vector.shape_cast %87 : vector<16xf32> to vector<16x1xf32>
    %89 = vector.broadcast %88 : vector<16x1xf32> to vector<16x16xf32>
    %90 = arith.subf %86, %89 : vector<16x16xf32>
    %91 = math.exp %90 : vector<16x16xf32>
    %cst_40 = arith.constant dense<0.000000e+00> : vector<16xf32>
    %92 = vector.multi_reduction <add>, %91, %cst_40 [1] : vector<16x16xf32> to vector<16xf32>
    %93 = vector.shape_cast %92 : vector<16xf32> to vector<16x1xf32>
    %94 = tpu.reciprocal %93 {approx = true} : vector<16x1xf32> -> vector<16x1xf32>
    %95 = vector.broadcast %94 : vector<16x1xf32> to vector<16x16xf32>
    %96 = arith.mulf %91, %95 : vector<16x16xf32>
    %cst_41 = arith.constant dense<0xFF800000> : vector<16xf32>
    %97 = vector.multi_reduction <maximumf>, %96, %cst_41 [1] : vector<16x16xf32> to vector<16xf32>
    %98 = vector.shape_cast %97 : vector<16xf32> to vector<16x1xf32>
    %99 = vector.broadcast %98 : vector<16x1xf32> to vector<16x16xf32>
    %100 = arith.subf %96, %99 : vector<16x16xf32>
    %101 = math.exp %100 : vector<16x16xf32>
    %cst_42 = arith.constant dense<0.000000e+00> : vector<16xf32>
    %102 = vector.multi_reduction <add>, %101, %cst_42 [1] : vector<16x16xf32> to vector<16xf32>
    %103 = vector.shape_cast %102 : vector<16xf32> to vector<16x1xf32>
    %104 = tpu.reciprocal %103 {approx = true} : vector<16x1xf32> -> vector<16x1xf32>
    %105 = vector.broadcast %104 : vector<16x1xf32> to vector<16x16xf32>
    %106 = arith.mulf %101, %105 : vector<16x16xf32>
    %cst_43 = arith.constant dense<0.000000e+00> : vector<16x16xf32>
    %107 = tpu.matmul %106, %82, %cst_43 {dimension_numbers = #tpu.dot_dimension_numbers<[1], [0], [0], [1], [0, 0, 1, 1], [], []>} : vector<16x16xf32>, vector<16x16xf32>, vector<16x16xf32> -> vector<16x16xf32>
    %108 = vector.extract_strided_slice %8 {offsets = [16, 16], sizes = [16, 16], strides = [1, 1]} : vector<32x32xf32> to vector<16x16xf32>
    %109 = vector.extract_strided_slice %15 {offsets = [16, 16], sizes = [16, 16], strides = [1, 1]} : vector<32x32xf32> to vector<16x16xf32>
    %110 = vector.extract_strided_slice %22 {offsets = [16, 16], sizes = [16, 16], strides = [1, 1]} : vector<32x32xf32> to vector<16x16xf32>
    %111 = tpu.transpose %109, [1, 0] : vector<16x16xf32> -> vector<16x16xf32>
    %cst_44 = arith.constant dense<0.000000e+00> : vector<16x16xf32>
    %112 = tpu.matmul %108, %111, %cst_44 {dimension_numbers = #tpu.dot_dimension_numbers<[1], [0], [0], [1], [0, 0, 1, 1], [], []>} : vector<16x16xf32>, vector<16x16xf32>, vector<16x16xf32> -> vector<16x16xf32>
    %cst_45 = arith.constant 4.000000e+00 : f32
    %113 = vector.broadcast %cst_45 : f32 to vector<16x16xf32>
    %114 = arith.divf %112, %113 : vector<16x16xf32>
    %cst_46 = arith.constant dense<0xFF800000> : vector<16xf32>
    %115 = vector.multi_reduction <maximumf>, %114, %cst_46 [1] : vector<16x16xf32> to vector<16xf32>
    %116 = vector.shape_cast %115 : vector<16xf32> to vector<16x1xf32>
    %117 = vector.broadcast %116 : vector<16x1xf32> to vector<16x16xf32>
    %118 = arith.subf %114, %117 : vector<16x16xf32>
    %119 = math.exp %118 : vector<16x16xf32>
    %cst_47 = arith.constant dense<0.000000e+00> : vector<16xf32>
    %120 = vector.multi_reduction <add>, %119, %cst_47 [1] : vector<16x16xf32> to vector<16xf32>
    %121 = vector.shape_cast %120 : vector<16xf32> to vector<16x1xf32>
    %122 = tpu.reciprocal %121 {approx = true} : vector<16x1xf32> -> vector<16x1xf32>
    %123 = vector.broadcast %122 : vector<16x1xf32> to vector<16x16xf32>
    %124 = arith.mulf %119, %123 : vector<16x16xf32>
    %cst_48 = arith.constant dense<0xFF800000> : vector<16xf32>
    %125 = vector.multi_reduction <maximumf>, %124, %cst_48 [1] : vector<16x16xf32> to vector<16xf32>
    %126 = vector.shape_cast %125 : vector<16xf32> to vector<16x1xf32>
    %127 = vector.broadcast %126 : vector<16x1xf32> to vector<16x16xf32>
    %128 = arith.subf %124, %127 : vector<16x16xf32>
    %129 = math.exp %128 : vector<16x16xf32>
    %cst_49 = arith.constant dense<0.000000e+00> : vector<16xf32>
    %130 = vector.multi_reduction <add>, %129, %cst_49 [1] : vector<16x16xf32> to vector<16xf32>
    %131 = vector.shape_cast %130 : vector<16xf32> to vector<16x1xf32>
    %132 = tpu.reciprocal %131 {approx = true} : vector<16x1xf32> -> vector<16x1xf32>
    %133 = vector.broadcast %132 : vector<16x1xf32> to vector<16x16xf32>
    %134 = arith.mulf %129, %133 : vector<16x16xf32>
    %cst_50 = arith.constant dense<0.000000e+00> : vector<16x16xf32>
    %135 = tpu.matmul %134, %110, %cst_50 {dimension_numbers = #tpu.dot_dimension_numbers<[1], [0], [0], [1], [0, 0, 1, 1], [], []>} : vector<16x16xf32>, vector<16x16xf32>, vector<16x16xf32> -> vector<16x16xf32>
    %136 = tpu.concatenate %107, %135 in 1 : vector<16x16xf32>, vector<16x16xf32> -> vector<16x32xf32>
    %137 = tpu.concatenate %79, %136 in 0 : vector<16x32xf32>, vector<16x32xf32> -> vector<32x32xf32>
    %c0_51 = arith.constant 0 : index
    %c0_52 = arith.constant 0 : index
    %c0_53 = arith.constant 0 : index
    %138 = vector.load %arg8[%c0_51, %c0_52, %c0_53] : memref<2x32x32xf32, #tpu.memory_space<vmem>>, vector<1x32x32xf32>
    %139 = vector.shape_cast %138 : vector<1x32x32xf32> to vector<32x32xf32>
    %cst_54 = arith.constant dense<0.000000e+00> : vector<32x32xf32>
    %140 = tpu.matmul %137, %139, %cst_54 {dimension_numbers = #tpu.dot_dimension_numbers<[1], [0], [0], [1], [0, 0, 1, 1], [], []>} : vector<32x32xf32>, vector<32x32xf32>, vector<32x32xf32> -> vector<32x32xf32>
    %c0_55 = arith.constant 0 : index
    %c0_56 = arith.constant 0 : index
    %c0_57 = arith.constant 0 : index
    %141 = vector.load %arg9[%c0_55, %c0_56, %c0_57] : memref<2x1x32xf32, #tpu.memory_space<vmem>>, vector<1x1x32xf32>
    %142 = vector.shape_cast %141 : vector<1x1x32xf32> to vector<1x32xf32>
    %143 = vector.broadcast %142 : vector<1x32xf32> to vector<32x32xf32>
    %144 = arith.addf %140, %143 : vector<32x32xf32>
    %145 = arith.addf %144, %0 : vector<32x32xf32>
    %c0_58 = arith.constant 0 : index
    %c0_59 = arith.constant 0 : index
    %c0_60 = arith.constant 0 : index
    %146 = vector.load %arg10[%c0_58, %c0_59, %c0_60] : memref<2x1x32xf32, #tpu.memory_space<vmem>>, vector<1x1x32xf32>
    %147 = vector.shape_cast %146 : vector<1x1x32xf32> to vector<1x32xf32>
    %c0_61 = arith.constant 0 : index
    %c0_62 = arith.constant 0 : index
    %c0_63 = arith.constant 0 : index
    %148 = vector.load %arg11[%c0_61, %c0_62, %c0_63] : memref<2x1x32xf32, #tpu.memory_space<vmem>>, vector<1x1x32xf32>
    %149 = vector.shape_cast %148 : vector<1x1x32xf32> to vector<1x32xf32>
    %cst_64 = arith.constant dense<0.000000e+00> : vector<32xf32>
    %150 = vector.multi_reduction <add>, %145, %cst_64 [1] : vector<32x32xf32> to vector<32xf32>
    %151 = vector.shape_cast %150 : vector<32xf32> to vector<32x1xf32>
    %cst_65 = arith.constant 3.200000e+01 : f32
    %152 = vector.broadcast %cst_65 : f32 to vector<32x1xf32>
    %153 = arith.divf %151, %152 : vector<32x1xf32>
    %154 = vector.broadcast %153 : vector<32x1xf32> to vector<32x32xf32>
    %155 = arith.subf %145, %154 : vector<32x32xf32>
    %156 = arith.mulf %155, %155 : vector<32x32xf32>
    %cst_66 = arith.constant dense<0.000000e+00> : vector<32xf32>
    %157 = vector.multi_reduction <add>, %156, %cst_66 [1] : vector<32x32xf32> to vector<32xf32>
    %158 = vector.shape_cast %157 : vector<32xf32> to vector<32x1xf32>
    %cst_67 = arith.constant 3.200000e+01 : f32
    %159 = vector.broadcast %cst_67 : f32 to vector<32x1xf32>
    %160 = arith.divf %158, %159 : vector<32x1xf32>
    %161 = vector.broadcast %153 : vector<32x1xf32> to vector<32x32xf32>
    %162 = arith.subf %145, %161 : vector<32x32xf32>
    %cst_68 = arith.constant 9.99999974E-6 : f32
    %163 = vector.broadcast %cst_68 : f32 to vector<32x1xf32>
    %164 = arith.addf %160, %163 : vector<32x1xf32>
    %165 = math.rsqrt %164 : vector<32x1xf32>
    %166 = vector.broadcast %165 : vector<32x1xf32> to vector<32x32xf32>
    %167 = arith.mulf %162, %166 : vector<32x32xf32>
    %168 = vector.broadcast %147 : vector<1x32xf32> to vector<32x32xf32>
    %169 = arith.mulf %167, %168 : vector<32x32xf32>
    %170 = vector.broadcast %149 : vector<1x32xf32> to vector<32x32xf32>
    %171 = arith.addf %169, %170 : vector<32x32xf32>
    %172 = arith.mulf %171, %1 : vector<32x32xf32>
    %173 = vector.extract_strided_slice %172 {offsets = [0, 0], sizes = [16, 32], strides = [1, 1]} : vector<32x32xf32> to vector<16x32xf32>
    %cst_69 = arith.constant 0.000000e+00 : f32
    %174 = vector.broadcast %cst_69 : f32 to vector<4x32xf32>
    %175 = tpu.concatenate %174, %173, %174 in 0 : vector<4x32xf32>, vector<16x32xf32>, vector<4x32xf32> -> vector<24x32xf32>
    %176 = vector.extract_strided_slice %175 {offsets = [0, 0], sizes = [16, 32], strides = [1, 1]} : vector<24x32xf32> to vector<16x32xf32>
    %177 = vector.extract_strided_slice %175 {offsets = [1, 0], sizes = [16, 32], strides = [1, 1]} : vector<24x32xf32> to vector<16x32xf32>
    %178 = vector.extract_strided_slice %175 {offsets = [2, 0], sizes = [16, 32], strides = [1, 1]} : vector<24x32xf32> to vector<16x32xf32>
    %179 = vector.extract_strided_slice %175 {offsets = [3, 0], sizes = [16, 32], strides = [1, 1]} : vector<24x32xf32> to vector<16x32xf32>
    %180 = vector.extract_strided_slice %175 {offsets = [4, 0], sizes = [16, 32], strides = [1, 1]} : vector<24x32xf32> to vector<16x32xf32>
    %181 = vector.extract_strided_slice %175 {offsets = [5, 0], sizes = [16, 32], strides = [1, 1]} : vector<24x32xf32> to vector<16x32xf32>
    %182 = vector.extract_strided_slice %175 {offsets = [6, 0], sizes = [16, 32], strides = [1, 1]} : vector<24x32xf32> to vector<16x32xf32>
    %183 = vector.extract_strided_slice %175 {offsets = [7, 0], sizes = [16, 32], strides = [1, 1]} : vector<24x32xf32> to vector<16x32xf32>
    %184 = vector.extract_strided_slice %175 {offsets = [8, 0], sizes = [16, 32], strides = [1, 1]} : vector<24x32xf32> to vector<16x32xf32>
    %185 = tpu.concatenate %176, %177, %178, %179, %180, %181, %182, %183, %184 in 1 : vector<16x32xf32>, vector<16x32xf32>, vector<16x32xf32>, vector<16x32xf32>, vector<16x32xf32>, vector<16x32xf32>, vector<16x32xf32>, vector<16x32xf32>, vector<16x32xf32> -> vector<16x288xf32>
    %186 = vector.extract_strided_slice %172 {offsets = [16, 0], sizes = [16, 32], strides = [1, 1]} : vector<32x32xf32> to vector<16x32xf32>
    %cst_70 = arith.constant 0.000000e+00 : f32
    %187 = vector.broadcast %cst_70 : f32 to vector<4x32xf32>
    %188 = tpu.concatenate %187, %186, %187 in 0 : vector<4x32xf32>, vector<16x32xf32>, vector<4x32xf32> -> vector<24x32xf32>
    %189 = vector.extract_strided_slice %188 {offsets = [0, 0], sizes = [16, 32], strides = [1, 1]} : vector<24x32xf32> to vector<16x32xf32>
    %190 = vector.extract_strided_slice %188 {offsets = [1, 0], sizes = [16, 32], strides = [1, 1]} : vector<24x32xf32> to vector<16x32xf32>
    %191 = vector.extract_strided_slice %188 {offsets = [2, 0], sizes = [16, 32], strides = [1, 1]} : vector<24x32xf32> to vector<16x32xf32>
    %192 = vector.extract_strided_slice %188 {offsets = [3, 0], sizes = [16, 32], strides = [1, 1]} : vector<24x32xf32> to vector<16x32xf32>
    %193 = vector.extract_strided_slice %188 {offsets = [4, 0], sizes = [16, 32], strides = [1, 1]} : vector<24x32xf32> to vector<16x32xf32>
    %194 = vector.extract_strided_slice %188 {offsets = [5, 0], sizes = [16, 32], strides = [1, 1]} : vector<24x32xf32> to vector<16x32xf32>
    %195 = vector.extract_strided_slice %188 {offsets = [6, 0], sizes = [16, 32], strides = [1, 1]} : vector<24x32xf32> to vector<16x32xf32>
    %196 = vector.extract_strided_slice %188 {offsets = [7, 0], sizes = [16, 32], strides = [1, 1]} : vector<24x32xf32> to vector<16x32xf32>
    %197 = vector.extract_strided_slice %188 {offsets = [8, 0], sizes = [16, 32], strides = [1, 1]} : vector<24x32xf32> to vector<16x32xf32>
    %198 = tpu.concatenate %189, %190, %191, %192, %193, %194, %195, %196, %197 in 1 : vector<16x32xf32>, vector<16x32xf32>, vector<16x32xf32>, vector<16x32xf32>, vector<16x32xf32>, vector<16x32xf32>, vector<16x32xf32>, vector<16x32xf32>, vector<16x32xf32> -> vector<16x288xf32>
    %199 = tpu.concatenate %185, %198 in 0 : vector<16x288xf32>, vector<16x288xf32> -> vector<32x288xf32>
    %c0_71 = arith.constant 0 : index
    %c0_72 = arith.constant 0 : index
    %c0_73 = arith.constant 0 : index
    %200 = vector.load %arg12[%c0_71, %c0_72, %c0_73] : memref<2x288x64xf32, #tpu.memory_space<vmem>>, vector<1x288x64xf32>
    %201 = vector.shape_cast %200 : vector<1x288x64xf32> to vector<288x64xf32>
    %cst_74 = arith.constant dense<0.000000e+00> : vector<32x64xf32>
    %202 = tpu.matmul %199, %201, %cst_74 {dimension_numbers = #tpu.dot_dimension_numbers<[1], [0], [0], [1], [0, 0, 1, 1], [], []>} : vector<32x288xf32>, vector<288x64xf32>, vector<32x64xf32> -> vector<32x64xf32>
    %c0_75 = arith.constant 0 : index
    %c0_76 = arith.constant 0 : index
    %c0_77 = arith.constant 0 : index
    %203 = vector.load %arg13[%c0_75, %c0_76, %c0_77] : memref<2x1x64xf32, #tpu.memory_space<vmem>>, vector<1x1x64xf32>
    %204 = vector.shape_cast %203 : vector<1x1x64xf32> to vector<1x64xf32>
    %205 = vector.broadcast %204 : vector<1x64xf32> to vector<32x64xf32>
    %206 = arith.addf %202, %205 : vector<32x64xf32>
    %cst_78 = arith.constant 0.000000e+00 : f32
    %207 = vector.broadcast %cst_78 : f32 to vector<32x64xf32>
    %208 = arith.maximumf %206, %207 : vector<32x64xf32>
    %c0_79 = arith.constant 0 : index
    %c0_80 = arith.constant 0 : index
    %c0_81 = arith.constant 0 : index
    %209 = vector.load %arg14[%c0_79, %c0_80, %c0_81] : memref<2x64x32xf32, #tpu.memory_space<vmem>>, vector<1x64x32xf32>
    %210 = vector.shape_cast %209 : vector<1x64x32xf32> to vector<64x32xf32>
    %cst_82 = arith.constant dense<0.000000e+00> : vector<32x32xf32>
    %211 = tpu.matmul %208, %210, %cst_82 {dimension_numbers = #tpu.dot_dimension_numbers<[1], [0], [0], [1], [0, 0, 1, 1], [], []>} : vector<32x64xf32>, vector<64x32xf32>, vector<32x32xf32> -> vector<32x32xf32>
    %c0_83 = arith.constant 0 : index
    %c0_84 = arith.constant 0 : index
    %c0_85 = arith.constant 0 : index
    %212 = vector.load %arg15[%c0_83, %c0_84, %c0_85] : memref<2x1x32xf32, #tpu.memory_space<vmem>>, vector<1x1x32xf32>
    %213 = vector.shape_cast %212 : vector<1x1x32xf32> to vector<1x32xf32>
    %214 = vector.broadcast %213 : vector<1x32xf32> to vector<32x32xf32>
    %215 = arith.addf %211, %214 : vector<32x32xf32>
    %216 = arith.addf %215, %172 : vector<32x32xf32>
    %c0_86 = arith.constant 0 : index
    %c0_87 = arith.constant 0 : index
    %c0_88 = arith.constant 0 : index
    %217 = vector.load %arg16[%c0_86, %c0_87, %c0_88] : memref<2x1x32xf32, #tpu.memory_space<vmem>>, vector<1x1x32xf32>
    %218 = vector.shape_cast %217 : vector<1x1x32xf32> to vector<1x32xf32>
    %c0_89 = arith.constant 0 : index
    %c0_90 = arith.constant 0 : index
    %c0_91 = arith.constant 0 : index
    %219 = vector.load %arg17[%c0_89, %c0_90, %c0_91] : memref<2x1x32xf32, #tpu.memory_space<vmem>>, vector<1x1x32xf32>
    %220 = vector.shape_cast %219 : vector<1x1x32xf32> to vector<1x32xf32>
    %cst_92 = arith.constant dense<0.000000e+00> : vector<32xf32>
    %221 = vector.multi_reduction <add>, %216, %cst_92 [1] : vector<32x32xf32> to vector<32xf32>
    %222 = vector.shape_cast %221 : vector<32xf32> to vector<32x1xf32>
    %cst_93 = arith.constant 3.200000e+01 : f32
    %223 = vector.broadcast %cst_93 : f32 to vector<32x1xf32>
    %224 = arith.divf %222, %223 : vector<32x1xf32>
    %225 = vector.broadcast %224 : vector<32x1xf32> to vector<32x32xf32>
    %226 = arith.subf %216, %225 : vector<32x32xf32>
    %227 = arith.mulf %226, %226 : vector<32x32xf32>
    %cst_94 = arith.constant dense<0.000000e+00> : vector<32xf32>
    %228 = vector.multi_reduction <add>, %227, %cst_94 [1] : vector<32x32xf32> to vector<32xf32>
    %229 = vector.shape_cast %228 : vector<32xf32> to vector<32x1xf32>
    %cst_95 = arith.constant 3.200000e+01 : f32
    %230 = vector.broadcast %cst_95 : f32 to vector<32x1xf32>
    %231 = arith.divf %229, %230 : vector<32x1xf32>
    %232 = vector.broadcast %224 : vector<32x1xf32> to vector<32x32xf32>
    %233 = arith.subf %216, %232 : vector<32x32xf32>
    %cst_96 = arith.constant 9.99999974E-6 : f32
    %234 = vector.broadcast %cst_96 : f32 to vector<32x1xf32>
    %235 = arith.addf %231, %234 : vector<32x1xf32>
    %236 = math.rsqrt %235 : vector<32x1xf32>
    %237 = vector.broadcast %236 : vector<32x1xf32> to vector<32x32xf32>
    %238 = arith.mulf %233, %237 : vector<32x32xf32>
    %239 = vector.broadcast %218 : vector<1x32xf32> to vector<32x32xf32>
    %240 = arith.mulf %238, %239 : vector<32x32xf32>
    %241 = vector.broadcast %220 : vector<1x32xf32> to vector<32x32xf32>
    %242 = arith.addf %240, %241 : vector<32x32xf32>
    %243 = arith.mulf %242, %1 : vector<32x32xf32>
    %c1 = arith.constant 1 : index
    %c0_97 = arith.constant 0 : index
    %c0_98 = arith.constant 0 : index
    %244 = vector.load %arg2[%c1, %c0_97, %c0_98] : memref<2x32x32xf32, #tpu.memory_space<vmem>>, vector<1x32x32xf32>
    %245 = vector.shape_cast %244 : vector<1x32x32xf32> to vector<32x32xf32>
    %cst_99 = arith.constant dense<0.000000e+00> : vector<32x32xf32>
    %246 = tpu.matmul %243, %245, %cst_99 {dimension_numbers = #tpu.dot_dimension_numbers<[1], [0], [0], [1], [0, 0, 1, 1], [], []>} : vector<32x32xf32>, vector<32x32xf32>, vector<32x32xf32> -> vector<32x32xf32>
    %c1_100 = arith.constant 1 : index
    %c0_101 = arith.constant 0 : index
    %c0_102 = arith.constant 0 : index
    %247 = vector.load %arg3[%c1_100, %c0_101, %c0_102] : memref<2x1x32xf32, #tpu.memory_space<vmem>>, vector<1x1x32xf32>
    %248 = vector.shape_cast %247 : vector<1x1x32xf32> to vector<1x32xf32>
    %249 = vector.broadcast %248 : vector<1x32xf32> to vector<32x32xf32>
    %250 = arith.addf %246, %249 : vector<32x32xf32>
    %c1_103 = arith.constant 1 : index
    %c0_104 = arith.constant 0 : index
    %c0_105 = arith.constant 0 : index
    %251 = vector.load %arg4[%c1_103, %c0_104, %c0_105] : memref<2x32x32xf32, #tpu.memory_space<vmem>>, vector<1x32x32xf32>
    %252 = vector.shape_cast %251 : vector<1x32x32xf32> to vector<32x32xf32>
    %cst_106 = arith.constant dense<0.000000e+00> : vector<32x32xf32>
    %253 = tpu.matmul %243, %252, %cst_106 {dimension_numbers = #tpu.dot_dimension_numbers<[1], [0], [0], [1], [0, 0, 1, 1], [], []>} : vector<32x32xf32>, vector<32x32xf32>, vector<32x32xf32> -> vector<32x32xf32>
    %c1_107 = arith.constant 1 : index
    %c0_108 = arith.constant 0 : index
    %c0_109 = arith.constant 0 : index
    %254 = vector.load %arg5[%c1_107, %c0_108, %c0_109] : memref<2x1x32xf32, #tpu.memory_space<vmem>>, vector<1x1x32xf32>
    %255 = vector.shape_cast %254 : vector<1x1x32xf32> to vector<1x32xf32>
    %256 = vector.broadcast %255 : vector<1x32xf32> to vector<32x32xf32>
    %257 = arith.addf %253, %256 : vector<32x32xf32>
    %c1_110 = arith.constant 1 : index
    %c0_111 = arith.constant 0 : index
    %c0_112 = arith.constant 0 : index
    %258 = vector.load %arg6[%c1_110, %c0_111, %c0_112] : memref<2x32x32xf32, #tpu.memory_space<vmem>>, vector<1x32x32xf32>
    %259 = vector.shape_cast %258 : vector<1x32x32xf32> to vector<32x32xf32>
    %cst_113 = arith.constant dense<0.000000e+00> : vector<32x32xf32>
    %260 = tpu.matmul %243, %259, %cst_113 {dimension_numbers = #tpu.dot_dimension_numbers<[1], [0], [0], [1], [0, 0, 1, 1], [], []>} : vector<32x32xf32>, vector<32x32xf32>, vector<32x32xf32> -> vector<32x32xf32>
    %c1_114 = arith.constant 1 : index
    %c0_115 = arith.constant 0 : index
    %c0_116 = arith.constant 0 : index
    %261 = vector.load %arg7[%c1_114, %c0_115, %c0_116] : memref<2x1x32xf32, #tpu.memory_space<vmem>>, vector<1x1x32xf32>
    %262 = vector.shape_cast %261 : vector<1x1x32xf32> to vector<1x32xf32>
    %263 = vector.broadcast %262 : vector<1x32xf32> to vector<32x32xf32>
    %264 = arith.addf %260, %263 : vector<32x32xf32>
    %265 = vector.extract_strided_slice %250 {offsets = [0, 0], sizes = [16, 16], strides = [1, 1]} : vector<32x32xf32> to vector<16x16xf32>
    %266 = vector.extract_strided_slice %257 {offsets = [0, 0], sizes = [16, 16], strides = [1, 1]} : vector<32x32xf32> to vector<16x16xf32>
    %267 = vector.extract_strided_slice %264 {offsets = [0, 0], sizes = [16, 16], strides = [1, 1]} : vector<32x32xf32> to vector<16x16xf32>
    %268 = tpu.transpose %266, [1, 0] : vector<16x16xf32> -> vector<16x16xf32>
    %cst_117 = arith.constant dense<0.000000e+00> : vector<16x16xf32>
    %269 = tpu.matmul %265, %268, %cst_117 {dimension_numbers = #tpu.dot_dimension_numbers<[1], [0], [0], [1], [0, 0, 1, 1], [], []>} : vector<16x16xf32>, vector<16x16xf32>, vector<16x16xf32> -> vector<16x16xf32>
    %cst_118 = arith.constant 4.000000e+00 : f32
    %270 = vector.broadcast %cst_118 : f32 to vector<16x16xf32>
    %271 = arith.divf %269, %270 : vector<16x16xf32>
    %cst_119 = arith.constant dense<0xFF800000> : vector<16xf32>
    %272 = vector.multi_reduction <maximumf>, %271, %cst_119 [1] : vector<16x16xf32> to vector<16xf32>
    %273 = vector.shape_cast %272 : vector<16xf32> to vector<16x1xf32>
    %274 = vector.broadcast %273 : vector<16x1xf32> to vector<16x16xf32>
    %275 = arith.subf %271, %274 : vector<16x16xf32>
    %276 = math.exp %275 : vector<16x16xf32>
    %cst_120 = arith.constant dense<0.000000e+00> : vector<16xf32>
    %277 = vector.multi_reduction <add>, %276, %cst_120 [1] : vector<16x16xf32> to vector<16xf32>
    %278 = vector.shape_cast %277 : vector<16xf32> to vector<16x1xf32>
    %279 = tpu.reciprocal %278 {approx = true} : vector<16x1xf32> -> vector<16x1xf32>
    %280 = vector.broadcast %279 : vector<16x1xf32> to vector<16x16xf32>
    %281 = arith.mulf %276, %280 : vector<16x16xf32>
    %cst_121 = arith.constant dense<0xFF800000> : vector<16xf32>
    %282 = vector.multi_reduction <maximumf>, %281, %cst_121 [1] : vector<16x16xf32> to vector<16xf32>
    %283 = vector.shape_cast %282 : vector<16xf32> to vector<16x1xf32>
    %284 = vector.broadcast %283 : vector<16x1xf32> to vector<16x16xf32>
    %285 = arith.subf %281, %284 : vector<16x16xf32>
    %286 = math.exp %285 : vector<16x16xf32>
    %cst_122 = arith.constant dense<0.000000e+00> : vector<16xf32>
    %287 = vector.multi_reduction <add>, %286, %cst_122 [1] : vector<16x16xf32> to vector<16xf32>
    %288 = vector.shape_cast %287 : vector<16xf32> to vector<16x1xf32>
    %289 = tpu.reciprocal %288 {approx = true} : vector<16x1xf32> -> vector<16x1xf32>
    %290 = vector.broadcast %289 : vector<16x1xf32> to vector<16x16xf32>
    %291 = arith.mulf %286, %290 : vector<16x16xf32>
    %cst_123 = arith.constant dense<0.000000e+00> : vector<16x16xf32>
    %292 = tpu.matmul %291, %267, %cst_123 {dimension_numbers = #tpu.dot_dimension_numbers<[1], [0], [0], [1], [0, 0, 1, 1], [], []>} : vector<16x16xf32>, vector<16x16xf32>, vector<16x16xf32> -> vector<16x16xf32>
    %293 = vector.extract_strided_slice %250 {offsets = [0, 16], sizes = [16, 16], strides = [1, 1]} : vector<32x32xf32> to vector<16x16xf32>
    %294 = vector.extract_strided_slice %257 {offsets = [0, 16], sizes = [16, 16], strides = [1, 1]} : vector<32x32xf32> to vector<16x16xf32>
    %295 = vector.extract_strided_slice %264 {offsets = [0, 16], sizes = [16, 16], strides = [1, 1]} : vector<32x32xf32> to vector<16x16xf32>
    %296 = tpu.transpose %294, [1, 0] : vector<16x16xf32> -> vector<16x16xf32>
    %cst_124 = arith.constant dense<0.000000e+00> : vector<16x16xf32>
    %297 = tpu.matmul %293, %296, %cst_124 {dimension_numbers = #tpu.dot_dimension_numbers<[1], [0], [0], [1], [0, 0, 1, 1], [], []>} : vector<16x16xf32>, vector<16x16xf32>, vector<16x16xf32> -> vector<16x16xf32>
    %cst_125 = arith.constant 4.000000e+00 : f32
    %298 = vector.broadcast %cst_125 : f32 to vector<16x16xf32>
    %299 = arith.divf %297, %298 : vector<16x16xf32>
    %cst_126 = arith.constant dense<0xFF800000> : vector<16xf32>
    %300 = vector.multi_reduction <maximumf>, %299, %cst_126 [1] : vector<16x16xf32> to vector<16xf32>
    %301 = vector.shape_cast %300 : vector<16xf32> to vector<16x1xf32>
    %302 = vector.broadcast %301 : vector<16x1xf32> to vector<16x16xf32>
    %303 = arith.subf %299, %302 : vector<16x16xf32>
    %304 = math.exp %303 : vector<16x16xf32>
    %cst_127 = arith.constant dense<0.000000e+00> : vector<16xf32>
    %305 = vector.multi_reduction <add>, %304, %cst_127 [1] : vector<16x16xf32> to vector<16xf32>
    %306 = vector.shape_cast %305 : vector<16xf32> to vector<16x1xf32>
    %307 = tpu.reciprocal %306 {approx = true} : vector<16x1xf32> -> vector<16x1xf32>
    %308 = vector.broadcast %307 : vector<16x1xf32> to vector<16x16xf32>
    %309 = arith.mulf %304, %308 : vector<16x16xf32>
    %cst_128 = arith.constant dense<0xFF800000> : vector<16xf32>
    %310 = vector.multi_reduction <maximumf>, %309, %cst_128 [1] : vector<16x16xf32> to vector<16xf32>
    %311 = vector.shape_cast %310 : vector<16xf32> to vector<16x1xf32>
    %312 = vector.broadcast %311 : vector<16x1xf32> to vector<16x16xf32>
    %313 = arith.subf %309, %312 : vector<16x16xf32>
    %314 = math.exp %313 : vector<16x16xf32>
    %cst_129 = arith.constant dense<0.000000e+00> : vector<16xf32>
    %315 = vector.multi_reduction <add>, %314, %cst_129 [1] : vector<16x16xf32> to vector<16xf32>
    %316 = vector.shape_cast %315 : vector<16xf32> to vector<16x1xf32>
    %317 = tpu.reciprocal %316 {approx = true} : vector<16x1xf32> -> vector<16x1xf32>
    %318 = vector.broadcast %317 : vector<16x1xf32> to vector<16x16xf32>
    %319 = arith.mulf %314, %318 : vector<16x16xf32>
    %cst_130 = arith.constant dense<0.000000e+00> : vector<16x16xf32>
    %320 = tpu.matmul %319, %295, %cst_130 {dimension_numbers = #tpu.dot_dimension_numbers<[1], [0], [0], [1], [0, 0, 1, 1], [], []>} : vector<16x16xf32>, vector<16x16xf32>, vector<16x16xf32> -> vector<16x16xf32>
    %321 = tpu.concatenate %292, %320 in 1 : vector<16x16xf32>, vector<16x16xf32> -> vector<16x32xf32>
    %322 = vector.extract_strided_slice %250 {offsets = [16, 0], sizes = [16, 16], strides = [1, 1]} : vector<32x32xf32> to vector<16x16xf32>
    %323 = vector.extract_strided_slice %257 {offsets = [16, 0], sizes = [16, 16], strides = [1, 1]} : vector<32x32xf32> to vector<16x16xf32>
    %324 = vector.extract_strided_slice %264 {offsets = [16, 0], sizes = [16, 16], strides = [1, 1]} : vector<32x32xf32> to vector<16x16xf32>
    %325 = tpu.transpose %323, [1, 0] : vector<16x16xf32> -> vector<16x16xf32>
    %cst_131 = arith.constant dense<0.000000e+00> : vector<16x16xf32>
    %326 = tpu.matmul %322, %325, %cst_131 {dimension_numbers = #tpu.dot_dimension_numbers<[1], [0], [0], [1], [0, 0, 1, 1], [], []>} : vector<16x16xf32>, vector<16x16xf32>, vector<16x16xf32> -> vector<16x16xf32>
    %cst_132 = arith.constant 4.000000e+00 : f32
    %327 = vector.broadcast %cst_132 : f32 to vector<16x16xf32>
    %328 = arith.divf %326, %327 : vector<16x16xf32>
    %cst_133 = arith.constant dense<0xFF800000> : vector<16xf32>
    %329 = vector.multi_reduction <maximumf>, %328, %cst_133 [1] : vector<16x16xf32> to vector<16xf32>
    %330 = vector.shape_cast %329 : vector<16xf32> to vector<16x1xf32>
    %331 = vector.broadcast %330 : vector<16x1xf32> to vector<16x16xf32>
    %332 = arith.subf %328, %331 : vector<16x16xf32>
    %333 = math.exp %332 : vector<16x16xf32>
    %cst_134 = arith.constant dense<0.000000e+00> : vector<16xf32>
    %334 = vector.multi_reduction <add>, %333, %cst_134 [1] : vector<16x16xf32> to vector<16xf32>
    %335 = vector.shape_cast %334 : vector<16xf32> to vector<16x1xf32>
    %336 = tpu.reciprocal %335 {approx = true} : vector<16x1xf32> -> vector<16x1xf32>
    %337 = vector.broadcast %336 : vector<16x1xf32> to vector<16x16xf32>
    %338 = arith.mulf %333, %337 : vector<16x16xf32>
    %cst_135 = arith.constant dense<0xFF800000> : vector<16xf32>
    %339 = vector.multi_reduction <maximumf>, %338, %cst_135 [1] : vector<16x16xf32> to vector<16xf32>
    %340 = vector.shape_cast %339 : vector<16xf32> to vector<16x1xf32>
    %341 = vector.broadcast %340 : vector<16x1xf32> to vector<16x16xf32>
    %342 = arith.subf %338, %341 : vector<16x16xf32>
    %343 = math.exp %342 : vector<16x16xf32>
    %cst_136 = arith.constant dense<0.000000e+00> : vector<16xf32>
    %344 = vector.multi_reduction <add>, %343, %cst_136 [1] : vector<16x16xf32> to vector<16xf32>
    %345 = vector.shape_cast %344 : vector<16xf32> to vector<16x1xf32>
    %346 = tpu.reciprocal %345 {approx = true} : vector<16x1xf32> -> vector<16x1xf32>
    %347 = vector.broadcast %346 : vector<16x1xf32> to vector<16x16xf32>
    %348 = arith.mulf %343, %347 : vector<16x16xf32>
    %cst_137 = arith.constant dense<0.000000e+00> : vector<16x16xf32>
    %349 = tpu.matmul %348, %324, %cst_137 {dimension_numbers = #tpu.dot_dimension_numbers<[1], [0], [0], [1], [0, 0, 1, 1], [], []>} : vector<16x16xf32>, vector<16x16xf32>, vector<16x16xf32> -> vector<16x16xf32>
    %350 = vector.extract_strided_slice %250 {offsets = [16, 16], sizes = [16, 16], strides = [1, 1]} : vector<32x32xf32> to vector<16x16xf32>
    %351 = vector.extract_strided_slice %257 {offsets = [16, 16], sizes = [16, 16], strides = [1, 1]} : vector<32x32xf32> to vector<16x16xf32>
    %352 = vector.extract_strided_slice %264 {offsets = [16, 16], sizes = [16, 16], strides = [1, 1]} : vector<32x32xf32> to vector<16x16xf32>
    %353 = tpu.transpose %351, [1, 0] : vector<16x16xf32> -> vector<16x16xf32>
    %cst_138 = arith.constant dense<0.000000e+00> : vector<16x16xf32>
    %354 = tpu.matmul %350, %353, %cst_138 {dimension_numbers = #tpu.dot_dimension_numbers<[1], [0], [0], [1], [0, 0, 1, 1], [], []>} : vector<16x16xf32>, vector<16x16xf32>, vector<16x16xf32> -> vector<16x16xf32>
    %cst_139 = arith.constant 4.000000e+00 : f32
    %355 = vector.broadcast %cst_139 : f32 to vector<16x16xf32>
    %356 = arith.divf %354, %355 : vector<16x16xf32>
    %cst_140 = arith.constant dense<0xFF800000> : vector<16xf32>
    %357 = vector.multi_reduction <maximumf>, %356, %cst_140 [1] : vector<16x16xf32> to vector<16xf32>
    %358 = vector.shape_cast %357 : vector<16xf32> to vector<16x1xf32>
    %359 = vector.broadcast %358 : vector<16x1xf32> to vector<16x16xf32>
    %360 = arith.subf %356, %359 : vector<16x16xf32>
    %361 = math.exp %360 : vector<16x16xf32>
    %cst_141 = arith.constant dense<0.000000e+00> : vector<16xf32>
    %362 = vector.multi_reduction <add>, %361, %cst_141 [1] : vector<16x16xf32> to vector<16xf32>
    %363 = vector.shape_cast %362 : vector<16xf32> to vector<16x1xf32>
    %364 = tpu.reciprocal %363 {approx = true} : vector<16x1xf32> -> vector<16x1xf32>
    %365 = vector.broadcast %364 : vector<16x1xf32> to vector<16x16xf32>
    %366 = arith.mulf %361, %365 : vector<16x16xf32>
    %cst_142 = arith.constant dense<0xFF800000> : vector<16xf32>
    %367 = vector.multi_reduction <maximumf>, %366, %cst_142 [1] : vector<16x16xf32> to vector<16xf32>
    %368 = vector.shape_cast %367 : vector<16xf32> to vector<16x1xf32>
    %369 = vector.broadcast %368 : vector<16x1xf32> to vector<16x16xf32>
    %370 = arith.subf %366, %369 : vector<16x16xf32>
    %371 = math.exp %370 : vector<16x16xf32>
    %cst_143 = arith.constant dense<0.000000e+00> : vector<16xf32>
    %372 = vector.multi_reduction <add>, %371, %cst_143 [1] : vector<16x16xf32> to vector<16xf32>
    %373 = vector.shape_cast %372 : vector<16xf32> to vector<16x1xf32>
    %374 = tpu.reciprocal %373 {approx = true} : vector<16x1xf32> -> vector<16x1xf32>
    %375 = vector.broadcast %374 : vector<16x1xf32> to vector<16x16xf32>
    %376 = arith.mulf %371, %375 : vector<16x16xf32>
    %cst_144 = arith.constant dense<0.000000e+00> : vector<16x16xf32>
    %377 = tpu.matmul %376, %352, %cst_144 {dimension_numbers = #tpu.dot_dimension_numbers<[1], [0], [0], [1], [0, 0, 1, 1], [], []>} : vector<16x16xf32>, vector<16x16xf32>, vector<16x16xf32> -> vector<16x16xf32>
    %378 = tpu.concatenate %349, %377 in 1 : vector<16x16xf32>, vector<16x16xf32> -> vector<16x32xf32>
    %379 = tpu.concatenate %321, %378 in 0 : vector<16x32xf32>, vector<16x32xf32> -> vector<32x32xf32>
    %c1_145 = arith.constant 1 : index
    %c0_146 = arith.constant 0 : index
    %c0_147 = arith.constant 0 : index
    %380 = vector.load %arg8[%c1_145, %c0_146, %c0_147] : memref<2x32x32xf32, #tpu.memory_space<vmem>>, vector<1x32x32xf32>
    %381 = vector.shape_cast %380 : vector<1x32x32xf32> to vector<32x32xf32>
    %cst_148 = arith.constant dense<0.000000e+00> : vector<32x32xf32>
    %382 = tpu.matmul %379, %381, %cst_148 {dimension_numbers = #tpu.dot_dimension_numbers<[1], [0], [0], [1], [0, 0, 1, 1], [], []>} : vector<32x32xf32>, vector<32x32xf32>, vector<32x32xf32> -> vector<32x32xf32>
    %c1_149 = arith.constant 1 : index
    %c0_150 = arith.constant 0 : index
    %c0_151 = arith.constant 0 : index
    %383 = vector.load %arg9[%c1_149, %c0_150, %c0_151] : memref<2x1x32xf32, #tpu.memory_space<vmem>>, vector<1x1x32xf32>
    %384 = vector.shape_cast %383 : vector<1x1x32xf32> to vector<1x32xf32>
    %385 = vector.broadcast %384 : vector<1x32xf32> to vector<32x32xf32>
    %386 = arith.addf %382, %385 : vector<32x32xf32>
    %387 = arith.addf %386, %243 : vector<32x32xf32>
    %c1_152 = arith.constant 1 : index
    %c0_153 = arith.constant 0 : index
    %c0_154 = arith.constant 0 : index
    %388 = vector.load %arg10[%c1_152, %c0_153, %c0_154] : memref<2x1x32xf32, #tpu.memory_space<vmem>>, vector<1x1x32xf32>
    %389 = vector.shape_cast %388 : vector<1x1x32xf32> to vector<1x32xf32>
    %c1_155 = arith.constant 1 : index
    %c0_156 = arith.constant 0 : index
    %c0_157 = arith.constant 0 : index
    %390 = vector.load %arg11[%c1_155, %c0_156, %c0_157] : memref<2x1x32xf32, #tpu.memory_space<vmem>>, vector<1x1x32xf32>
    %391 = vector.shape_cast %390 : vector<1x1x32xf32> to vector<1x32xf32>
    %cst_158 = arith.constant dense<0.000000e+00> : vector<32xf32>
    %392 = vector.multi_reduction <add>, %387, %cst_158 [1] : vector<32x32xf32> to vector<32xf32>
    %393 = vector.shape_cast %392 : vector<32xf32> to vector<32x1xf32>
    %cst_159 = arith.constant 3.200000e+01 : f32
    %394 = vector.broadcast %cst_159 : f32 to vector<32x1xf32>
    %395 = arith.divf %393, %394 : vector<32x1xf32>
    %396 = vector.broadcast %395 : vector<32x1xf32> to vector<32x32xf32>
    %397 = arith.subf %387, %396 : vector<32x32xf32>
    %398 = arith.mulf %397, %397 : vector<32x32xf32>
    %cst_160 = arith.constant dense<0.000000e+00> : vector<32xf32>
    %399 = vector.multi_reduction <add>, %398, %cst_160 [1] : vector<32x32xf32> to vector<32xf32>
    %400 = vector.shape_cast %399 : vector<32xf32> to vector<32x1xf32>
    %cst_161 = arith.constant 3.200000e+01 : f32
    %401 = vector.broadcast %cst_161 : f32 to vector<32x1xf32>
    %402 = arith.divf %400, %401 : vector<32x1xf32>
    %403 = vector.broadcast %395 : vector<32x1xf32> to vector<32x32xf32>
    %404 = arith.subf %387, %403 : vector<32x32xf32>
    %cst_162 = arith.constant 9.99999974E-6 : f32
    %405 = vector.broadcast %cst_162 : f32 to vector<32x1xf32>
    %406 = arith.addf %402, %405 : vector<32x1xf32>
    %407 = math.rsqrt %406 : vector<32x1xf32>
    %408 = vector.broadcast %407 : vector<32x1xf32> to vector<32x32xf32>
    %409 = arith.mulf %404, %408 : vector<32x32xf32>
    %410 = vector.broadcast %389 : vector<1x32xf32> to vector<32x32xf32>
    %411 = arith.mulf %409, %410 : vector<32x32xf32>
    %412 = vector.broadcast %391 : vector<1x32xf32> to vector<32x32xf32>
    %413 = arith.addf %411, %412 : vector<32x32xf32>
    %414 = arith.mulf %413, %1 : vector<32x32xf32>
    %415 = vector.extract_strided_slice %414 {offsets = [0, 0], sizes = [16, 32], strides = [1, 1]} : vector<32x32xf32> to vector<16x32xf32>
    %cst_163 = arith.constant 0.000000e+00 : f32
    %416 = vector.broadcast %cst_163 : f32 to vector<4x32xf32>
    %417 = tpu.concatenate %416, %415, %416 in 0 : vector<4x32xf32>, vector<16x32xf32>, vector<4x32xf32> -> vector<24x32xf32>
    %418 = vector.extract_strided_slice %417 {offsets = [0, 0], sizes = [16, 32], strides = [1, 1]} : vector<24x32xf32> to vector<16x32xf32>
    %419 = vector.extract_strided_slice %417 {offsets = [1, 0], sizes = [16, 32], strides = [1, 1]} : vector<24x32xf32> to vector<16x32xf32>
    %420 = vector.extract_strided_slice %417 {offsets = [2, 0], sizes = [16, 32], strides = [1, 1]} : vector<24x32xf32> to vector<16x32xf32>
    %421 = vector.extract_strided_slice %417 {offsets = [3, 0], sizes = [16, 32], strides = [1, 1]} : vector<24x32xf32> to vector<16x32xf32>
    %422 = vector.extract_strided_slice %417 {offsets = [4, 0], sizes = [16, 32], strides = [1, 1]} : vector<24x32xf32> to vector<16x32xf32>
    %423 = vector.extract_strided_slice %417 {offsets = [5, 0], sizes = [16, 32], strides = [1, 1]} : vector<24x32xf32> to vector<16x32xf32>
    %424 = vector.extract_strided_slice %417 {offsets = [6, 0], sizes = [16, 32], strides = [1, 1]} : vector<24x32xf32> to vector<16x32xf32>
    %425 = vector.extract_strided_slice %417 {offsets = [7, 0], sizes = [16, 32], strides = [1, 1]} : vector<24x32xf32> to vector<16x32xf32>
    %426 = vector.extract_strided_slice %417 {offsets = [8, 0], sizes = [16, 32], strides = [1, 1]} : vector<24x32xf32> to vector<16x32xf32>
    %427 = tpu.concatenate %418, %419, %420, %421, %422, %423, %424, %425, %426 in 1 : vector<16x32xf32>, vector<16x32xf32>, vector<16x32xf32>, vector<16x32xf32>, vector<16x32xf32>, vector<16x32xf32>, vector<16x32xf32>, vector<16x32xf32>, vector<16x32xf32> -> vector<16x288xf32>
    %428 = vector.extract_strided_slice %414 {offsets = [16, 0], sizes = [16, 32], strides = [1, 1]} : vector<32x32xf32> to vector<16x32xf32>
    %cst_164 = arith.constant 0.000000e+00 : f32
    %429 = vector.broadcast %cst_164 : f32 to vector<4x32xf32>
    %430 = tpu.concatenate %429, %428, %429 in 0 : vector<4x32xf32>, vector<16x32xf32>, vector<4x32xf32> -> vector<24x32xf32>
    %431 = vector.extract_strided_slice %430 {offsets = [0, 0], sizes = [16, 32], strides = [1, 1]} : vector<24x32xf32> to vector<16x32xf32>
    %432 = vector.extract_strided_slice %430 {offsets = [1, 0], sizes = [16, 32], strides = [1, 1]} : vector<24x32xf32> to vector<16x32xf32>
    %433 = vector.extract_strided_slice %430 {offsets = [2, 0], sizes = [16, 32], strides = [1, 1]} : vector<24x32xf32> to vector<16x32xf32>
    %434 = vector.extract_strided_slice %430 {offsets = [3, 0], sizes = [16, 32], strides = [1, 1]} : vector<24x32xf32> to vector<16x32xf32>
    %435 = vector.extract_strided_slice %430 {offsets = [4, 0], sizes = [16, 32], strides = [1, 1]} : vector<24x32xf32> to vector<16x32xf32>
    %436 = vector.extract_strided_slice %430 {offsets = [5, 0], sizes = [16, 32], strides = [1, 1]} : vector<24x32xf32> to vector<16x32xf32>
    %437 = vector.extract_strided_slice %430 {offsets = [6, 0], sizes = [16, 32], strides = [1, 1]} : vector<24x32xf32> to vector<16x32xf32>
    %438 = vector.extract_strided_slice %430 {offsets = [7, 0], sizes = [16, 32], strides = [1, 1]} : vector<24x32xf32> to vector<16x32xf32>
    %439 = vector.extract_strided_slice %430 {offsets = [8, 0], sizes = [16, 32], strides = [1, 1]} : vector<24x32xf32> to vector<16x32xf32>
    %440 = tpu.concatenate %431, %432, %433, %434, %435, %436, %437, %438, %439 in 1 : vector<16x32xf32>, vector<16x32xf32>, vector<16x32xf32>, vector<16x32xf32>, vector<16x32xf32>, vector<16x32xf32>, vector<16x32xf32>, vector<16x32xf32>, vector<16x32xf32> -> vector<16x288xf32>
    %441 = tpu.concatenate %427, %440 in 0 : vector<16x288xf32>, vector<16x288xf32> -> vector<32x288xf32>
    %c1_165 = arith.constant 1 : index
    %c0_166 = arith.constant 0 : index
    %c0_167 = arith.constant 0 : index
    %442 = vector.load %arg12[%c1_165, %c0_166, %c0_167] : memref<2x288x64xf32, #tpu.memory_space<vmem>>, vector<1x288x64xf32>
    %443 = vector.shape_cast %442 : vector<1x288x64xf32> to vector<288x64xf32>
    %cst_168 = arith.constant dense<0.000000e+00> : vector<32x64xf32>
    %444 = tpu.matmul %441, %443, %cst_168 {dimension_numbers = #tpu.dot_dimension_numbers<[1], [0], [0], [1], [0, 0, 1, 1], [], []>} : vector<32x288xf32>, vector<288x64xf32>, vector<32x64xf32> -> vector<32x64xf32>
    %c1_169 = arith.constant 1 : index
    %c0_170 = arith.constant 0 : index
    %c0_171 = arith.constant 0 : index
    %445 = vector.load %arg13[%c1_169, %c0_170, %c0_171] : memref<2x1x64xf32, #tpu.memory_space<vmem>>, vector<1x1x64xf32>
    %446 = vector.shape_cast %445 : vector<1x1x64xf32> to vector<1x64xf32>
    %447 = vector.broadcast %446 : vector<1x64xf32> to vector<32x64xf32>
    %448 = arith.addf %444, %447 : vector<32x64xf32>
    %cst_172 = arith.constant 0.000000e+00 : f32
    %449 = vector.broadcast %cst_172 : f32 to vector<32x64xf32>
    %450 = arith.maximumf %448, %449 : vector<32x64xf32>
    %c1_173 = arith.constant 1 : index
    %c0_174 = arith.constant 0 : index
    %c0_175 = arith.constant 0 : index
    %451 = vector.load %arg14[%c1_173, %c0_174, %c0_175] : memref<2x64x32xf32, #tpu.memory_space<vmem>>, vector<1x64x32xf32>
    %452 = vector.shape_cast %451 : vector<1x64x32xf32> to vector<64x32xf32>
    %cst_176 = arith.constant dense<0.000000e+00> : vector<32x32xf32>
    %453 = tpu.matmul %450, %452, %cst_176 {dimension_numbers = #tpu.dot_dimension_numbers<[1], [0], [0], [1], [0, 0, 1, 1], [], []>} : vector<32x64xf32>, vector<64x32xf32>, vector<32x32xf32> -> vector<32x32xf32>
    %c1_177 = arith.constant 1 : index
    %c0_178 = arith.constant 0 : index
    %c0_179 = arith.constant 0 : index
    %454 = vector.load %arg15[%c1_177, %c0_178, %c0_179] : memref<2x1x32xf32, #tpu.memory_space<vmem>>, vector<1x1x32xf32>
    %455 = vector.shape_cast %454 : vector<1x1x32xf32> to vector<1x32xf32>
    %456 = vector.broadcast %455 : vector<1x32xf32> to vector<32x32xf32>
    %457 = arith.addf %453, %456 : vector<32x32xf32>
    %458 = arith.addf %457, %414 : vector<32x32xf32>
    %c1_180 = arith.constant 1 : index
    %c0_181 = arith.constant 0 : index
    %c0_182 = arith.constant 0 : index
    %459 = vector.load %arg16[%c1_180, %c0_181, %c0_182] : memref<2x1x32xf32, #tpu.memory_space<vmem>>, vector<1x1x32xf32>
    %460 = vector.shape_cast %459 : vector<1x1x32xf32> to vector<1x32xf32>
    %c1_183 = arith.constant 1 : index
    %c0_184 = arith.constant 0 : index
    %c0_185 = arith.constant 0 : index
    %461 = vector.load %arg17[%c1_183, %c0_184, %c0_185] : memref<2x1x32xf32, #tpu.memory_space<vmem>>, vector<1x1x32xf32>
    %462 = vector.shape_cast %461 : vector<1x1x32xf32> to vector<1x32xf32>
    %cst_186 = arith.constant dense<0.000000e+00> : vector<32xf32>
    %463 = vector.multi_reduction <add>, %458, %cst_186 [1] : vector<32x32xf32> to vector<32xf32>
    %464 = vector.shape_cast %463 : vector<32xf32> to vector<32x1xf32>
    %cst_187 = arith.constant 3.200000e+01 : f32
    %465 = vector.broadcast %cst_187 : f32 to vector<32x1xf32>
    %466 = arith.divf %464, %465 : vector<32x1xf32>
    %467 = vector.broadcast %466 : vector<32x1xf32> to vector<32x32xf32>
    %468 = arith.subf %458, %467 : vector<32x32xf32>
    %469 = arith.mulf %468, %468 : vector<32x32xf32>
    %cst_188 = arith.constant dense<0.000000e+00> : vector<32xf32>
    %470 = vector.multi_reduction <add>, %469, %cst_188 [1] : vector<32x32xf32> to vector<32xf32>
    %471 = vector.shape_cast %470 : vector<32xf32> to vector<32x1xf32>
    %cst_189 = arith.constant 3.200000e+01 : f32
    %472 = vector.broadcast %cst_189 : f32 to vector<32x1xf32>
    %473 = arith.divf %471, %472 : vector<32x1xf32>
    %474 = vector.broadcast %466 : vector<32x1xf32> to vector<32x32xf32>
    %475 = arith.subf %458, %474 : vector<32x32xf32>
    %cst_190 = arith.constant 9.99999974E-6 : f32
    %476 = vector.broadcast %cst_190 : f32 to vector<32x1xf32>
    %477 = arith.addf %473, %476 : vector<32x1xf32>
    %478 = math.rsqrt %477 : vector<32x1xf32>
    %479 = vector.broadcast %478 : vector<32x1xf32> to vector<32x32xf32>
    %480 = arith.mulf %475, %479 : vector<32x32xf32>
    %481 = vector.broadcast %460 : vector<1x32xf32> to vector<32x32xf32>
    %482 = arith.mulf %480, %481 : vector<32x32xf32>
    %483 = vector.broadcast %462 : vector<1x32xf32> to vector<32x32xf32>
    %484 = arith.addf %482, %483 : vector<32x32xf32>
    %485 = arith.mulf %484, %1 : vector<32x32xf32>
    %c0_191 = arith.constant 0 : index
    %c0_192 = arith.constant 0 : index
    %486 = vector.load %arg18[%c0_191, %c0_192] : memref<32x32xf32, #tpu.memory_space<vmem>>, vector<32x32xf32>
    tpu.vector_store %arg18[%c0_191, %c0_192], %485 {strides = array<i32>} : memref<32x32xf32, #tpu.memory_space<vmem>>, vector<32x32xf32>,
    return
  }
}

</mosaic_0001>

<bundles_post_ra>
// kernel: decoder_forward.1
= control target key start
LH: loop header
LB: loop body
LE: loop exit
PB: predicated region body
PF: predicated region fallthrough
CT: control target
= control target key end

     0   :  { %s6557_s0 = inlined_call_operand.vmem [shape: f32[32,32], index: 0, kind: input, shape index: {}]   ;;  %s6558_s1 = inlined_call_operand.vmem [shape: f32[32,32], index: 1, kind: input, shape index: {}]   ;;  %s6559_s2 = inlined_call_operand.vmem [shape: f32[2,32,32], index: 2, kind: input, shape index: {}]   ;;  %s6560_s3 = inlined_call_operand.vmem [shape: f32[2,1,32], index: 3, kind: input, shape index: {}]   ;;  %s6561_s4 = inlined_call_operand.vmem [shape: f32[2,32,32], index: 4, kind: input, shape index: {}]   ;;  %s6562_s5 = inlined_call_operand.vmem [shape: f32[2,1,32], index: 5, kind: input, shape index: {}]   ;;  %s6563_s6 = inlined_call_operand.vmem [shape: f32[2,32,32], index: 6, kind: input, shape index: {}]   ;;  %s6564_s7 = inlined_call_operand.vmem [shape: f32[2,1,32], index: 7, kind: input, shape index: {}]   ;;  %s6565_s8 = inlined_call_operand.vmem [shape: f32[2,32,32], index: 8, kind: input, shape index: {}]   ;;  %s6566_s9 = inlined_call_operand.vmem [shape: f32[2,1,32], index: 9, kind: input, shape index: {}]   ;;  %s6567_s10 = inlined_call_operand.vmem [shape: f32[2,1,32], index: 10, kind: input, shape index: {}]   ;;  %s6568_s11 = inlined_call_operand.vmem [shape: f32[2,1,32], index: 11, kind: input, shape index: {}]   ;;  %s6569_s12 = inlined_call_operand.vmem [shape: f32[2,288,64], index: 12, kind: input, shape index: {}]   ;;  %s6570_s13 = inlined_call_operand.vmem [shape: f32[2,1,64], index: 13, kind: input, shape index: {}]   ;;  %s6571_s14 = inlined_call_operand.vmem [shape: f32[2,64,32], index: 14, kind: input, shape index: {}]   ;;  %s6572_s15 = inlined_call_operand.vmem [shape: f32[2,1,32], index: 15, kind: input, shape index: {}]   ;;  %s6573_s16 = inlined_call_operand.vmem [shape: f32[2,1,32], index: 16, kind: input, shape index: {}]   ;;  %s6574_s17 = inlined_call_operand.vmem [shape: f32[2,1,32], index: 17, kind: input, shape index: {}]   ;;  %s6575_s18 = inlined_call_operand.hbm [shape: f32[32,32], index: 18, kind: output, shape index: {}]  }
   0x1   :  { %6583 = sst [smem:[#allocation5_spill]] %s6557_s0 }
   0x2   :  { %6584 = sst [smem:[#allocation6_spill]] %s6558_s1 }
   0x3   :  { %6585 = sst [smem:[#allocation7_spill]] %s6559_s2 }
   0x4   :  { %s6586_s29 = sld [smem:[#allocation7_spill]]  ;;  %v180_v1 = vld [vmem:[%s6561_s4 + $0x18] sm:$0xff]  ;;  %v179_v3 = vld [vmem:[%s6561_s4 + $0x10] sm:$0xff]  ;;  %v178_v5 = vld [vmem:[%s6561_s4 + $0x8] sm:$0xff] }
   0x5   :  { %4579 = vmatprep.subr.mxu1 %v180_v1  ;;  %v177_v7 = vld [vmem:[%s6561_s4] sm:$0xff] }
   0x6   :  { %4580 = vmatpush3.msra.mxu1 %v180_v1 }
   0x7   :  { %4581 = vmatprep.subr.mxu1 %v179_v3 }
   0x8   :  { %4582 = vmatpush3.msra.mxu1 %v179_v3 }
   0xa   :  { %v71_v0 = vld [vmem:[%s6586_s29 + $0x18] sm:$0xff]  ;;  %v70_v2 = vld [vmem:[%s6586_s29 + $0x10] sm:$0xff]  ;;  %v69_v4 = vld [vmem:[%s6586_s29 + $0x8] sm:$0xff] }
   0xb   :  { %4565 = vmatprep.subr.mxu0 %v71_v0  ;;  %v68_v6 = vld [vmem:[%s6586_s29] sm:$0xff] }
   0xc   :  { %4566 = vmatpush3.msra.mxu0 %v71_v0 }
   0xd   :  { %4567 = vmatprep.subr.mxu0 %v70_v2 }
   0xe   :  { %4568 = vmatpush3.msra.mxu0 %v70_v2 }
   0xf   :  { %23 = vsyncpa [#allocation3], 0  ;;  %4569 = vmatprep.subr.mxu0 %v69_v4  ;;  %4583 = vmatprep.subr.mxu1 %v178_v5  ;;  %s6587_s19 = sld [smem:[#allocation5_spill]]  ;;  %vm79_vm0 = vcmask 261120   ;;  %v276_v12 = vld [vmem:[%s6563_s6 + $0x18] sm:$0xff]  ;;  %v275_v13 = vld [vmem:[%s6563_s6 + $0x10] sm:$0xff] }
  0x10   :  { %4570 = vmatpush3.msra.mxu0 %v69_v4  ;;  %4584 = vmatpush3.msra.mxu1 %v178_v5  ;;  %v274_v14 = vld [vmem:[%s6563_s6 + $0x8] sm:$0xff]  ;;  %v273_v15 = vld [vmem:[%s6563_s6] sm:$0xff]  ;;  %vm369_vm1 = vcmask 130048   ;;  %s5175_s2 = smov 112   ;;  %s5176_s25 = smov 16   ;;  %vm1464_vm2 = vcmask 1043456  }
  0x11   :  { %4571 = vmatprep.subr.mxu0 %v68_v6  ;;  %4585 = vmatprep.subr.mxu1 %v177_v7  ;;  %v4128_v16 = vld [vmem:[%s6562_s5] ss:$0 sm:$0xff]  ;;  %s6588_s26 = sld [smem:[#allocation6_spill]]  ;;  %vm1487_vm3 = vcmask 1045504   ;;  %vm1530_vm4 = vcmask 1041408   ;;  %vm1475_vm5 = vcmask 1046528  }
  0x12   :  { %4572 = vmatpush3.msra.mxu0 %v68_v6  ;;  %4586 = vmatpush3.msra.mxu1 %v177_v7  ;;  %v4123_v18 = vld [vmem:[%s6560_s3] ss:$0 sm:$0xff]  ;;  %vm1518_vm6 = vcmask 1042432   ;;  %vm1499_vm7 = vcmask 1044480   ;;  %vm1542_vm8 = vcmask 1040384   ;;  %s5177_s23 = smov 64  }
  0x13   :  { %4593 = vmatprep.subr.mxu0 %v276_v12  ;;  %v5377_v28 = vld [vmem:[%s6564_s7] ss:$0 sm:$0xff]  ;;  %s6581_s24 = smov 32   ;;  %s6579_s27 = smov 96   ;;  %vm1556_vm9 = vcmask 523264   ;;  %vm1559_vm10 = vcmask 785408  }
  0x14   :  { %s6589_s30 = smov 32  }
  0x15   :  { %v5305_v8 = vld [vmem:[%s6587_s19] sm:$0xff]  ;;  %v5310_v9 = vld [vmem:[%s6587_s19 + $0x8] sm:$0xff]  ;;  %v5317_v10 = vld [vmem:[%s6587_s19 + $0x10] sm:$0xff] }
  0x16   :  { %4573 = vmatprep.mubr.msk.f32.mxu0 %vm79_vm0, %v5305_v8  ;;  %4587 = vmatprep.mubr.msk.f32.mxu1 %vm79_vm0, %v5305_v8  ;;  %v5330_v11 = vld [vmem:[%s6587_s19 + $0x18] sm:$0xff] }
  0x17   :  { %4574 = vmatmul.mubr.msk.f32.vlgmr.msra.gmra.mxu0 %vm79_vm0, %v5310_v9  ;;  %4588 = vmatmul.mubr.msk.f32.vlgmr.msra.gmra.mxu1 %vm79_vm0, %v5310_v9 }
  0x18   :  { %4590 = vmatprep.mubr.msk.f32.mxu1 %vm79_vm0, %v5317_v10  ;;  %4576 = vmatprep.mubr.msk.f32.mxu0 %vm79_vm0, %v5317_v10 }
  0x19   :  { %4594 = vmatpush3.msra.mxu0 %v276_v12 }
  0x1a   :  { %4595 = vmatprep.subr.mxu0 %v275_v13 }
  0x1b   :  { %4591 = vmatmul.mubr.msk.f32.gmra.mxu1 %vm79_vm0, %v5330_v11  ;;  %4577 = vmatmul.mubr.msk.f32.gmra.mxu0 %vm79_vm0, %v5330_v11 }
  0x1c   :  { %4601 = vmatprep.mubr.msk.f32.mxu0 %vm79_vm0, %v5305_v8  ;;  %4596 = vmatpush3.msra.mxu0 %v275_v13 }
  0x1d   :  { %4597 = vmatprep.subr.mxu0 %v274_v14 }
  0x1e   :  { %4598 = vmatpush3.msra.mxu0 %v274_v14 }
  0x1f   :  { %4599 = vmatprep.subr.mxu0 %v273_v15 }
  0x20   :  { %4600 = vmatpush3.msra.mxu0 %v273_v15 }
  0x21   :  { %4602 = vmatmul.mubr.msk.f32.vlgmr.msra.gmra.mxu0 %vm79_vm0, %v5310_v9 }
  0x22   :  { %4604 = vmatprep.mubr.msk.f32.mxu0 %vm79_vm0, %v5317_v10 }
  0x25   :  { %4605 = vmatmul.mubr.msk.f32.gmra.mxu0 %vm79_vm0, %v5330_v11 }
  0xd7   :  { %v4575_v17 = vpop.f32.mrf.mxu0  ;;  %v4589_v19 = vpop.f32.mrf.mxu1 }
  0xd8   :  { %v260_v20 = vadd.f32 %v4589_v19, %v4128_v16  ;;  %v164_v25 = vadd.f32 %v4575_v17, %v4123_v18 }
  0xd9   :  { %v158_v21 = vpop.f32.mrf.mxu0  ;;  %v254_v22 = vpop.f32.mrf.mxu1 }
  0xda   :  { %v159_v23 = vadd.f32 %v4123_v18, %v158_v21  ;;  %v255_v24 = vadd.f32 %v4128_v16, %v254_v22  ;;  %591 = vrot.lane.b32.xlu0 %v260_v20, %s5175_s2  ;;  %4607 = vmatprep.subr.msk.mxu1 %vm369_vm1, %v260_v20 }
  0xdb   :  { %4608 = vmatpush3.xpose.msk.msra.mxu1 %vm369_vm1, %v260_v20  ;;  %v4578_v26 = vpop.f32.mrf.mxu0  ;;  %v4592_v36 = vpop.f32.mrf.mxu1 }
  0xdc   :  { %4609 = vmatprep.subr.msk.mxu1 %vm369_vm1, %v255_v24  ;;  %585 = vrot.lane.b32.xlu1 %v159_v23, %s5175_s2  ;;  %v5395_v38 = vadd.f32 %v4592_v36, %v4128_v16  ;;  %v5412_v44 = vadd.f32 %v4578_v26, %v4123_v18 }
  0xdd   :  { %4611 = vmatprep.mubr.msk.f32.mxu1 %vm369_vm1, %v159_v23  ;;  %v168_v27 = vpop.f32.mrf.mxu0  ;;  %v264_v40 = vpop.f32.mrf.mxu1 }
  0xde   :  { %589 = vrot.lane.b32.xlu0 %v255_v24, %s5175_s2  ;;  %v5399_v41 = vadd.f32 %v4123_v18, %v168_v27  ;;  %v5403_v42 = vadd.f32 %v4128_v16, %v264_v40 }
  0xdf   :  { %4610 = vmatpush3.xpose.msk.msra.mxu1 %vm369_vm1, %v255_v24 }
  0xe0   :  { %587 = vrot.lane.b32.xlu1 %v164_v25, %s5175_s2 }
  0xe1   :  { %v4603_v29 = vpop.f32.mrf.mxu0 }
  0xe2   :  { %4612 = vmatmul.mubr.msk.f32.vlgmr.msra.gmra.mxu1 %vm369_vm1, %v164_v25  ;;  %v5380_v30 = vadd.f32 %v4603_v29, %v5377_v28 }
  0xe3   :  { %v350_v31 = vpop.f32.mrf.mxu0 }
  0xe4   :  { %v5383_v32 = vadd.f32 %v5377_v28, %v350_v31  ;;  %4614 = vmatprep.subr.mxu1 %v5380_v30 }
  0xe5   :  { %4615 = vmatpush3.msra.mxu1 %v5380_v30  ;;  %v4606_v33 = vpop.f32.mrf.mxu0 }
  0xe6   :  { %v5388_v34 = vadd.f32 %v4606_v33, %v5377_v28  ;;  %4616 = vmatprep.subr.mxu1 %v5383_v32 }
  0xe7   :  { %4617 = vmatpush3.msra.mxu1 %v5383_v32  ;;  %v5420_v51 = vpop.f32.mrf.mxu0 }
 0x14c   :  { %v592_v35 = vpop.permute.xlu0 %591 }
 0x14d   :  { %4621 = vmatprep.subr.msk.mxu0 %vm369_vm1, %v592_v35 }
 0x14e   :  { %4622 = vmatpush3.xpose.msk.msra.mxu0 %vm369_vm1, %v592_v35  ;;  %v586_v37 = vpop.permute.xlu1 %585 }
 0x14f   :  { %4625 = vmatprep.mubr.msk.f32.mxu0 %vm369_vm1, %v586_v37 }
 0x150   :  { %v590_v39 = vpop.permute.xlu0 %589 }
 0x151   :  { %4623 = vmatprep.subr.msk.mxu0 %vm369_vm1, %v590_v39 }
 0x152   :  { %4624 = vmatpush3.xpose.msk.msra.mxu0 %vm369_vm1, %v590_v39  ;;  %v588_v43 = vpop.permute.xlu1 %587 }
 0x153   :  { %4635 = vmatprep.subr.msk.mxu0 %vm369_vm1, %v5395_v38 }
 0x155   :  { %4626 = vmatmul.mubr.msk.f32.vlgmr.msra.gmra.mxu0 %vm369_vm1, %v588_v43 }
 0x156   :  { %4636 = vmatpush3.xpose.msk.msra.mxu0 %vm369_vm1, %v5395_v38  ;;  %4639 = vmatprep.mubr.msk.f32.mxu0 %vm369_vm1, %v5399_v41 }
 0x157   :  { %4637 = vmatprep.subr.msk.mxu0 %vm369_vm1, %v5403_v42 }
 0x15a   :  { %4638 = vmatpush3.xpose.msk.msra.mxu0 %vm369_vm1, %v5403_v42 }
 0x15d   :  { %4640 = vmatmul.mubr.msk.f32.vlgmr.msra.gmra.mxu0 %vm369_vm1, %v5412_v44 }
 0x1a2   :  { %v4613_v45 = vpop.f32.mrf.mxu1 }
 0x1a3   :  { %v459_v46 = vmul.f32 0.25, %v4613_v45 }
 0x1a4   :  { %v448_v47 = vpop.f32.mrf.mxu1 }
 0x1a5   :  { %v458_v48 = vmul.f32 0.25, %v448_v47  ;;  %v463_v49 = vsel %vm369_vm1, %v459_v46, -inf }
 0x1a6   :  { %464 = vmax.xlane.f32.xlu1 %v463_v49 }
 0x1a7   :  { %v460_v50 = vsel %vm369_vm1, %v458_v48, -inf }
 0x1a8   :  { %461 = vmax.xlane.f32.xlu0 %v460_v50 }
 0x215   :  { %v4627_v52 = vpop.f32.mrf.mxu0 }
 0x216   :  { %v677_v55 = vmul.f32 0.25, %v4627_v52 }
 0x217   :  { %v667_v53 = vpop.f32.mrf.mxu0 }
 0x218   :  { %v676_v54 = vmul.f32 0.25, %v667_v53  ;;  %v681_v59 = vsel %vm369_vm1, %v677_v55, -inf }
 0x21a   :  { %v678_v56 = vsel %vm369_vm1, %v676_v54, -inf }
 0x21b   :  { %679 = vmax.xlane.f32.xlu0 %v678_v56 }
 0x21d   :  { %v4641_v57 = vpop.f32.mrf.mxu0 }
 0x21e   :  { %v909_v58 = vmul.f32 0.25, %v4641_v57 }
 0x21f   :  { %v899_v60 = vpop.f32.mrf.mxu0  ;;  %682 = vmax.xlane.f32.xlu0 %v681_v59 }
 0x220   :  { %v908_v61 = vmul.f32 0.25, %v899_v60  ;;  %v913_v62 = vsel %vm369_vm1, %v909_v58, -inf }
 0x222   :  { %v910_v63 = vsel %vm369_vm1, %v908_v61, -inf }
 0x223   :  { %911 = vmax.xlane.f32.xlu1 %v910_v63  ;;  %914 = vmax.xlane.f32.xlu0 %v913_v62 }
 0x22f   :  { %v465_v0 = vpop.xlane.xlu1 %464 }
 0x230   :  { %v467_v1 = vsub.f32 %v459_v46, %v465_v0 }
 0x231   :  { %v462_v2 = vpop.xlane.xlu0 %461 }
 0x232   :  { %v470_v3 = vmul.f32 1.442695, %v467_v1  ;;  %v466_v4 = vsub.f32 %v458_v48, %v462_v2 }
 0x234   :  { %4989 = vpow2.f32 %v470_v3  ;;  %v468_v5 = vmul.f32 1.442695, %v466_v4 }
 0x236   :  { %4991 = vpow2.f32 %v468_v5 }
 0x241   :  { %v4990_v6 = vpop.eup %4989 }
 0x242   :  { %v475_v7 = vsel %vm369_vm1, %v4990_v6, 0.0 }
 0x243   :  { %v4992_v12 = vpop.eup %4991  ;;  %476 = vadd.xlane.f32.xlu0 %v475_v7 }
 0x244   :  { %v472_v13 = vsel %vm369_vm1, %v4992_v12, 0.0 }
 0x245   :  { %473 = vadd.xlane.f32.xlu1 %v472_v13 }
 0x2a4   :  { %v680_v14 = vpop.xlane.xlu0 %679 }
 0x2a5   :  { %v684_v15 = vsub.f32 %v676_v54, %v680_v14 }
 0x2a7   :  { %v686_v16 = vmul.f32 1.442695, %v684_v15 }
 0x2a8   :  { %v683_v17 = vpop.xlane.xlu0 %682 }
 0x2a9   :  { %4993 = vpow2.f32 %v686_v16  ;;  %v685_v18 = vsub.f32 %v677_v55, %v683_v17 }
 0x2ab   :  { %v688_v19 = vmul.f32 1.442695, %v685_v18 }
 0x2ac   :  { %v912_v20 = vpop.xlane.xlu1 %911  ;;  %v915_v21 = vpop.xlane.xlu0 %914 }
 0x2ad   :  { %4995 = vpow2.f32 %v688_v19  ;;  %v916_v22 = vsub.f32 %v908_v61, %v912_v20  ;;  %v917_v23 = vsub.f32 %v909_v58, %v915_v21 }
 0x2af   :  { %v918_v24 = vmul.f32 1.442695, %v916_v22  ;;  %v920_v25 = vmul.f32 1.442695, %v917_v23 }
 0x2b1   :  { %4997 = vpow2.f32 %v918_v24 }
 0x2b2   :  { %4999 = vpow2.f32 %v920_v25 }
 0x2b6   :  { %v4994_v26 = vpop.eup %4993 }
 0x2b7   :  { %v690_v27 = vsel %vm369_vm1, %v4994_v26, 0.0 }
 0x2b8   :  { %691 = vadd.xlane.f32.xlu1 %v690_v27 }
 0x2ba   :  { %v4996_v29 = vpop.eup %4995 }
 0x2bb   :  { %v693_v31 = vsel %vm369_vm1, %v4996_v29, 0.0 }
 0x2bc   :  { %694 = vadd.xlane.f32.xlu0 %v693_v31 }
 0x2be   :  { %v4998_v33 = vpop.eup %4997 }
 0x2bf   :  { %v5000_v35 = vpop.eup %4999  ;;  %v922_v36 = vsel %vm369_vm1, %v4998_v33, 0.0 }
 0x2c0   :  { %923 = vadd.xlane.f32.xlu1 %v922_v36  ;;  %v925_v37 = vsel %vm369_vm1, %v5000_v35, 0.0 }
 0x2c1   :  { %926 = vadd.xlane.f32.xlu0 %v925_v37 }
 0x2cc   :  { %v477_v39 = vpop.xlane.xlu0 %476 }
 0x2cd   :  { %5001 = vrcp.f32 %v477_v39 }
 0x2ce   :  { %v474_v40 = vpop.xlane.xlu1 %473 }
 0x2cf   :  { %5003 = vrcp.f32 %v474_v40 }
 0x2da   :  { %v5002_v43 = vpop.eup %5001 }
 0x2db   :  { %v481_v45 = vmul.f32 %v5002_v43, %v4990_v6 }
 0x2dc   :  { %v5004_v46 = vpop.eup %5003 }
 0x2dd   :  { %v485_v47 = vsel %vm369_vm1, %v481_v45, -inf  ;;  %v480_v48 = vmul.f32 %v5004_v46, %v4992_v12 }
 0x2de   :  { %486 = vmax.xlane.f32.xlu0 %v485_v47 }
 0x2df   :  { %v482_v49 = vsel %vm369_vm1, %v480_v48, -inf }
 0x2e0   :  { %483 = vmax.xlane.f32.xlu1 %v482_v49 }
 0x341   :  { %v692_v50 = vpop.xlane.xlu1 %691 }
 0x342   :  { %5005 = vrcp.f32 %v692_v50 }
 0x345   :  { %v695_v52 = vpop.xlane.xlu0 %694 }
 0x346   :  { %5007 = vrcp.f32 %v695_v52 }
 0x349   :  { %v924_v53 = vpop.xlane.xlu1 %923 }
 0x34a   :  { %5009 = vrcp.f32 %v924_v53  ;;  %v927_v54 = vpop.xlane.xlu0 %926 }
 0x34b   :  { %5011 = vrcp.f32 %v927_v54 }
 0x34f   :  { %v5006_v55 = vpop.eup %5005 }
 0x350   :  { %v698_v56 = vmul.f32 %v5006_v55, %v4994_v26 }
 0x352   :  { %v700_v57 = vsel %vm369_vm1, %v698_v56, -inf }
 0x353   :  { %v5008_v58 = vpop.eup %5007  ;;  %701 = vmax.xlane.f32.xlu1 %v700_v57 }
 0x354   :  { %v699_v59 = vmul.f32 %v5008_v58, %v4996_v29 }
 0x356   :  { %v703_v60 = vsel %vm369_vm1, %v699_v59, -inf }
 0x357   :  { %v5010_v61 = vpop.eup %5009  ;;  %704 = vmax.xlane.f32.xlu0 %v703_v60 }
 0x358   :  { %v5012_v62 = vpop.eup %5011  ;;  %v930_v63 = vmul.f32 %v5010_v61, %v4998_v33 }
 0x359   :  { %v931_v0 = vmul.f32 %v5012_v62, %v5000_v35 }
 0x35a   :  { %v932_v1 = vsel %vm369_vm1, %v930_v63, -inf }
 0x35b   :  { %933 = vmax.xlane.f32.xlu1 %v932_v1  ;;  %v935_v2 = vsel %vm369_vm1, %v931_v0, -inf }
 0x35c   :  { %936 = vmax.xlane.f32.xlu0 %v935_v2 }
 0x367   :  { %v487_v3 = vpop.xlane.xlu0 %486 }
 0x368   :  { %v489_v4 = vsub.f32 %v481_v45, %v487_v3 }
 0x369   :  { %v484_v6 = vpop.xlane.xlu1 %483 }
 0x36a   :  { %v492_v5 = vmul.f32 1.442695, %v489_v4  ;;  %v488_v7 = vsub.f32 %v480_v48, %v484_v6 }
 0x36c   :  { %5013 = vpow2.f32 %v492_v5  ;;  %726 = vrot.lane.b32.xlu1 %v5380_v30, %s5175_s2  ;;  %v490_v14 = vmul.f32 1.442695, %v488_v7 }
 0x36e   :  { %5015 = vpow2.f32 %v490_v14 }
 0x379   :  { %v5014_v12 = vpop.eup %5013 }
 0x37a   :  { %v497_v13 = vsel %vm369_vm1, %v5014_v12, 0.0 }
 0x37b   :  { %498 = vadd.xlane.f32.xlu0 %v497_v13  ;;  %v5016_v15 = vpop.eup %5015 }
 0x37c   :  { %v494_v16 = vsel %vm369_vm1, %v5016_v15, 0.0 }
 0x390   :  { %495 = vadd.xlane.f32.xlu1 %v494_v16 }
 0x3dc   :  { %v702_v17 = vpop.xlane.xlu1 %701 }
 0x3dd   :  { %v706_v18 = vsub.f32 %v698_v56, %v702_v17  ;;  %v5462_v56 = vadd.f32 %v5377_v28, %v5420_v51 }
 0x3df   :  { %v708_v19 = vmul.f32 1.442695, %v706_v18 }
 0x3e0   :  { %v705_v20 = vpop.xlane.xlu0 %704 }
 0x3e1   :  { %5017 = vpow2.f32 %v708_v19  ;;  %v707_v21 = vsub.f32 %v699_v59, %v705_v20 }
 0x3e3   :  { %v710_v22 = vmul.f32 1.442695, %v707_v21 }
 0x3e4   :  { %v934_v30 = vpop.xlane.xlu1 %933 }
 0x3e5   :  { %5019 = vpow2.f32 %v710_v22  ;;  %v937_v23 = vpop.xlane.xlu0 %936  ;;  %v938_v37 = vsub.f32 %v930_v63, %v934_v30 }
 0x3e6   :  { %v939_v24 = vsub.f32 %v931_v0, %v937_v23 }
 0x3e7   :  { %v940_v39 = vmul.f32 1.442695, %v938_v37 }
 0x3e8   :  { %v942_v25 = vmul.f32 1.442695, %v939_v24  ;;  %v727_v26 = vpop.permute.xlu1 %726 }
 0x3e9   :  { %4628 = vmatprep.subr.mxu1 %v727_v26 }
 0x3ea   :  { %5021 = vpow2.f32 %v942_v25 }
 0x3eb   :  { %5023 = vpow2.f32 %v940_v39 }
 0x3ee   :  { %v5018_v27 = vpop.eup %5017 }
 0x3ef   :  { %v712_v29 = vsel %vm369_vm1, %v5018_v27, 0.0 }
 0x3f0   :  { %713 = vadd.xlane.f32.xlu1 %v712_v29 }
 0x3f2   :  { %v5020_v31 = vpop.eup %5019 }
 0x3f3   :  { %v715_v33 = vsel %vm369_vm1, %v5020_v31, 0.0 }
 0x3f4   :  { %716 = vadd.xlane.f32.xlu0 %v715_v33 }
 0x3f7   :  { %v5022_v35 = vpop.eup %5021 }
 0x3f8   :  { %v947_v36 = vsel %vm369_vm1, %v5022_v35, 0.0  ;;  %v5024_v45 = vpop.eup %5023 }
 0x3f9   :  { %948 = vadd.xlane.f32.xlu0 %v947_v36 }
 0x401   :  { %1041 = vrot.lane.b32.xlu1 %v5395_v38, %s5175_s2  ;;  %v944_v38 = vsel %vm369_vm1, %v5024_v45, 0.0 }
 0x404   :  { %v499_v40 = vpop.xlane.xlu0 %498 }
 0x405   :  { %1039 = vrot.lane.b32.xlu1 %v5403_v42, %s5175_s2  ;;  %5025 = vrcp.f32 %v499_v40 }
 0x40f   :  { %724 = vrot.lane.b32.xlu0 %v5383_v32, %s5175_s2 }
 0x412   :  { %v5026_v46 = vpop.eup %5025 }
 0x413   :  { %1035 = vrot.lane.b32.xlu0 %v5399_v41, %s5175_s2  ;;  %v503_v42 = vmul.f32 %v5026_v46, %v5014_v12 }
 0x419   :  { %v496_v43 = vpop.xlane.xlu1 %495 }
 0x41a   :  { %5027 = vrcp.f32 %v496_v43 }
 0x427   :  { %v5028_v47 = vpop.eup %5027 }
 0x428   :  { %v502_v48 = vmul.f32 %v5028_v47, %v5016_v15 }
 0x429   :  { %945 = vadd.xlane.f32.xlu1 %v944_v38 }
 0x42a   :  { %4618 = vmatprep.mubr.msk.f32.mxu1 %vm369_vm1, %v502_v48 }
 0x42b   :  { %4619 = vmatmul.mubr.msk.f32.vlgmr.msra.gmra.mxu1 %vm369_vm1, %v503_v42 }
 0x42c   :  { %4629 = vmatpush3.msra.mxu1 %v727_v26 }
 0x43a   :  { %1037 = vrot.lane.b32.xlu1 %v5412_v44, %s5175_s2 }
 0x479   :  { %v714_v32 = vpop.xlane.xlu1 %713 }
 0x47a   :  { %5029 = vrcp.f32 %v714_v32 }
 0x47d   :  { %v717_v41 = vpop.xlane.xlu0 %716  ;;  %v1042_v44 = vpop.permute.xlu1 %1041 }
 0x47e   :  { %5031 = vrcp.f32 %v717_v41 }
 0x481   :  { %v1040_v57 = vpop.permute.xlu1 %1039 }
 0x482   :  { %v949_v49 = vpop.xlane.xlu0 %948 }
 0x483   :  { %5033 = vrcp.f32 %v949_v49 }
 0x486   :  { %v725_v50 = vpop.permute.xlu0 %724 }
 0x487   :  { %v5030_v52 = vpop.eup %5029  ;;  %4630 = vmatprep.subr.mxu1 %v725_v50 }
 0x488   :  { %4631 = vmatpush3.msra.mxu1 %v725_v50  ;;  %v720_v53 = vmul.f32 %v5030_v52, %v5018_v27 }
 0x489   :  { %4642 = vmatprep.subr.mxu1 %v5388_v34 }
 0x48a   :  { %4632 = vmatprep.mubr.msk.f32.mxu1 %vm369_vm1, %v720_v53  ;;  %v1036_v51 = vpop.permute.xlu0 %1035 }
 0x48b   :  { %v5032_v54 = vpop.eup %5031 }
 0x48c   :  { %v721_v55 = vmul.f32 %v5032_v54, %v5020_v31 }
 0x48e   :  { %4633 = vmatmul.mubr.msk.f32.vlgmr.msra.gmra.mxu1 %vm369_vm1, %v721_v55 }
 0x48f   :  { %4643 = vmatpush3.msra.mxu1 %v5388_v34 }
 0x490   :  { %4644 = vmatprep.subr.mxu1 %v5462_v56  ;;  %v5034_v59 = vpop.eup %5033 }
 0x491   :  { %4645 = vmatpush3.msra.mxu1 %v5462_v56  ;;  %v953_v28 = vmul.f32 %v5034_v59, %v5022_v35 }
 0x492   :  { %4649 = vmatprep.subr.msk.mxu1 %vm369_vm1, %v1042_v44 }
 0x4b2   :  { %v946_v58 = vpop.xlane.xlu1 %945 }
 0x4b3   :  { %5035 = vrcp.f32 %v946_v58  ;;  %v1271_v58 = vld [vmem:[%s6565_s8] sm:$0xff] }
 0x4b6   :  { %v1038_v62 = vpop.permute.xlu1 %1037 }
 0x4c0   :  { %v5036_v60 = vpop.eup %5035 }
 0x4c1   :  { %v952_v61 = vmul.f32 %v5036_v60, %v5024_v45 }
 0x4c3   :  { %4646 = vmatprep.mubr.msk.f32.mxu1 %vm369_vm1, %v952_v61 }
 0x4c4   :  { %4647 = vmatmul.mubr.msk.f32.vlgmr.msra.gmra.mxu1 %vm369_vm1, %v953_v28 }
 0x4c5   :  { %4650 = vmatpush3.xpose.msk.msra.mxu1 %vm369_vm1, %v1042_v44  ;;  %4653 = vmatprep.mubr.msk.f32.mxu1 %vm369_vm1, %v1036_v51 }
 0x4c6   :  { %4651 = vmatprep.subr.msk.mxu1 %vm369_vm1, %v1040_v57 }
 0x4c9   :  { %4652 = vmatpush3.xpose.msk.msra.mxu1 %vm369_vm1, %v1040_v57  ;;  %v1272_v57 = vld [vmem:[%s6565_s8 + $0x8] sm:$0xff] }
 0x4cc   :  { %4654 = vmatmul.mubr.msk.f32.vlgmr.msra.gmra.mxu1 %vm369_vm1, %v1038_v62 }
 0x4eb   :  { %v5476_v63 = vpop.f32.mrf.mxu1 }
 0x4ed   :  { %v5478_v0 = vpop.f32.mrf.mxu1 }
 0x54e   :  { %v4634_v1 = vpop.f32.mrf.mxu1 }
 0x550   :  { %v802_v2 = vpop.f32.mrf.mxu1 }
 0x584   :  { %v5480_v3 = vpop.f32.mrf.mxu1 }
 0x586   :  { %v5482_v4 = vpop.f32.mrf.mxu1 }
 0x58c   :  { %v4655_v5 = vpop.f32.mrf.mxu1 }
 0x58d   :  { %v1127_v6 = vmul.f32 0.25, %v4655_v5 }
 0x58e   :  { %v1117_v7 = vpop.f32.mrf.mxu1 }
 0x58f   :  { %v1126_v12 = vmul.f32 0.25, %v1117_v7  ;;  %v1131_v13 = vsel %vm369_vm1, %v1127_v6, -inf }
 0x590   :  { %1132 = vmax.xlane.f32.xlu1 %v1131_v13 }
 0x591   :  { %v1128_v14 = vsel %vm369_vm1, %v1126_v12, -inf }
 0x592   :  { %1129 = vmax.xlane.f32.xlu0 %v1128_v14 }
 0x619   :  { %v1133_v15 = vpop.xlane.xlu1 %1132 }
 0x61a   :  { %v1135_v16 = vsub.f32 %v1127_v6, %v1133_v15 }
 0x61b   :  { %v1130_v17 = vpop.xlane.xlu0 %1129 }
 0x61c   :  { %v1134_v18 = vsub.f32 %v1126_v12, %v1130_v17  ;;  %v1138_v19 = vmul.f32 1.442695, %v1135_v16 }
 0x61e   :  { %v1136_v20 = vmul.f32 1.442695, %v1134_v18 }
 0x620   :  { %5037 = vpow2.f32 %v1136_v20 }
 0x621   :  { %5039 = vpow2.f32 %v1138_v19 }
 0x62d   :  { %v5038_v21 = vpop.eup %5037 }
 0x62e   :  { %v1140_v22 = vsel %vm369_vm1, %v5038_v21, 0.0  ;;  %v5040_v30 = vpop.eup %5039 }
 0x62f   :  { %1141 = vadd.xlane.f32.xlu0 %v1140_v22  ;;  %v1143_v23 = vsel %vm369_vm1, %v5040_v30, 0.0 }
 0x633   :  { %1144 = vadd.xlane.f32.xlu0 %v1143_v23 }
 0x6b8   :  { %v1142_v24 = vpop.xlane.xlu0 %1141 }
 0x6b9   :  { %5041 = vrcp.f32 %v1142_v24 }
 0x6bc   :  { %v1145_v25 = vpop.xlane.xlu0 %1144 }
 0x6bd   :  { %5043 = vrcp.f32 %v1145_v25 }
 0x6c6   :  { %v5042_v26 = vpop.eup %5041 }
 0x6c7   :  { %v1148_v27 = vmul.f32 %v5042_v26, %v5038_v21 }
 0x6c9   :  { %v1150_v29 = vsel %vm369_vm1, %v1148_v27, -inf }
 0x6ca   :  { %v5044_v31 = vpop.eup %5043  ;;  %1151 = vmax.xlane.f32.xlu1 %v1150_v29 }
 0x6cb   :  { %v1149_v33 = vmul.f32 %v5044_v31, %v5040_v30  ;;  %v1698_v31 = vld [vmem:[%s6569_s12 + $0x108] sm:$0xff] }
 0x6cd   :  { %v1153_v35 = vsel %vm369_vm1, %v1149_v33, -inf }
 0x6ce   :  { %1154 = vmax.xlane.f32.xlu0 %v1153_v35  ;;  %v1696_v35 = vld [vmem:[%s6569_s12 + $0xf8] sm:$0xff] }
 0x6cf   :  { %4373 = vmatprep.subr.mxu1 %v1696_v35  ;;  %v1668_v35 = vld [vmem:[%s6569_s12 + $0x18] sm:$0xff] }
 0x753   :  { %v1152_v36 = vpop.xlane.xlu1 %1151 }
 0x754   :  { %v1156_v37 = vsub.f32 %v1148_v27, %v1152_v36  ;;  %v1680_v36 = vld [vmem:[%s6569_s12 + $0x78] sm:$0xff] }
 0x755   :  { %4374 = vmatpush3.msra.mxu1 %v1680_v36  ;;  %v1683_v36 = vld [vmem:[%s6569_s12 + $0x90] sm:$0xff] }
 0x756   :  { %v1158_v39 = vmul.f32 1.442695, %v1156_v37  ;;  %v1695_v37 = vld [vmem:[%s6569_s12 + $0xf0] sm:$0xff] }
 0x757   :  { %v1155_v40 = vpop.xlane.xlu0 %1154  ;;  %4375 = vmatprep.subr.mxu1 %v1695_v37 }
 0x758   :  { %5045 = vpow2.f32 %v1158_v39  ;;  %v1157_v43 = vsub.f32 %v1149_v33, %v1155_v40  ;;  %v1697_v33 = vld [vmem:[%s6569_s12 + $0x100] sm:$0xff]  ;;  %v1679_v39 = vld [vmem:[%s6569_s12 + $0x70] sm:$0xff]  ;;  %v1694_v40 = vld [vmem:[%s6569_s12 + $0xe8] sm:$0xff] }
 0x759   :  { %4376 = vmatpush3.msra.mxu1 %v1679_v39 }
 0x75a   :  { %v1160_v45 = vmul.f32 1.442695, %v1157_v43  ;;  %v1678_v43 = vld [vmem:[%s6569_s12 + $0x68] sm:$0xff]  ;;  %4377 = vmatprep.subr.mxu1 %v1694_v40  ;;  %v1667_v40 = vld [vmem:[%s6569_s12 + $0x10] sm:$0xff] }
 0x75b   :  { %4378 = vmatpush3.msra.mxu1 %v1678_v43 }
 0x75c   :  { %5047 = vpow2.f32 %v1160_v45  ;;  %v1693_v45 = vld [vmem:[%s6569_s12 + $0xe0] sm:$0xff] }
 0x75d   :  { %4379 = vmatprep.subr.mxu1 %v1693_v45 }
 0x765   :  { %v5046_v46 = vpop.eup %5045 }
 0x766   :  { %v1162_v47 = vsel %vm369_vm1, %v5046_v46, 0.0 }
 0x767   :  { %1163 = vadd.xlane.f32.xlu1 %v1162_v47  ;;  %v1692_v47 = vld [vmem:[%s6569_s12 + $0xd8] sm:$0xff] }
 0x769   :  { %v5048_v38 = vpop.eup %5047 }
 0x76a   :  { %v1165_v48 = vsel %vm369_vm1, %v5048_v38, 0.0 }
 0x76b   :  { %1166 = vadd.xlane.f32.xlu0 %v1165_v48  ;;  %v1691_v48 = vld [vmem:[%s6569_s12 + $0xd0] sm:$0xff] }
 0x778   :  { %1176 = vrot.lane.b32.xlu1 %v5388_v34, %s5175_s2  ;;  %v1274_v34 = vld [vmem:[%s6565_s8 + $0x18] sm:$0xff] }
 0x77c   :  { %813 = vrot.lane.b32.xlu1 %v802_v2, %s5176_s25 }
 0x780   :  { %815 = vrot.lane.b32.xlu1 %v4634_v1, %s5176_s25 }
 0x781   :  { %1174 = vrot.lane.b32.xlu0 %v5462_v56, %s5175_s2  ;;  %v1273_v56 = vld [vmem:[%s6565_s8 + $0x10] sm:$0xff] }
 0x7f0   :  { %v1164_v42 = vpop.xlane.xlu1 %1163 }
 0x7f1   :  { %5049 = vrcp.f32 %v1164_v42  ;;  %v1675_v42 = vld [vmem:[%s6569_s12 + $0x50] sm:$0xff] }
 0x7f4   :  { %v1177_v32 = vpop.permute.xlu1 %1176  ;;  %v1167_v41 = vpop.xlane.xlu0 %1166 }
 0x7f5   :  { %5051 = vrcp.f32 %v1167_v41  ;;  %4656 = vmatprep.subr.mxu0 %v1177_v32 }
 0x7f6   :  { %4657 = vmatpush3.msra.mxu0 %v1177_v32 }
 0x7f8   :  { %v1175_v49 = vpop.permute.xlu0 %1174  ;;  %v814_v54 = vpop.permute.xlu1 %813 }
 0x7f9   :  { %4658 = vmatprep.subr.mxu0 %v1175_v49  ;;  %v819_v44 = vsel %vm369_vm1, %v5478_v0, %v814_v54  ;;  %v4162_v0 = vld [vmem:[%s6566_s9] ss:$0 sm:$0xff] }
 0x7fa   :  { %4659 = vmatpush3.msra.mxu0 %v1175_v49 }
 0x7fb   :  { %4663 = vmatprep.subr.mxu0 %v1274_v34 }
 0x7fc   :  { %v816_v59 = vpop.permute.xlu1 %815 }
 0x7fd   :  { %v820_v60 = vsel %vm369_vm1, %v5476_v63, %v816_v59 }
 0x7fe   :  { %v5050_v50 = vpop.eup %5049 }
 0x7ff   :  { %v1170_v52 = vmul.f32 %v5050_v50, %v5046_v46  ;;  %v1677_v46 = vld [vmem:[%s6569_s12 + $0x60] sm:$0xff] }
 0x800   :  { %4380 = vmatpush3.msra.mxu1 %v1677_v46 }
 0x801   :  { %4660 = vmatprep.mubr.msk.f32.mxu0 %vm369_vm1, %v1170_v52  ;;  %4381 = vmatprep.subr.mxu1 %v1692_v47 }
 0x802   :  { %v5052_v53 = vpop.eup %5051 }
 0x803   :  { %v1171_v55 = vmul.f32 %v5052_v53, %v5048_v38  ;;  %v1676_v38 = vld [vmem:[%s6569_s12 + $0x58] sm:$0xff] }
 0x804   :  { %4382 = vmatpush3.msra.mxu1 %v1676_v38  ;;  %v1682_v38 = vld [vmem:[%s6569_s12 + $0x88] sm:$0xff] }
 0x805   :  { %4661 = vmatmul.mubr.msk.f32.vlgmr.msra.gmra.mxu0 %vm369_vm1, %v1171_v55  ;;  %4383 = vmatprep.subr.mxu1 %v1691_v48 }
 0x806   :  { %4664 = vmatpush3.msra.mxu0 %v1274_v34  ;;  %4671 = vmatprep.mubr.msk.f32.mxu0 %vm79_vm0, %v819_v44 }
 0x807   :  { %4665 = vmatprep.subr.mxu0 %v1273_v56  ;;  %4384 = vmatpush3.msra.mxu1 %v1675_v42 }
 0x808   :  { %4666 = vmatpush3.msra.mxu0 %v1273_v56 }
 0x809   :  { %4667 = vmatprep.subr.mxu0 %v1272_v57 }
 0x80a   :  { %4668 = vmatpush3.msra.mxu0 %v1272_v57 }
 0x80b   :  { %4669 = vmatprep.subr.mxu0 %v1271_v58 }
 0x80c   :  { %4670 = vmatpush3.msra.mxu0 %v1271_v58 }
 0x80d   :  { %4672 = vmatmul.mubr.msk.f32.vlgmr.msra.gmra.mxu0 %vm79_vm0, %v820_v60 }
 0x8c5   :  { %v4662_v61 = vpop.f32.mrf.mxu0 }
 0x8c6   :  { %1265 = vrot.lane.b32.xlu1 %v4662_v61, %s5176_s25 }
 0x8c7   :  { %v1252_v28 = vpop.f32.mrf.mxu0 }
 0x8c8   :  { %1263 = vrot.lane.b32.xlu0 %v1252_v28, %s5176_s25 }
 0x8cd   :  { %v4673_v51 = vpop.f32.mrf.mxu0 }
 0x8ce   :  { %v1366_v2 = vadd.f32 %v4673_v51, %v4162_v0 }
 0x8cf   :  { %v1360_v62 = vpop.f32.mrf.mxu0 }
 0x8d0   :  { %v1361_v1 = vadd.f32 %v4162_v0, %v1360_v62  ;;  %v1380_v63 = vadd.f32 %v1366_v2, %v5310_v9  ;;  %v5609_v62 = vld [vmem:[%s6567_s10] ss:$0 sm:$0xff] }
 0x8d2   :  { %v1379_v5 = vadd.f32 %v1361_v1, %v5305_v8  ;;  %v1388_v7 = vsel %vm79_vm0, %v1380_v63, 0.0  ;;  %v5615_v1 = vld [vmem:[%s6568_s11] ss:$0 sm:$0xff] }
 0x8d4   :  { %v1385_v6 = vsel %vm79_vm0, %v1379_v5, 0.0 }
 0x8e7   :  { %1386 = vadd.xlane.f32.xlu0 %v1385_v6 }
 0x8ea   :  { %1389 = vadd.xlane.f32.xlu1 %v1388_v7  ;;  %v1674_v7 = vld [vmem:[%s6569_s12 + $0x48] sm:$0xff] }
 0x938   :  { %v1266_v12 = vpop.permute.xlu1 %1265 }
 0x939   :  { %v1270_v15 = vsel %vm369_vm1, %v5480_v3, %v1266_v12  ;;  %v1689_v12 = vld [vmem:[%s6569_s12 + $0xc0] sm:$0xff] }
 0x93a   :  { %v1264_v13 = vpop.permute.xlu0 %1263 }
 0x93b   :  { %v1269_v14 = vsel %vm369_vm1, %v5482_v4, %v1264_v13  ;;  %v1673_v13 = vld [vmem:[%s6569_s12 + $0x40] sm:$0xff] }
 0x93c   :  { %4674 = vmatprep.mubr.msk.f32.mxu0 %vm79_vm0, %v1269_v14 }
 0x93d   :  { %4675 = vmatmul.mubr.msk.f32.gmra.mxu0 %vm79_vm0, %v1270_v15  ;;  %v1688_v15 = vld [vmem:[%s6569_s12 + $0xb8] sm:$0xff] }
 0x970   :  { %v1387_v8 = vpop.xlane.xlu0 %1386 }
 0x971   :  { %v1398_v9 = vmul.f32 0.03125, %v1387_v8 }
 0x973   :  { %v5533_v16 = vsub.f32 %v1379_v5, %v1398_v9  ;;  %v1390_v19 = vpop.xlane.xlu1 %1389  ;;  %v5621_v5 = vld [vmem:[%s6588_s26] sm:$0xff] }
 0x974   :  { %v1399_v21 = vmul.f32 0.03125, %v1390_v19  ;;  %v1671_v19 = vld [vmem:[%s6569_s12 + $0x30] sm:$0xff] }
 0x975   :  { %v1406_v17 = vmul.f32 %v5533_v16, %v5533_v16 }
 0x976   :  { %v5539_v23 = vsub.f32 %v1380_v63, %v1399_v21  ;;  %v1690_v63 = vld [vmem:[%s6569_s12 + $0xc8] sm:$0xff] }
 0x977   :  { %v1410_v18 = vsel %vm79_vm0, %v1406_v17, 0.0  ;;  %4385 = vmatprep.subr.mxu1 %v1690_v63  ;;  %v1687_v17 = vld [vmem:[%s6569_s12 + $0xb0] sm:$0xff] }
 0x978   :  { %1411 = vadd.xlane.f32.xlu1 %v1410_v18  ;;  %v1407_v27 = vmul.f32 %v5539_v23, %v5539_v23  ;;  %4386 = vmatpush3.msra.mxu1 %v1674_v7 }
 0x979   :  { %4387 = vmatprep.subr.mxu1 %v1689_v12 }
 0x97a   :  { %v1413_v29 = vsel %vm79_vm0, %v1407_v27, 0.0  ;;  %4388 = vmatpush3.msra.mxu1 %v1673_v13 }
 0x97b   :  { %4389 = vmatprep.subr.mxu1 %v1688_v15 }
 0x9fd   :  { %v4676_v20 = vpop.f32.mrf.mxu0 }
 0x9fe   :  { %v1376_v22 = vadd.f32 %v4676_v20, %v4162_v0  ;;  %v5656_v20 = vld [vmem:[%s6588_s26 + $0x8] sm:$0xff] }
 0x9ff   :  { %v1370_v4 = vpop.f32.mrf.mxu0 }
 0xa00   :  { %v1371_v3 = vadd.f32 %v4162_v0, %v1370_v4  ;;  %v1382_v25 = vadd.f32 %v1376_v22, %v5330_v11  ;;  %v1699_v11 = vld [vmem:[%s6569_s12 + $0x110] sm:$0xff]  ;;  %v1686_v4 = vld [vmem:[%s6569_s12 + $0xa8] sm:$0xff] }
 0xa01   :  { %v1412_v32 = vpop.xlane.xlu1 %1411 }
 0xa02   :  { %v1381_v30 = vadd.f32 %v1371_v3, %v5317_v10  ;;  %v1394_v26 = vsel %vm79_vm0, %v1382_v25, 0.0  ;;  %v1700_v10 = vld [vmem:[%s6569_s12 + $0x118] sm:$0xff]  ;;  %v1422_v41 = vmul.f32 0.03125, %v1412_v32  ;;  %v1670_v3 = vld [vmem:[%s6569_s12 + $0x28] sm:$0xff] }
 0xa03   :  { %4677 = vmatprep.subr.mxu0 %v1700_v10 }
 0xa04   :  { %v1391_v24 = vsel %vm79_vm0, %v1381_v30, 0.0  ;;  %4678 = vmatpush3.msra.mxu0 %v1700_v10  ;;  %v1426_v49 = vadd.f32 1e-05, %v1422_v41 }
 0xa05   :  { %1392 = vadd.xlane.f32.xlu0 %v1391_v24  ;;  %4679 = vmatprep.subr.mxu0 %v1699_v11  ;;  %v1669_v24 = vld [vmem:[%s6569_s12 + $0x20] sm:$0xff] }
 0xa06   :  { %4680 = vmatpush3.msra.mxu0 %v1699_v11  ;;  %5053 = vrsqrt.f32 %v1426_v49  ;;  %v1666_v49 = vld [vmem:[%s6569_s12 + $0x8] sm:$0xff] }
 0xa07   :  { %4681 = vmatprep.subr.mxu0 %v1698_v31 }
 0xa08   :  { %4682 = vmatpush3.msra.mxu0 %v1698_v31 }
 0xa09   :  { %1395 = vadd.xlane.f32.xlu0 %v1394_v26  ;;  %4683 = vmatprep.subr.mxu0 %v1697_v33 }
 0xa0a   :  { %4684 = vmatpush3.msra.mxu0 %v1697_v33 }
 0xa0d   :  { %1414 = vadd.xlane.f32.xlu0 %v1413_v29  ;;  %v1684_v29 = vld [vmem:[%s6569_s12 + $0x98] sm:$0xff] }
 0xa13   :  { %v5054_v57 = vpop.eup %5053 }
 0xa14   :  { %v1434_v61 = vmul.f32 %v5054_v57, %v5533_v16  ;;  %v1672_v16 = vld [vmem:[%s6569_s12 + $0x38] sm:$0xff] }
 0xa15   :  { %4390 = vmatpush3.msra.mxu1 %v1672_v16 }
 0xa16   :  { %v1444_v0 = vmul.f32 %v5609_v62, %v1434_v61  ;;  %4391 = vmatprep.subr.mxu1 %v1687_v17 }
 0xa17   :  { %4392 = vmatpush3.msra.mxu1 %v1671_v19 }
 0xa18   :  { %v1454_v2 = vadd.f32 %v5615_v1, %v1444_v0  ;;  %4393 = vmatprep.subr.mxu1 %v1686_v4 }
 0xa19   :  { %4394 = vmatpush3.msra.mxu1 %v1670_v3 }
 0xa1a   :  { %v5627_v6 = vmul.f32 %v1454_v2, %v5621_v5 }
 0xa1c   :  { %v1465_v9 = vrot.slane %v5627_v6, 4 }
 0xa1e   :  { %v5663_v22 = vsel %vm1464_vm2, 0.0, %v1465_v9 }
 0xa1f   :  { %v1531_v26 = vrot.slane %v5663_v22, 6  ;;  %v1476_v27 = vrot.slane %v5663_v22, 1  ;;  %v1519_v11 = vrot.slane %v5663_v22, 5  ;;  %v1500_v31 = vrot.slane %v5663_v22, 3 }
 0xa20   :  { %v1543_v33 = vrot.slane %v5663_v22, 7 }
 0xa8e   :  { %v1393_v34 = vpop.xlane.xlu0 %1392 }
 0xa8f   :  { %v1400_v50 = vmul.f32 0.03125, %v1393_v34 }
 0xa91   :  { %v5595_v52 = vsub.f32 %v1381_v30, %v1400_v50  ;;  %v1685_v30 = vld [vmem:[%s6569_s12 + $0xa0] sm:$0xff] }
 0xa92   :  { %v1396_v53 = vpop.xlane.xlu0 %1395  ;;  %4395 = vmatprep.subr.mxu1 %v1685_v30 }
 0xa93   :  { %v1401_v54 = vmul.f32 0.03125, %v1396_v53  ;;  %v1408_v55 = vmul.f32 %v5595_v52, %v5595_v52  ;;  %4396 = vmatpush3.msra.mxu1 %v1669_v24 }
 0xa94   :  { %4397 = vmatprep.subr.mxu1 %v1684_v29 }
 0xa95   :  { %v5599_v56 = vsub.f32 %v1382_v25, %v1401_v54  ;;  %v1416_v44 = vsel %vm79_vm0, %v1408_v55, 0.0  ;;  %v1488_v25 = vrot.slane %v5663_v22, 2  ;;  %4398 = vmatpush3.msra.mxu1 %v1668_v35  ;;  %v1681_v55 = vld [vmem:[%s6569_s12 + $0x80] sm:$0xff] }
 0xa96   :  { %1417 = vadd.xlane.f32.xlu1 %v1416_v44  ;;  %v1415_v58 = vpop.xlane.xlu0 %1414  ;;  %4399 = vmatprep.subr.mxu1 %v1683_v36 }
 0xa97   :  { %v1423_v59 = vmul.f32 0.03125, %v1415_v58  ;;  %v1409_v60 = vmul.f32 %v5599_v56, %v5599_v56  ;;  %4400 = vmatpush3.msra.mxu1 %v1667_v40 }
 0xa98   :  { %4401 = vmatprep.subr.mxu1 %v1682_v38 }
 0xa99   :  { %v1427_v28 = vadd.f32 1e-05, %v1423_v59  ;;  %v1419_v51 = vsel %vm79_vm0, %v1409_v60, 0.0  ;;  %4402 = vmatpush3.msra.mxu1 %v1666_v49  ;;  %v1665_v59 = vld [vmem:[%s6569_s12] sm:$0xff] }
 0xa9a   :  { %1420 = vadd.xlane.f32.xlu0 %v1419_v51  ;;  %4403 = vmatprep.subr.mxu1 %v1681_v55 }
 0xa9b   :  { %5055 = vrsqrt.f32 %v1427_v28  ;;  %4404 = vmatpush3.msra.mxu1 %v1665_v59 }
 0xaa8   :  { %v5056_v14 = vpop.eup %5055 }
 0xaa9   :  { %v1435_v8 = vmul.f32 %v5056_v14, %v5539_v23 }
 0xaab   :  { %v1445_v18 = vmul.f32 %v5609_v62, %v1435_v8 }
 0xaad   :  { %v1455_v21 = vadd.f32 %v5615_v1, %v1445_v18 }
 0xaaf   :  { %v5672_v23 = vmul.f32 %v1455_v21, %v5656_v20 }
 0xab1   :  { %v1466_v10 = vrot.slane %v5672_v23, 4 }
 0xab3   :  { %v5694_v37 = vsel %vm1464_vm2, %v1465_v9, %v1466_v10  ;;  %v5697_v39 = vsel %vm1464_vm2, %v1466_v10, 0.0 }
 0xab4   :  { %4685 = vmatprep.mubr.msk.f32.mxu0 %vm79_vm0, %v5694_v37  ;;  %v1489_v43 = vrot.slane %v5694_v37, 2  ;;  %v1532_v45 = vrot.slane %v5694_v37, 6  ;;  %v1477_v46 = vrot.slane %v5694_v37, 1  ;;  %v1520_v47 = vrot.slane %v5694_v37, 5 }
 0xab5   :  { %4686 = vmatmul.mubr.msk.f32.vlgmr.msra.gmra.mxu0 %vm79_vm0, %v5697_v39  ;;  %v1491_v48 = vrot.slane %v5697_v39, 2  ;;  %v1534_v42 = vrot.slane %v5697_v39, 6  ;;  %v1501_v32 = vrot.slane %v5694_v37, 3  ;;  %v1544_v41 = vrot.slane %v5694_v37, 7 }
 0xab6   :  { %v1490_v34 = vsel %vm1487_vm3, %v1488_v25, %v1489_v43  ;;  %v1533_v50 = vsel %vm1530_vm4, %v1531_v26, %v1532_v45  ;;  %v1478_v53 = vsel %vm1475_vm5, %v1476_v27, %v1477_v46  ;;  %v1521_v54 = vsel %vm1518_vm6, %v1519_v11, %v1520_v47 }
 0xab7   :  { %v4874_v44 = vpack.i.bf16 %v1490_v34, %v1533_v50  ;;  %v4869_v57 = vpack.i.bf16 %v1478_v53, %v1521_v54  ;;  %v1492_v58 = vsel %vm1487_vm3, %v1489_v43, %v1491_v48  ;;  %v1535_v60 = vsel %vm1530_vm4, %v1532_v45, %v1534_v42  ;;  %v5764_v54 = vld [vmem:[%s6588_s26 + $0x10] sm:$0xff] }
 0xab8   :  { %v1502_v61 = vsel %vm1499_vm7, %v1500_v31, %v1501_v32  ;;  %v1545_v28 = vsel %vm1542_vm8, %v1543_v33, %v1544_v41  ;;  %v1479_v51 = vrot.slane %v5697_v39, 1  ;;  %v1522_v0 = vrot.slane %v5697_v39, 5 }
 0xab9   :  { %4875 = vrot.lane.b32.xlu0 %v4874_v44, %s5177_s23  ;;  %4870 = vrot.lane.b32.xlu1 %v4869_v57, %s6581_s24  ;;  %v4889_v2 = vpack.i.bf16 %v1492_v58, %v1535_v60  ;;  %v4879_v63 = vpack.i.bf16 %v1502_v61, %v1545_v28  ;;  %v1503_v13 = vrot.slane %v5697_v39, 3  ;;  %v1546_v14 = vrot.slane %v5697_v39, 7 }
 0xaba   :  { %v1480_v7 = vsel %vm1475_vm5, %v1477_v46, %v1479_v51  ;;  %v1523_v12 = vsel %vm1518_vm6, %v1520_v47, %v1522_v0  ;;  %v1512_v30 = vrot.slane %v5694_v37, 4  ;;  %v1511_v26 = vrot.slane %v5663_v22, 4 }
 0xabb   :  { %v4884_v15 = vpack.i.bf16 %v1480_v7, %v1523_v12  ;;  %v1504_v8 = vsel %vm1499_vm7, %v1501_v32, %v1503_v13  ;;  %v1547_v9 = vsel %vm1542_vm8, %v1544_v41, %v1546_v14  ;;  %v1514_v38 = vrot.slane %v5697_v39, 4 }
 0xabc   :  { %v4894_v16 = vpack.i.bf16 %v1504_v8, %v1547_v9  ;;  %v1513_v31 = vsel %vm1464_vm2, %v1511_v26, %v1512_v30 }
 0xabd   :  { %4890 = vrot.lane.b32.xlu0 %v4889_v2, %s5177_s23  ;;  %4880 = vrot.lane.b32.xlu1 %v4879_v63, %s6579_s27  ;;  %v5779_v2 = vld [vmem:[%s6588_s26 + $0x18] sm:$0xff] }
 0xac1   :  { %4885 = vrot.lane.b32.xlu1 %v4884_v15, %s6581_s24 }
 0xac5   :  { %4895 = vrot.lane.b32.xlu1 %v4894_v16, %s6579_s27 }
 0xb1f   :  { %v1418_v17 = vpop.xlane.xlu1 %1417 }
 0xb20   :  { %v1424_v18 = vmul.f32 0.03125, %v1418_v17 }
 0xb22   :  { %v1428_v19 = vadd.f32 1e-05, %v1424_v18 }
 0xb23   :  { %v1421_v4 = vpop.xlane.xlu0 %1420 }
 0xb24   :  { %5057 = vrsqrt.f32 %v1428_v19  ;;  %v1425_v21 = vmul.f32 0.03125, %v1421_v4 }
 0xb26   :  { %v1429_v3 = vadd.f32 1e-05, %v1425_v21 }
 0xb28   :  { %5059 = vrsqrt.f32 %v1429_v3 }
 0xb2b   :  { %v4871_v24 = vpop.permute.xlu1 %4870  ;;  %v4876_v25 = vpop.permute.xlu0 %4875 }
 0xb2c   :  { %v4873_v27 = vunpack.i.h.bf16 %v4871_v24  ;;  %v4872_v29 = vunpack.i.l.bf16 %v4871_v24  ;;  %v4878_v10 = vunpack.i.h.bf16 %v4876_v25  ;;  %v4877_v11 = vunpack.i.l.bf16 %v4876_v25 }
 0xb2e   :  { %v1554_v33 = vsel %vm79_vm0, %v5663_v22, %v4873_v27  ;;  %v1562_v35 = vsel %vm79_vm0, %v1513_v31, %v4872_v29 }
 0xb2f   :  { %v4881_v36 = vpop.permute.xlu1 %4880  ;;  %v1564_v46 = vsel %vm1556_vm9, %v1562_v35, %v4877_v11  ;;  %v1557_v47 = vsel %vm1556_vm9, %v1554_v33, %v4878_v10  ;;  %v4891_v49 = vpop.permute.xlu0 %4890 }
 0xb30   :  { %v4883_v40 = vunpack.i.h.bf16 %v4881_v36  ;;  %v4882_v43 = vunpack.i.l.bf16 %v4881_v36  ;;  %v4893_v58 = vunpack.i.h.bf16 %v4891_v49  ;;  %v4892_v59 = vunpack.i.l.bf16 %v4891_v49 }
 0xb31   :  { %v5058_v45 = vpop.eup %5057 }
 0xb32   :  { %v1436_v48 = vmul.f32 %v5058_v45, %v5595_v52  ;;  %v1566_v42 = vsel %vm1559_vm10, %v1564_v46, %v4882_v43  ;;  %v1560_v22 = vsel %vm1559_vm10, %v1557_v47, %v4883_v40  ;;  %v1515_v52 = vsel %vm1464_vm2, %v1512_v30, %v1514_v38 }
 0xb33   :  { %v4886_v32 = vpop.permute.xlu1 %4885  ;;  %1780 = vmatprep.mubr.f32.mxu1 %v1566_v42 }
 0xb34   :  { %v1446_v41 = vmul.f32 %v5609_v62, %v1436_v48  ;;  %v4888_v34 = vunpack.i.h.bf16 %v4886_v32  ;;  %v4887_v50 = vunpack.i.l.bf16 %v4886_v32  ;;  %1781 = vmatmul.mubr.f32.vlgmr.msra.gmra.mxu1 %v1560_v22 }
 0xb35   :  { %v5060_v53 = vpop.eup %5059 }
 0xb36   :  { %v1456_v39 = vadd.f32 %v5615_v1, %v1446_v41  ;;  %v1437_v55 = vmul.f32 %v5060_v53, %v5599_v56  ;;  %v1563_v44 = vsel %vm79_vm0, %v1515_v52, %v4887_v50  ;;  %v1555_v57 = vsel %vm79_vm0, %v5694_v37, %v4888_v34 }
 0xb37   :  { %v4896_v60 = vpop.permute.xlu1 %4895  ;;  %v1565_v56 = vsel %vm1556_vm9, %v1563_v44, %v4892_v59  ;;  %v1558_v63 = vsel %vm1556_vm9, %v1555_v57, %v4893_v58  ;;  %v1895_v44 = vld [vmem:[%s6571_s14 + $0x28] sm:$0xff]  ;;  %v1894_v57 = vld [vmem:[%s6571_s14 + $0x20] sm:$0xff]  ;;  %v1893_v58 = vld [vmem:[%s6571_s14 + $0x18] sm:$0xff] }
 0xb38   :  { %v5773_v61 = vmul.f32 %v1456_v39, %v5764_v54  ;;  %v1447_v28 = vmul.f32 %v5609_v62, %v1437_v55  ;;  %v4898_v51 = vunpack.i.h.bf16 %v4896_v60  ;;  %v4897_v0 = vunpack.i.l.bf16 %v4896_v60  ;;  %v1897_v39 = vld [vmem:[%s6571_s14 + $0x38] sm:$0xff]  ;;  %v1896_v55 = vld [vmem:[%s6571_s14 + $0x30] sm:$0xff]  ;;  %v1891_v60 = vld [vmem:[%s6571_s14 + $0x8] sm:$0xff] }
 0xb39   :  { %4691 = vmatprep.subr.mxu0 %v1897_v39  ;;  %v1892_v59 = vld [vmem:[%s6571_s14 + $0x10] sm:$0xff] }
 0xb3a   :  { %v1570_v37 = vrot.slane %v5773_v61, 4  ;;  %v1457_v7 = vadd.f32 %v5615_v1, %v1447_v28  ;;  %v1567_v12 = vsel %vm1559_vm10, %v1565_v56, %v4897_v0  ;;  %v1561_v13 = vsel %vm1559_vm10, %v1558_v63, %v4898_v51  ;;  %4692 = vmatpush3.msra.mxu0 %v1897_v39  ;;  %v1890_v28 = vld [vmem:[%s6571_s14] sm:$0xff] }
 0xb3b   :  { %1785 = vmatprep.mubr.f32.mxu1 %v1567_v12  ;;  %4693 = vmatprep.subr.mxu0 %v1896_v55 }
 0xb3c   :  { %v5788_v62 = vmul.f32 %v1457_v7, %v5779_v2  ;;  %1786 = vmatmul.mubr.f32.gmra.mxu1 %v1561_v13  ;;  %v5791_v14 = vsel %vm1464_vm2, 0.0, %v1570_v37  ;;  %4694 = vmatpush3.msra.mxu0 %v1896_v55 }
 0xb3d   :  { %v1591_v8 = vrot.slane %v5791_v14, 2  ;;  %v1631_v9 = vrot.slane %v5791_v14, 6  ;;  %v1580_v1 = vrot.slane %v5791_v14, 1  ;;  %v1620_v16 = vrot.slane %v5791_v14, 5  ;;  %4695 = vmatprep.subr.mxu0 %v1895_v44 }
 0xb3e   :  { %v1571_v15 = vrot.slane %v5788_v62, 4  ;;  %v1602_v19 = vrot.slane %v5791_v14, 3  ;;  %v1642_v4 = vrot.slane %v5791_v14, 7  ;;  %4696 = vmatpush3.msra.mxu0 %v1895_v44  ;;  %v1613_v63 = vrot.slane %v5791_v14, 4 }
 0xb3f   :  { %4697 = vmatprep.subr.mxu0 %v1894_v57 }
 0xb40   :  { %v5799_v17 = vsel %vm1464_vm2, %v1570_v37, %v1571_v15  ;;  %v5802_v18 = vsel %vm1464_vm2, %v1571_v15, 0.0  ;;  %4698 = vmatpush3.msra.mxu0 %v1894_v57 }
 0xb41   :  { %4688 = vmatprep.mubr.msk.f32.mxu0 %vm79_vm0, %v5799_v17  ;;  %v1592_v21 = vrot.slane %v5799_v17, 2  ;;  %v1632_v3 = vrot.slane %v5799_v17, 6  ;;  %v1581_v30 = vrot.slane %v5799_v17, 1  ;;  %v1621_v24 = vrot.slane %v5799_v17, 5  ;;  %4699 = vmatprep.subr.mxu0 %v1893_v58 }
 0xb42   :  { %4689 = vmatmul.mubr.msk.f32.gmra.mxu0 %vm79_vm0, %v5802_v18  ;;  %v1583_v25 = vrot.slane %v5802_v18, 1  ;;  %v1623_v26 = vrot.slane %v5802_v18, 5  ;;  %v1603_v27 = vrot.slane %v5799_v17, 3  ;;  %v1643_v29 = vrot.slane %v5799_v17, 7 }
 0xb43   :  { %v1593_v10 = vsel %vm1487_vm3, %v1591_v8, %v1592_v21  ;;  %v1633_v11 = vsel %vm1530_vm4, %v1631_v9, %v1632_v3  ;;  %v1582_v31 = vsel %vm1475_vm5, %v1580_v1, %v1581_v30  ;;  %v1622_v33 = vsel %vm1518_vm6, %v1620_v16, %v1621_v24  ;;  %4700 = vmatpush3.msra.mxu0 %v1893_v58 }
 0xb44   :  { %v4904_v35 = vpack.i.bf16 %v1593_v10, %v1633_v11  ;;  %v4899_v36 = vpack.i.bf16 %v1582_v31, %v1622_v33  ;;  %v1584_v40 = vsel %vm1475_vm5, %v1581_v30, %v1583_v25  ;;  %v1624_v43 = vsel %vm1518_vm6, %v1621_v24, %v1623_v26  ;;  %4701 = vmatprep.subr.mxu0 %v1892_v59 }
 0xb45   :  { %v1604_v45 = vsel %vm1499_vm7, %v1602_v19, %v1603_v27  ;;  %v1644_v46 = vsel %vm1542_vm8, %v1642_v4, %v1643_v29  ;;  %v1605_v47 = vrot.slane %v5802_v18, 3  ;;  %v1645_v38 = vrot.slane %v5802_v18, 7  ;;  %4702 = vmatpush3.msra.mxu0 %v1892_v59 }
 0xb46   :  { %4905 = vrot.lane.b32.xlu1 %v4904_v35, %s5177_s23  ;;  %4900 = vrot.lane.b32.xlu0 %v4899_v36, %s6581_s24  ;;  %v1594_v48 = vrot.slane %v5802_v18, 2  ;;  %v1634_v42 = vrot.slane %v5802_v18, 6  ;;  %v4914_v22 = vpack.i.bf16 %v1584_v40, %v1624_v43  ;;  %v4909_v32 = vpack.i.bf16 %v1604_v45, %v1644_v46 }
 0xb47   :  { %v1606_v41 = vsel %vm1499_vm7, %v1603_v27, %v1605_v47  ;;  %v1646_v49 = vsel %vm1542_vm8, %v1643_v29, %v1645_v38  ;;  %4703 = vmatprep.subr.mxu0 %v1891_v60  ;;  %v1614_v51 = vrot.slane %v5799_v17, 4  ;;  %v1616_v19 = vrot.slane %v5802_v18, 4 }
 0xb48   :  { %v1595_v34 = vsel %vm1487_vm3, %v1592_v21, %v1594_v48  ;;  %v1635_v50 = vsel %vm1530_vm4, %v1632_v3, %v1634_v42  ;;  %v4924_v53 = vpack.i.bf16 %v1606_v41, %v1646_v49  ;;  %4704 = vmatpush3.msra.mxu0 %v1891_v60  ;;  %v4169_v48 = vld [vmem:[%s6570_s13] ss:$0 sm:$0xff] }
 0xb49   :  { %v4919_v52 = vpack.i.bf16 %v1595_v34, %v1635_v50  ;;  %4705 = vmatprep.subr.mxu0 %v1890_v28  ;;  %v1615_v15 = vsel %vm1464_vm2, %v1613_v63, %v1614_v51 }
 0xb4a   :  { %4915 = vrot.lane.b32.xlu1 %v4914_v22, %s6581_s24  ;;  %4910 = vrot.lane.b32.xlu0 %v4909_v32, %s6579_s27 }
 0xb4b   :  { %4706 = vmatpush3.msra.mxu0 %v1890_v28 }
 0xb4e   :  { %4925 = vrot.lane.b32.xlu1 %v4924_v53, %s6579_s27  ;;  %4920 = vrot.lane.b32.xlu0 %v4919_v52, %s5177_s23 }
 0xb75   :  { %v4687_v38 = vpop.f32.mrf.mxu0 }
 0xbb8   :  { %v4906_v0 = vpop.permute.xlu1 %4905  ;;  %v4901_v56 = vpop.permute.xlu0 %4900 }
 0xbb9   :  { %v4903_v37 = vunpack.i.h.bf16 %v4901_v56  ;;  %v4902_v7 = vunpack.i.l.bf16 %v4901_v56  ;;  %v4908_v12 = vunpack.i.h.bf16 %v4906_v0  ;;  %v4907_v13 = vunpack.i.l.bf16 %v4906_v0 }
 0xbbb   :  { %v1659_v8 = vsel %vm79_vm0, %v1615_v15, %v4902_v7  ;;  %v1653_v9 = vsel %vm79_vm0, %v5791_v14, %v4903_v37  ;;  %v1617_v14 = vsel %vm1464_vm2, %v1614_v51, %v1616_v19  ;;  %v4174_v15 = vld [vmem:[%s6572_s15] ss:$0 sm:$0xff] }
 0xbbc   :  { %v4916_v1 = vpop.permute.xlu1 %4915  ;;  %v4911_v16 = vpop.permute.xlu0 %4910  ;;  %v1661_v24 = vsel %vm1556_vm9, %v1659_v8, %v4907_v13  ;;  %v1655_v25 = vsel %vm1556_vm9, %v1653_v9, %v4908_v12 }
 0xbbd   :  { %v4913_v4 = vunpack.i.h.bf16 %v4911_v16  ;;  %v4912_v21 = vunpack.i.l.bf16 %v4911_v16  ;;  %v4918_v3 = vunpack.i.h.bf16 %v4916_v1  ;;  %v4917_v30 = vunpack.i.l.bf16 %v4916_v1 }
 0xbbf   :  { %v1663_v26 = vsel %vm1559_vm10, %v1661_v24, %v4912_v21  ;;  %v1657_v27 = vsel %vm1559_vm10, %v1655_v25, %v4913_v4  ;;  %v1660_v35 = vsel %vm79_vm0, %v1617_v14, %v4917_v30  ;;  %v1654_v36 = vsel %vm79_vm0, %v5799_v17, %v4918_v3  ;;  %v1867_v17 = vpop.f32.mrf.mxu0 }
 0xbc0   :  { %v4926_v29 = vpop.permute.xlu1 %4925  ;;  %v4921_v10 = vpop.permute.xlu0 %4920  ;;  %1790 = vmatprep.mubr.f32.mxu1 %v1663_v26 }
 0xbc1   :  { %v4928_v11 = vunpack.i.h.bf16 %v4926_v29  ;;  %v4927_v31 = vunpack.i.l.bf16 %v4926_v29  ;;  %v4923_v18 = vunpack.i.h.bf16 %v4921_v10  ;;  %v4922_v33 = vunpack.i.l.bf16 %v4921_v10  ;;  %1791 = vmatmul.mubr.f32.gmra.mxu1 %v1657_v27 }
 0xbc3   :  { %v1662_v40 = vsel %vm1556_vm9, %v1660_v35, %v4922_v33  ;;  %v1656_v43 = vsel %vm1556_vm9, %v1654_v36, %v4923_v18 }
 0xbc4   :  { %v1664_v45 = vsel %vm1559_vm10, %v1662_v40, %v4927_v31  ;;  %v1658_v46 = vsel %vm1559_vm10, %v1656_v43, %v4928_v11  ;;  %v4184_v43 = vld [vmem:[%s6586_s29 + $0x38] sm:$0xff] }
 0xbc5   :  { %1795 = vmatprep.mubr.f32.mxu1 %v1664_v45  ;;  %v4183_v45 = vld [vmem:[%s6586_s29 + $0x30] sm:$0xff]  ;;  %4713 = vmatprep.subr.mxu0 %v4184_v43 }
 0xbc6   :  { %1796 = vmatmul.mubr.f32.gmra.mxu1 %v1658_v46  ;;  %v4203_v46 = vld [vmem:[%s6563_s6 + $0x30] sm:$0xff] }
 0xbf4   :  { %v4405_v47 = vpop.f32.mrf.mxu1 }
 0xbf6   :  { %v4406_v42 = vpop.f32.mrf.mxu1 }
 0xbf7   :  { %v4407_v22 = vadd.f32 %v4406_v42, %v4405_v47  ;;  %v4182_v47 = vld [vmem:[%s6586_s29 + $0x28] sm:$0xff]  ;;  %v4201_v42 = vld [vmem:[%s6563_s6 + $0x20] sm:$0xff] }
 0xbf9   :  { %v1783_v32 = vadd.f32 %v4407_v22, %v4169_v48 }
 0xbfb   :  { %v1868_v41 = vadd.f32 %v1867_v17, %v1783_v32 }
 0xbfc   :  { %v4408_v49 = vpop.f32.mrf.mxu1 }
 0xbfd   :  { %v1886_v34 = vmax.f32 %v1868_v41, 0.0 }
 0xbfe   :  { %v4409_v50 = vpop.f32.mrf.mxu1 }
 0xbff   :  { %v4410_v53 = vadd.f32 %v4409_v50, %v4408_v49  ;;  %4707 = vmatprep.mubr.msk.f32.mxu0 %vm1556_vm9, %v1886_v34 }
 0xc01   :  { %v1788_v52 = vadd.f32 %v4410_v53, %v4169_v48 }
 0xc02   :  { %v4690_v57 = vpop.f32.mrf.mxu0 }
 0xc03   :  { %v1873_v39 = vadd.f32 %v4687_v38, %v1788_v52  ;;  %v4202_v38 = vld [vmem:[%s6563_s6 + $0x28] sm:$0xff] }
 0xc04   :  { %v1877_v51 = vpop.f32.mrf.mxu0 }
 0xc05   :  { %v1887_v55 = vmax.f32 %v1873_v39, 0.0 }
 0xc07   :  { %4708 = vmatmul.mubr.msk.f32.vlgmr.msra.gmra.mxu0 %vm1556_vm9, %v1887_v55 }
 0xc08   :  { %4714 = vmatpush3.msra.mxu0 %v4184_v43 }
 0xc09   :  { %4715 = vmatprep.subr.mxu0 %v4183_v45 }
 0xc0a   :  { %4716 = vmatpush3.msra.mxu0 %v4183_v45 }
 0xc0b   :  { %4717 = vmatprep.subr.mxu0 %v4182_v47 }
 0xc0c   :  { %4718 = vmatpush3.msra.mxu0 %v4182_v47  ;;  %v4206_v47 = vld [vmem:[%s6564_s7 + $0x1] ss:$0 sm:$0xff] }
 0xc81   :  { %v4411_v44 = vpop.f32.mrf.mxu1 }
 0xc83   :  { %v4412_v58 = vpop.f32.mrf.mxu1 }
 0xc84   :  { %v4413_v59 = vadd.f32 %v4412_v58, %v4411_v44 }
 0xc86   :  { %v1793_v60 = vadd.f32 %v4413_v59, %v4169_v48  ;;  %v4414_v28 = vpop.f32.mrf.mxu1 }
 0xc88   :  { %v1878_v0 = vadd.f32 %v1877_v51, %v1793_v60  ;;  %v4415_v56 = vpop.f32.mrf.mxu1  ;;  %v4179_v51 = vld [vmem:[%s6573_s16] ss:$0 sm:$0xff] }
 0xc89   :  { %v4416_v63 = vadd.f32 %v4415_v56, %v4414_v28 }
 0xc8a   :  { %v1888_v37 = vmax.f32 %v1878_v0, 0.0 }
 0xc8b   :  { %v1798_v7 = vadd.f32 %v4416_v63, %v4169_v48  ;;  %v4181_v48 = vld [vmem:[%s6586_s29 + $0x20] sm:$0xff] }
 0xc8c   :  { %4710 = vmatprep.mubr.msk.f32.mxu0 %vm1556_vm9, %v1888_v37  ;;  %4719 = vmatprep.subr.mxu0 %v4181_v48  ;;  %v4180_v37 = vld [vmem:[%s6574_s17] ss:$0 sm:$0xff] }
 0xc8d   :  { %v1883_v12 = vadd.f32 %v4690_v57, %v1798_v7  ;;  %4720 = vmatpush3.msra.mxu0 %v4181_v48 }
 0xc8f   :  { %v1889_v13 = vmax.f32 %v1883_v12, 0.0 }
 0xc91   :  { %4711 = vmatmul.mubr.msk.f32.gmra.mxu0 %vm1556_vm9, %v1889_v13 }
 0xcc7   :  { %v4709_v8 = vpop.f32.mrf.mxu0 }
 0xcc8   :  { %v1989_v9 = vadd.f32 %v4709_v8, %v4174_v15 }
 0xcc9   :  { %v1983_v1 = vpop.f32.mrf.mxu0 }
 0xcca   :  { %v1984_v16 = vadd.f32 %v4174_v15, %v1983_v1  ;;  %v2003_v19 = vadd.f32 %v1989_v9, %v5672_v23  ;;  %v4192_v1 = vld [vmem:[%s6561_s4 + $0x28] sm:$0xff] }
 0xccc   :  { %v2011_v4 = vsel %vm79_vm0, %v2003_v19, 0.0  ;;  %v2002_v21 = vadd.f32 %v1984_v16, %v5627_v6  ;;  %v4191_v16 = vld [vmem:[%s6561_s4 + $0x20] sm:$0xff] }
 0xccd   :  { %2012 = vadd.xlane.f32.xlu1 %v2011_v4 }
 0xcce   :  { %v2008_v3 = vsel %vm79_vm0, %v2002_v21, 0.0 }
 0xccf   :  { %2009 = vadd.xlane.f32.xlu0 %v2008_v3 }
 0xd51   :  { %v4712_v30 = vpop.f32.mrf.mxu0 }
 0xd52   :  { %v1999_v25 = vadd.f32 %v4712_v30, %v4174_v15 }
 0xd53   :  { %v1993_v24 = vpop.f32.mrf.mxu0 }
 0xd54   :  { %v1994_v26 = vadd.f32 %v4174_v15, %v1993_v24  ;;  %v2005_v23 = vadd.f32 %v1999_v25, %v5788_v62  ;;  %v4204_v62 = vld [vmem:[%s6563_s6 + $0x38] sm:$0xff] }
 0xd55   :  { %4741 = vmatprep.subr.mxu1 %v4204_v62 }
 0xd56   :  { %v2013_v27 = vpop.xlane.xlu1 %2012  ;;  %v2004_v29 = vadd.f32 %v1994_v26, %v5773_v61  ;;  %v2017_v33 = vsel %vm79_vm0, %v2005_v23, 0.0  ;;  %4742 = vmatpush3.msra.mxu1 %v4204_v62 }
 0xd57   :  { %v2021_v10 = vmul.f32 0.03125, %v2013_v27  ;;  %4743 = vmatprep.subr.mxu1 %v4203_v46 }
 0xd58   :  { %v2010_v14 = vpop.xlane.xlu0 %2009  ;;  %v2014_v11 = vsel %vm79_vm0, %v2004_v29, 0.0  ;;  %4744 = vmatpush3.msra.mxu1 %v4203_v46 }
 0xd59   :  { %v2025_v31 = vsub.f32 %v2003_v19, %v2021_v10  ;;  %v2020_v18 = vmul.f32 0.03125, %v2010_v14  ;;  %2015 = vadd.xlane.f32.xlu0 %v2014_v11  ;;  %4745 = vmatprep.subr.mxu1 %v4202_v38 }
 0xd5a   :  { %4746 = vmatpush3.msra.mxu1 %v4202_v38 }
 0xd5b   :  { %v2024_v6 = vsub.f32 %v2002_v21, %v2020_v18  ;;  %v2029_v35 = vmul.f32 %v2025_v31, %v2025_v31  ;;  %4747 = vmatprep.subr.mxu1 %v4201_v42 }
 0xd5c   :  { %4748 = vmatpush3.msra.mxu1 %v4201_v42 }
 0xd5d   :  { %2018 = vadd.xlane.f32.xlu0 %v2017_v33  ;;  %v2028_v36 = vmul.f32 %v2024_v6, %v2024_v6  ;;  %v2035_v61 = vsel %vm79_vm0, %v2029_v35, 0.0 }
 0xd5f   :  { %v2032_v40 = vsel %vm79_vm0, %v2028_v36, 0.0 }
 0xd60   :  { %2033 = vadd.xlane.f32.xlu1 %v2032_v40  ;;  %v5997_v40 = vld [vmem:[%s6562_s5 + $0x1] ss:$0 sm:$0xff] }
 0xd61   :  { %2036 = vadd.xlane.f32.xlu0 %v2035_v61 }
 0xde2   :  { %v2016_v22 = vpop.xlane.xlu0 %2015 }
 0xde3   :  { %v2022_v32 = vmul.f32 0.03125, %v2016_v22 }
 0xde5   :  { %v2026_v17 = vsub.f32 %v2004_v29, %v2022_v32 }
 0xde6   :  { %v2019_v41 = vpop.xlane.xlu0 %2018 }
 0xde7   :  { %v2023_v49 = vmul.f32 0.03125, %v2019_v41  ;;  %v2030_v34 = vmul.f32 %v2026_v17, %v2026_v17 }
 0xde9   :  { %v2027_v50 = vsub.f32 %v2005_v23, %v2023_v49  ;;  %v2034_v53 = vpop.xlane.xlu1 %2033  ;;  %v2038_v52 = vsel %vm79_vm0, %v2030_v34, 0.0 }
 0xdea   :  { %v2044_v39 = vmul.f32 0.03125, %v2034_v53  ;;  %2039 = vadd.xlane.f32.xlu1 %v2038_v52  ;;  %v2037_v55 = vpop.xlane.xlu0 %2036 }
 0xdeb   :  { %v2045_v44 = vmul.f32 0.03125, %v2037_v55  ;;  %v2031_v57 = vmul.f32 %v2027_v50, %v2027_v50 }
 0xdec   :  { %v2048_v58 = vadd.f32 1e-05, %v2044_v39 }
 0xded   :  { %v2049_v59 = vadd.f32 1e-05, %v2045_v44  ;;  %v2041_v60 = vsel %vm79_vm0, %v2031_v57, 0.0 }
 0xdee   :  { %5061 = vrsqrt.f32 %v2048_v58  ;;  %2042 = vadd.xlane.f32.xlu0 %v2041_v60 }
 0xdef   :  { %5063 = vrsqrt.f32 %v2049_v59 }
 0xdfb   :  { %v5062_v28 = vpop.eup %5061 }
 0xdfc   :  { %v5064_v0 = vpop.eup %5063  ;;  %v2056_v56 = vmul.f32 %v5062_v28, %v2024_v6 }
 0xdfd   :  { %v2057_v63 = vmul.f32 %v5064_v0, %v2025_v31 }
 0xdfe   :  { %v2066_v7 = vmul.f32 %v4179_v51, %v2056_v56 }
 0xdff   :  { %v2067_v12 = vmul.f32 %v4179_v51, %v2057_v63 }
 0xe00   :  { %v2076_v13 = vadd.f32 %v4180_v37, %v2066_v7 }
 0xe01   :  { %v2077_v15 = vadd.f32 %v4180_v37, %v2067_v12 }
 0xe02   :  { %v5936_v8 = vmul.f32 %v2076_v13, %v5621_v5  ;;  %v4194_v5 = vld [vmem:[%s6561_s4 + $0x38] sm:$0xff] }
 0xe03   :  { %v5939_v9 = vmul.f32 %v2077_v15, %v5656_v20  ;;  %v4193_v20 = vld [vmem:[%s6561_s4 + $0x30] sm:$0xff]  ;;  %4727 = vmatprep.subr.mxu0 %v4194_v5 }
 0xe04   :  { %4721 = vmatprep.mubr.msk.f32.mxu0 %vm79_vm0, %v5936_v8  ;;  %4749 = vmatprep.mubr.msk.f32.mxu1 %vm79_vm0, %v5936_v8 }
 0xe05   :  { %4722 = vmatmul.mubr.msk.f32.vlgmr.msra.gmra.mxu0 %vm79_vm0, %v5939_v9  ;;  %4750 = vmatmul.mubr.msk.f32.vlgmr.msra.gmra.mxu1 %vm79_vm0, %v5939_v9 }
 0xe06   :  { %4728 = vmatpush3.msra.mxu0 %v4194_v5 }
 0xe07   :  { %4729 = vmatprep.subr.mxu0 %v4193_v20 }
 0xe08   :  { %4730 = vmatpush3.msra.mxu0 %v4193_v20 }
 0xe09   :  { %4731 = vmatprep.subr.mxu0 %v4192_v1 }
 0xe0a   :  { %4732 = vmatpush3.msra.mxu0 %v4192_v1 }
 0xe0b   :  { %4733 = vmatprep.subr.mxu0 %v4191_v16 }
 0xe0c   :  { %4734 = vmatpush3.msra.mxu0 %v4191_v16 }
 0xe73   :  { %v2040_v19 = vpop.xlane.xlu1 %2039 }
 0xe74   :  { %v2046_v4 = vmul.f32 0.03125, %v2040_v19 }
 0xe76   :  { %v2050_v21 = vadd.f32 1e-05, %v2046_v4 }
 0xe77   :  { %v2043_v3 = vpop.xlane.xlu0 %2042 }
 0xe78   :  { %5065 = vrsqrt.f32 %v2050_v21  ;;  %v2047_v30 = vmul.f32 0.03125, %v2043_v3 }
 0xe7a   :  { %v2051_v24 = vadd.f32 1e-05, %v2047_v30 }
 0xe7c   :  { %5067 = vrsqrt.f32 %v2051_v24 }
 0xe85   :  { %v5066_v25 = vpop.eup %5065 }
 0xe86   :  { %v2058_v26 = vmul.f32 %v5066_v25, %v2026_v17 }
 0xe88   :  { %v2068_v27 = vmul.f32 %v4179_v51, %v2058_v26 }
 0xe89   :  { %v5068_v29 = vpop.eup %5067 }
 0xe8a   :  { %v2078_v10 = vadd.f32 %v4180_v37, %v2068_v27  ;;  %v2059_v14 = vmul.f32 %v5068_v29, %v2027_v50 }
 0xe8c   :  { %v5962_v11 = vmul.f32 %v2078_v10, %v5764_v54  ;;  %v2069_v23 = vmul.f32 %v4179_v51, %v2059_v14 }
 0xe8e   :  { %4724 = vmatprep.mubr.msk.f32.mxu0 %vm79_vm0, %v5962_v11  ;;  %4752 = vmatprep.mubr.msk.f32.mxu1 %vm79_vm0, %v5962_v11  ;;  %v2079_v31 = vadd.f32 %v4180_v37, %v2069_v23 }
 0xe90   :  { %v5969_v18 = vmul.f32 %v2079_v31, %v5779_v2  ;;  %v5986_v2 = vld [vmem:[%s6560_s3 + $0x1] ss:$0 sm:$0xff] }
 0xe92   :  { %4725 = vmatmul.mubr.msk.f32.gmra.mxu0 %vm79_vm0, %v5969_v18  ;;  %4753 = vmatmul.mubr.msk.f32.gmra.mxu1 %vm79_vm0, %v5969_v18 }
 0xe93   :  { %4735 = vmatprep.mubr.msk.f32.mxu0 %vm79_vm0, %v5936_v8 }
 0xe96   :  { %4736 = vmatmul.mubr.msk.f32.vlgmr.msra.gmra.mxu0 %vm79_vm0, %v5939_v9 }
 0xe97   :  { %4738 = vmatprep.mubr.msk.f32.mxu0 %vm79_vm0, %v5962_v11 }
 0xe9a   :  { %4739 = vmatmul.mubr.msk.f32.gmra.mxu0 %vm79_vm0, %v5969_v18 }
 0xec5   :  { %v4723_v54 = vpop.f32.mrf.mxu0  ;;  %v4751_v46 = vpop.f32.mrf.mxu1 }
 0xec6   :  { %v6012_v42 = vadd.f32 %v4751_v46, %v4206_v47  ;;  %v2181_v32 = vadd.f32 %v4723_v54, %v5986_v2 }
 0xec7   :  { %v2175_v6 = vpop.f32.mrf.mxu0  ;;  %v2371_v22 = vpop.f32.mrf.mxu1 }
 0xec8   :  { %v2176_v33 = vadd.f32 %v5986_v2, %v2175_v6  ;;  %v6018_v17 = vadd.f32 %v4206_v47, %v2371_v22 }
 0xeca   :  { %4759 = vmatprep.mubr.msk.f32.mxu1 %vm369_vm1, %v2176_v33 }
 0xf52   :  { %v5990_v35 = vpop.f32.mrf.mxu0  ;;  %v4754_v49 = vpop.f32.mrf.mxu1 }
 0xf53   :  { %v6028_v53 = vadd.f32 %v4754_v49, %v4206_v47 }
 0xf54   :  { %v5992_v36 = vpop.f32.mrf.mxu0  ;;  %v2381_v52 = vpop.f32.mrf.mxu1 }
 0xf55   :  { %v6033_v55 = vadd.f32 %v4206_v47, %v2381_v52 }
 0xf56   :  { %v4737_v61 = vpop.f32.mrf.mxu0 }
 0xf57   :  { %v2279_v43 = vadd.f32 %v4737_v61, %v5997_v40 }
 0xf58   :  { %v2273_v62 = vpop.f32.mrf.mxu0 }
 0xf59   :  { %v2274_v45 = vadd.f32 %v5997_v40, %v2273_v62  ;;  %2610 = vrot.lane.b32.xlu1 %v2279_v43, %s5175_s2  ;;  %4755 = vmatprep.subr.msk.mxu1 %vm369_vm1, %v2279_v43 }
 0xf5a   :  { %v4740_v38 = vpop.f32.mrf.mxu0  ;;  %4756 = vmatpush3.xpose.msk.msra.mxu1 %vm369_vm1, %v2279_v43 }
 0xf5b   :  { %v6008_v48 = vadd.f32 %v4740_v38, %v5997_v40  ;;  %2608 = vrot.lane.b32.xlu0 %v2274_v45, %s5175_s2  ;;  %4757 = vmatprep.subr.msk.mxu1 %vm369_vm1, %v2274_v45 }
 0xf5c   :  { %v6041_v51 = vpop.f32.mrf.mxu0 }
 0xf5d   :  { %2604 = vrot.lane.b32.xlu1 %v2176_v33, %s5175_s2 }
 0xf5e   :  { %4758 = vmatpush3.xpose.msk.msra.mxu1 %vm369_vm1, %v2274_v45 }
 0xf5f   :  { %4762 = vmatprep.subr.mxu1 %v6012_v42 }
 0xf61   :  { %2606 = vrot.lane.b32.xlu1 %v2181_v32, %s5175_s2  ;;  %4760 = vmatmul.mubr.msk.f32.vlgmr.msra.gmra.mxu1 %vm369_vm1, %v2181_v32 }
 0xf62   :  { %4763 = vmatpush3.msra.mxu1 %v6012_v42 }
 0xf63   :  { %4764 = vmatprep.subr.mxu1 %v6018_v17 }
 0xf64   :  { %4765 = vmatpush3.msra.mxu1 %v6018_v17 }
 0xfcb   :  { %v2611_v41 = vpop.permute.xlu1 %2610 }
 0xfcc   :  { %4769 = vmatprep.subr.msk.mxu0 %vm369_vm1, %v2611_v41 }
 0xfcd   :  { %4770 = vmatpush3.xpose.msk.msra.mxu0 %vm369_vm1, %v2611_v41  ;;  %v2609_v34 = vpop.permute.xlu0 %2608 }
 0xfce   :  { %4771 = vmatprep.subr.msk.mxu0 %vm369_vm1, %v2609_v34 }
 0xfcf   :  { %v2605_v50 = vpop.permute.xlu1 %2604 }
 0xfd0   :  { %4773 = vmatprep.mubr.msk.f32.mxu0 %vm369_vm1, %v2605_v50 }
 0xfd1   :  { %4772 = vmatpush3.xpose.msk.msra.mxu0 %vm369_vm1, %v2609_v34 }
 0xfd2   :  { %4790 = vmatprep.subr.mxu0 %v6028_v53 }
 0xfd3   :  { %v2607_v39 = vpop.permute.xlu1 %2606 }
 0xfd4   :  { %4774 = vmatmul.mubr.msk.f32.vlgmr.msra.gmra.mxu0 %vm369_vm1, %v2607_v39 }
 0xfd5   :  { %4791 = vmatpush3.msra.mxu0 %v6028_v53 }
 0xfd6   :  { %4792 = vmatprep.subr.mxu0 %v6033_v55 }
 0xfd7   :  { %4793 = vmatpush3.msra.mxu0 %v6033_v55 }
0x1021   :  { %v4761_v44 = vpop.f32.mrf.mxu1 }
0x1022   :  { %v2478_v57 = vmul.f32 0.25, %v4761_v44 }
0x1023   :  { %v2468_v58 = vpop.f32.mrf.mxu1 }
0x1024   :  { %v2477_v59 = vmul.f32 0.25, %v2468_v58  ;;  %v2482_v60 = vsel %vm369_vm1, %v2478_v57, -inf }
0x1025   :  { %2483 = vmax.xlane.f32.xlu1 %v2482_v60 }
0x1026   :  { %v2479_v28 = vsel %vm369_vm1, %v2477_v59, -inf }
0x1027   :  { %2480 = vmax.xlane.f32.xlu0 %v2479_v28 }
0x1094   :  { %v4775_v0 = vpop.f32.mrf.mxu0 }
0x1095   :  { %v2696_v37 = vmul.f32 0.25, %v4775_v0 }
0x1096   :  { %v2686_v56 = vpop.f32.mrf.mxu0 }
0x1097   :  { %v2695_v63 = vmul.f32 0.25, %v2686_v56  ;;  %v2700_v12 = vsel %vm369_vm1, %v2696_v37, -inf }
0x1099   :  { %v2697_v7 = vsel %vm369_vm1, %v2695_v63, -inf }
0x109a   :  { %2698 = vmax.xlane.f32.xlu0 %v2697_v7 }
0x109e   :  { %2701 = vmax.xlane.f32.xlu0 %v2700_v12 }
0x10ae   :  { %v2484_v13 = vpop.xlane.xlu1 %2483 }
0x10af   :  { %v2486_v15 = vsub.f32 %v2478_v57, %v2484_v13 }
0x10b0   :  { %v2481_v5 = vpop.xlane.xlu0 %2480 }
0x10b1   :  { %v2489_v20 = vmul.f32 1.442695, %v2486_v15  ;;  %v2485_v1 = vsub.f32 %v2477_v59, %v2481_v5 }
0x10b3   :  { %5069 = vpow2.f32 %v2489_v20  ;;  %v2487_v16 = vmul.f32 1.442695, %v2485_v1 }
0x10b5   :  { %5071 = vpow2.f32 %v2487_v16 }
0x10c0   :  { %v5070_v19 = vpop.eup %5069 }
0x10c1   :  { %v2494_v4 = vsel %vm369_vm1, %v5070_v19, 0.0 }
0x10c2   :  { %v5072_v21 = vpop.eup %5071  ;;  %2495 = vadd.xlane.f32.xlu0 %v2494_v4 }
0x10c3   :  { %v2491_v3 = vsel %vm369_vm1, %v5072_v21, 0.0 }
0x10c4   :  { %2492 = vadd.xlane.f32.xlu1 %v2491_v3 }
0x1123   :  { %v2699_v30 = vpop.xlane.xlu0 %2698 }
0x1124   :  { %v2703_v24 = vsub.f32 %v2695_v63, %v2699_v30 }
0x1126   :  { %v2705_v25 = vmul.f32 1.442695, %v2703_v24 }
0x1127   :  { %v2702_v26 = vpop.xlane.xlu0 %2701 }
0x1128   :  { %5073 = vpow2.f32 %v2705_v25  ;;  %v2704_v27 = vsub.f32 %v2696_v37, %v2702_v26 }
0x112a   :  { %v2707_v29 = vmul.f32 1.442695, %v2704_v27 }
0x112c   :  { %5075 = vpow2.f32 %v2707_v29 }
0x1135   :  { %v5074_v10 = vpop.eup %5073 }
0x1136   :  { %v2709_v14 = vsel %vm369_vm1, %v5074_v10, 0.0 }
0x1137   :  { %2710 = vadd.xlane.f32.xlu1 %v2709_v14 }
0x1139   :  { %v5076_v23 = vpop.eup %5075 }
0x113a   :  { %v2712_v31 = vsel %vm369_vm1, %v5076_v23, 0.0 }
0x113b   :  { %2713 = vadd.xlane.f32.xlu0 %v2712_v31  ;;  %v6070_v31 = vadd.f32 %v5997_v40, %v6041_v51 }
0x114b   :  { %v2496_v54 = vpop.xlane.xlu0 %2495 }
0x114c   :  { %5077 = vrcp.f32 %v2496_v54 }
0x114d   :  { %v2493_v6 = vpop.xlane.xlu1 %2492 }
0x114e   :  { %5079 = vrcp.f32 %v2493_v6 }
0x1159   :  { %v5078_v33 = vpop.eup %5077 }
0x115a   :  { %v2500_v61 = vmul.f32 %v5078_v33, %v5070_v19 }
0x115b   :  { %v5080_v43 = vpop.eup %5079 }
0x115c   :  { %v2504_v62 = vsel %vm369_vm1, %v2500_v61, -inf  ;;  %v2499_v45 = vmul.f32 %v5080_v43, %v5072_v21 }
0x115d   :  { %2505 = vmax.xlane.f32.xlu0 %v2504_v62 }
0x115e   :  { %v2501_v46 = vsel %vm369_vm1, %v2499_v45, -inf }
0x115f   :  { %2502 = vmax.xlane.f32.xlu1 %v2501_v46 }
0x11c0   :  { %v2711_v47 = vpop.xlane.xlu1 %2710 }
0x11c1   :  { %5081 = vrcp.f32 %v2711_v47 }
0x11c4   :  { %v2714_v38 = vpop.xlane.xlu0 %2713 }
0x11c5   :  { %5083 = vrcp.f32 %v2714_v38 }
0x11ce   :  { %v5082_v22 = vpop.eup %5081 }
0x11cf   :  { %v2717_v32 = vmul.f32 %v5082_v22, %v5074_v10 }
0x11d1   :  { %v2719_v41 = vsel %vm369_vm1, %v2717_v32, -inf }
0x11d2   :  { %v5084_v49 = vpop.eup %5083  ;;  %2720 = vmax.xlane.f32.xlu1 %v2719_v41 }
0x11d3   :  { %v2718_v34 = vmul.f32 %v5084_v49, %v5076_v23  ;;  %v2186_v23 = vadd.f32 %v5986_v2, %v5992_v36  ;;  %v2191_v36 = vadd.f32 %v5990_v35, %v5986_v2 }
0x11d5   :  { %v2722_v50 = vsel %vm369_vm1, %v2718_v34, -inf }
0x11d6   :  { %2723 = vmax.xlane.f32.xlu0 %v2722_v50 }
0x11e6   :  { %v2506_v52 = vpop.xlane.xlu0 %2505 }
0x11e7   :  { %v2508_v39 = vsub.f32 %v2500_v61, %v2506_v52 }
0x11e8   :  { %v2503_v44 = vpop.xlane.xlu1 %2502 }
0x11e9   :  { %v2511_v57 = vmul.f32 1.442695, %v2508_v39  ;;  %v2507_v58 = vsub.f32 %v2499_v45, %v2503_v44 }
0x11eb   :  { %5085 = vpow2.f32 %v2511_v57  ;;  %v2509_v59 = vmul.f32 1.442695, %v2507_v58 }
0x11ed   :  { %5087 = vpow2.f32 %v2509_v59 }
0x11f8   :  { %v5086_v60 = vpop.eup %5085 }
0x11f9   :  { %v2516_v28 = vsel %vm369_vm1, %v5086_v60, 0.0 }
0x11fa   :  { %v5088_v0 = vpop.eup %5087  ;;  %2517 = vadd.xlane.f32.xlu0 %v2516_v28 }
0x11fb   :  { %v2513_v56 = vsel %vm369_vm1, %v5088_v0, 0.0 }
0x11fc   :  { %2514 = vadd.xlane.f32.xlu1 %v2513_v56 }
0x125b   :  { %v2721_v63 = vpop.xlane.xlu1 %2720 }
0x125c   :  { %v2725_v37 = vsub.f32 %v2717_v32, %v2721_v63 }
0x125e   :  { %v2727_v7 = vmul.f32 1.442695, %v2725_v37 }
0x125f   :  { %v2724_v12 = vpop.xlane.xlu0 %2723 }
0x1260   :  { %5089 = vpow2.f32 %v2727_v7  ;;  %v2726_v13 = vsub.f32 %v2718_v34, %v2724_v12 }
0x1262   :  { %v2729_v15 = vmul.f32 1.442695, %v2726_v13 }
0x1264   :  { %5091 = vpow2.f32 %v2729_v15 }
0x126d   :  { %v5090_v5 = vpop.eup %5089 }
0x126e   :  { %v2731_v20 = vsel %vm369_vm1, %v5090_v5, 0.0 }
0x126f   :  { %2732 = vadd.xlane.f32.xlu1 %v2731_v20 }
0x1271   :  { %v5092_v1 = vpop.eup %5091 }
0x1272   :  { %v2734_v16 = vsel %vm369_vm1, %v5092_v1, 0.0 }
0x1273   :  { %2735 = vadd.xlane.f32.xlu0 %v2734_v16 }
0x1280   :  { %2745 = vrot.lane.b32.xlu1 %v6012_v42, %s5175_s2 }
0x1283   :  { %v2518_v19 = vpop.xlane.xlu0 %2517 }
0x1284   :  { %5093 = vrcp.f32 %v2518_v19 }
0x1285   :  { %v2515_v4 = vpop.xlane.xlu1 %2514 }
0x1286   :  { %5095 = vrcp.f32 %v2515_v4 }
0x1289   :  { %2743 = vrot.lane.b32.xlu0 %v6018_v17, %s5175_s2 }
0x1291   :  { %v5094_v21 = vpop.eup %5093 }
0x1292   :  { %v2522_v24 = vmul.f32 %v5094_v21, %v5086_v60 }
0x1293   :  { %v5096_v3 = vpop.eup %5095 }
0x1294   :  { %v2521_v30 = vmul.f32 %v5096_v3, %v5088_v0 }
0x1296   :  { %4766 = vmatprep.mubr.msk.f32.mxu1 %vm369_vm1, %v2521_v30 }
0x1297   :  { %4767 = vmatmul.mubr.msk.f32.vlgmr.msra.gmra.mxu1 %vm369_vm1, %v2522_v24 }
0x12f8   :  { %v2733_v25 = vpop.xlane.xlu1 %2732 }
0x12f9   :  { %5097 = vrcp.f32 %v2733_v25 }
0x12fc   :  { %v2746_v26 = vpop.permute.xlu1 %2745  ;;  %v2736_v27 = vpop.xlane.xlu0 %2735 }
0x12fd   :  { %5099 = vrcp.f32 %v2736_v27  ;;  %4776 = vmatprep.subr.mxu1 %v2746_v26 }
0x12fe   :  { %4777 = vmatpush3.msra.mxu1 %v2746_v26 }
0x1300   :  { %v2744_v42 = vpop.permute.xlu0 %2743 }
0x1301   :  { %4778 = vmatprep.subr.mxu1 %v2744_v42 }
0x1302   :  { %4779 = vmatpush3.msra.mxu1 %v2744_v42 }
0x1303   :  { %4783 = vmatprep.subr.msk.mxu1 %vm369_vm1, %v6008_v48 }
0x1306   :  { %v5098_v17 = vpop.eup %5097 }
0x1307   :  { %v2739_v29 = vmul.f32 %v5098_v17, %v5090_v5 }
0x1309   :  { %4780 = vmatprep.mubr.msk.f32.mxu1 %vm369_vm1, %v2739_v29 }
0x130a   :  { %v5100_v10 = vpop.eup %5099 }
0x130b   :  { %v2740_v14 = vmul.f32 %v5100_v10, %v5092_v1 }
0x130d   :  { %4781 = vmatmul.mubr.msk.f32.vlgmr.msra.gmra.mxu1 %vm369_vm1, %v2740_v14 }
0x130e   :  { %4784 = vmatpush3.xpose.msk.msra.mxu1 %vm369_vm1, %v6008_v48  ;;  %4787 = vmatprep.mubr.msk.f32.mxu1 %vm369_vm1, %v2186_v23 }
0x130f   :  { %4785 = vmatprep.subr.msk.mxu1 %vm369_vm1, %v6070_v31 }
0x1312   :  { %4786 = vmatpush3.xpose.msk.msra.mxu1 %vm369_vm1, %v6070_v31 }
0x1315   :  { %4788 = vmatmul.mubr.msk.f32.vlgmr.msra.gmra.mxu1 %vm369_vm1, %v2191_v36 }
0x1357   :  { %v6083_v40 = vpop.f32.mrf.mxu1 }
0x1359   :  { %v6085_v51 = vpop.f32.mrf.mxu1 }
0x13cd   :  { %v6087_v54 = vpop.f32.mrf.mxu1 }
0x13cf   :  { %v6089_v6 = vpop.f32.mrf.mxu1 }
0x13d5   :  { %v4789_v33 = vpop.f32.mrf.mxu1 }
0x13d6   :  { %v2928_v61 = vmul.f32 0.25, %v4789_v33 }
0x13d7   :  { %v2918_v43 = vpop.f32.mrf.mxu1 }
0x13d8   :  { %v2927_v62 = vmul.f32 0.25, %v2918_v43  ;;  %v2932_v45 = vsel %vm369_vm1, %v2928_v61, -inf }
0x13d9   :  { %2933 = vmax.xlane.f32.xlu0 %v2932_v45 }
0x13da   :  { %v2929_v46 = vsel %vm369_vm1, %v2927_v62, -inf }
0x13db   :  { %2930 = vmax.xlane.f32.xlu1 %v2929_v46 }
0x1462   :  { %v2934_v2 = vpop.xlane.xlu0 %2933 }
0x1463   :  { %v2936_v35 = vsub.f32 %v2928_v61, %v2934_v2 }
0x1464   :  { %v2931_v47 = vpop.xlane.xlu1 %2930 }
0x1465   :  { %v2939_v38 = vmul.f32 1.442695, %v2936_v35  ;;  %v2935_v22 = vsub.f32 %v2927_v62, %v2931_v47 }
0x1467   :  { %5101 = vpow2.f32 %v2939_v38  ;;  %v2937_v32 = vmul.f32 1.442695, %v2935_v22 }
0x1469   :  { %5103 = vpow2.f32 %v2937_v32 }
0x1474   :  { %v5102_v41 = vpop.eup %5101 }
0x1475   :  { %v2944_v49 = vsel %vm369_vm1, %v5102_v41, 0.0 }
0x1476   :  { %v5104_v34 = vpop.eup %5103  ;;  %2945 = vadd.xlane.f32.xlu0 %v2944_v49 }
0x1477   :  { %v2941_v50 = vsel %vm369_vm1, %v5104_v34, 0.0 }
0x1478   :  { %2942 = vadd.xlane.f32.xlu1 %v2941_v50 }
0x14ff   :  { %v2946_v52 = vpop.xlane.xlu0 %2945 }
0x1500   :  { %5105 = vrcp.f32 %v2946_v52 }
0x1501   :  { %v2943_v39 = vpop.xlane.xlu1 %2942 }
0x1502   :  { %5107 = vrcp.f32 %v2943_v39 }
0x150d   :  { %v5106_v44 = vpop.eup %5105 }
0x150e   :  { %v2950_v57 = vmul.f32 %v5106_v44, %v5102_v41 }
0x150f   :  { %v5108_v58 = vpop.eup %5107 }
0x1510   :  { %v2954_v59 = vsel %vm369_vm1, %v2950_v57, -inf  ;;  %v2949_v60 = vmul.f32 %v5108_v58, %v5104_v34 }
0x1511   :  { %2955 = vmax.xlane.f32.xlu0 %v2954_v59 }
0x1512   :  { %v2951_v28 = vsel %vm369_vm1, %v2949_v60, -inf }
0x1513   :  { %2952 = vmax.xlane.f32.xlu1 %v2951_v28 }
0x1524   :  { %3060 = vrot.lane.b32.xlu1 %v6008_v48, %s5175_s2 }
0x1528   :  { %3054 = vrot.lane.b32.xlu1 %v2186_v23, %s5175_s2 }
0x159a   :  { %v2956_v0 = vpop.xlane.xlu0 %2955 }
0x159b   :  { %v2958_v56 = vsub.f32 %v2950_v57, %v2956_v0 }
0x159c   :  { %v2953_v63 = vpop.xlane.xlu1 %2952 }
0x159d   :  { %v2961_v37 = vmul.f32 1.442695, %v2958_v56  ;;  %v2957_v7 = vsub.f32 %v2949_v60, %v2953_v63 }
0x159f   :  { %5109 = vpow2.f32 %v2961_v37  ;;  %v2959_v12 = vmul.f32 1.442695, %v2957_v7 }
0x15a0   :  { %v3061_v13 = vpop.permute.xlu1 %3060 }
0x15a1   :  { %5111 = vpow2.f32 %v2959_v12  ;;  %4797 = vmatprep.subr.msk.mxu0 %vm369_vm1, %v3061_v13 }
0x15a4   :  { %v3055_v1 = vpop.permute.xlu1 %3054 }
0x15ac   :  { %v5110_v15 = vpop.eup %5109 }
0x15ad   :  { %v2966_v5 = vsel %vm369_vm1, %v5110_v15, 0.0 }
0x15ae   :  { %v5112_v20 = vpop.eup %5111  ;;  %2967 = vadd.xlane.f32.xlu0 %v2966_v5  ;;  %v4237_v5 = vld [vmem:[%s6565_s8 + $0x30] sm:$0xff] }
0x15af   :  { %v2963_v48 = vsel %vm369_vm1, %v5112_v20, 0.0 }
0x15b0   :  { %2964 = vadd.xlane.f32.xlu1 %v2963_v48  ;;  %v4236_v48 = vld [vmem:[%s6565_s8 + $0x28] sm:$0xff] }
0x15c1   :  { %3056 = vrot.lane.b32.xlu1 %v2191_v36, %s5175_s2 }
0x15c4   :  { %3058 = vrot.lane.b32.xlu0 %v6070_v31, %s5175_s2 }
0x1637   :  { %v2968_v16 = vpop.xlane.xlu0 %2967 }
0x1638   :  { %5113 = vrcp.f32 %v2968_v16 }
0x1639   :  { %v2965_v19 = vpop.xlane.xlu1 %2964 }
0x163a   :  { %5115 = vrcp.f32 %v2965_v19 }
0x163b   :  { %v3059_v24 = vpop.permute.xlu0 %3058 }
0x163d   :  { %v3057_v25 = vpop.permute.xlu1 %3056 }
0x1645   :  { %v5114_v4 = vpop.eup %5113 }
0x1646   :  { %v2972_v30 = vmul.f32 %v5114_v4, %v5110_v15 }
0x1647   :  { %v5116_v21 = vpop.eup %5115 }
0x1648   :  { %v2971_v3 = vmul.f32 %v5116_v21, %v5112_v20 }
0x164a   :  { %4794 = vmatprep.mubr.msk.f32.mxu0 %vm369_vm1, %v2971_v3 }
0x164b   :  { %4795 = vmatmul.mubr.msk.f32.vlgmr.msra.gmra.mxu0 %vm369_vm1, %v2972_v30  ;;  %v4240_v30 = vld [vmem:[%s6566_s9 + $0x1] ss:$0 sm:$0xff] }
0x164c   :  { %4798 = vmatpush3.xpose.msk.msra.mxu0 %vm369_vm1, %v3061_v13  ;;  %4801 = vmatprep.mubr.msk.f32.mxu0 %vm369_vm1, %v3055_v1  ;;  %v4235_v1 = vld [vmem:[%s6565_s8 + $0x20] sm:$0xff] }
0x164d   :  { %4799 = vmatprep.subr.msk.mxu0 %vm369_vm1, %v3059_v24 }
0x1650   :  { %4800 = vmatpush3.xpose.msk.msra.mxu0 %vm369_vm1, %v3059_v24 }
0x1653   :  { %4802 = vmatmul.mubr.msk.f32.vlgmr.msra.gmra.mxu0 %vm369_vm1, %v3057_v25 }
0x170b   :  { %v6113_v26 = vpop.f32.mrf.mxu0 }
0x170d   :  { %v6115_v27 = vpop.f32.mrf.mxu0 }
0x1713   :  { %v4803_v42 = vpop.f32.mrf.mxu0 }
0x1714   :  { %v3146_v17 = vmul.f32 0.25, %v4803_v42 }
0x1715   :  { %v3136_v29 = vpop.f32.mrf.mxu0 }
0x1716   :  { %v3145_v10 = vmul.f32 0.25, %v3136_v29  ;;  %v3150_v14 = vsel %vm369_vm1, %v3146_v17, -inf }
0x1717   :  { %3151 = vmax.xlane.f32.xlu1 %v3150_v14 }
0x1718   :  { %v3147_v23 = vsel %vm369_vm1, %v3145_v10, -inf }
0x1719   :  { %3148 = vmax.xlane.f32.xlu0 %v3147_v23 }
0x17a0   :  { %v3152_v31 = vpop.xlane.xlu1 %3151 }
0x17a1   :  { %v3154_v36 = vsub.f32 %v3146_v17, %v3152_v31 }
0x17a2   :  { %v3149_v33 = vpop.xlane.xlu0 %3148 }
0x17a3   :  { %v3153_v61 = vsub.f32 %v3145_v10, %v3149_v33  ;;  %v3157_v43 = vmul.f32 1.442695, %v3154_v36 }
0x17a5   :  { %v3155_v62 = vmul.f32 1.442695, %v3153_v61 }
0x17a7   :  { %5117 = vpow2.f32 %v3155_v62 }
0x17a8   :  { %5119 = vpow2.f32 %v3157_v43 }
0x17b4   :  { %v5118_v45 = vpop.eup %5117 }
0x17b5   :  { %v3159_v46 = vsel %vm369_vm1, %v5118_v45, 0.0  ;;  %v5120_v2 = vpop.eup %5119 }
0x17b6   :  { %3160 = vadd.xlane.f32.xlu0 %v3159_v46  ;;  %v3162_v35 = vsel %vm369_vm1, %v5120_v2, 0.0 }
0x17ba   :  { %3163 = vadd.xlane.f32.xlu0 %v3162_v35 }
0x183f   :  { %v3161_v47 = vpop.xlane.xlu0 %3160 }
0x1840   :  { %5121 = vrcp.f32 %v3161_v47 }
0x1843   :  { %v3164_v38 = vpop.xlane.xlu0 %3163 }
0x1844   :  { %5123 = vrcp.f32 %v3164_v38 }
0x184d   :  { %v5122_v22 = vpop.eup %5121 }
0x184e   :  { %v3167_v32 = vmul.f32 %v5122_v22, %v5118_v45 }
0x1850   :  { %v3169_v41 = vsel %vm369_vm1, %v3167_v32, -inf }
0x1851   :  { %v5124_v49 = vpop.eup %5123  ;;  %3170 = vmax.xlane.f32.xlu1 %v3169_v41 }
0x1852   :  { %v3168_v34 = vmul.f32 %v5124_v49, %v5120_v2  ;;  %v4282_v49 = vld [vmem:[%s6569_s12 + $0x228] sm:$0xff] }
0x1854   :  { %v3172_v50 = vsel %vm369_vm1, %v3168_v34, -inf }
0x1855   :  { %3173 = vmax.xlane.f32.xlu0 %v3172_v50  ;;  %v4280_v50 = vld [vmem:[%s6569_s12 + $0x218] sm:$0xff] }
0x1856   :  { %4501 = vmatprep.subr.mxu0 %v4280_v50 }
0x18da   :  { %v3171_v52 = vpop.xlane.xlu1 %3170 }
0x18db   :  { %v3175_v39 = vsub.f32 %v3167_v32, %v3171_v52  ;;  %v4264_v52 = vld [vmem:[%s6569_s12 + $0x198] sm:$0xff] }
0x18dc   :  { %4502 = vmatpush3.msra.mxu0 %v4264_v52 }
0x18dd   :  { %v3177_v44 = vmul.f32 1.442695, %v3175_v39  ;;  %v4279_v39 = vld [vmem:[%s6569_s12 + $0x210] sm:$0xff] }
0x18de   :  { %v3174_v57 = vpop.xlane.xlu0 %3173  ;;  %4503 = vmatprep.subr.mxu0 %v4279_v39 }
0x18df   :  { %5125 = vpow2.f32 %v3177_v44  ;;  %v3176_v58 = vsub.f32 %v3168_v34, %v3174_v57  ;;  %v4281_v34 = vld [vmem:[%s6569_s12 + $0x220] sm:$0xff]  ;;  %v4263_v44 = vld [vmem:[%s6569_s12 + $0x190] sm:$0xff]  ;;  %v4278_v57 = vld [vmem:[%s6569_s12 + $0x208] sm:$0xff] }
0x18e0   :  { %4504 = vmatpush3.msra.mxu0 %v4263_v44 }
0x18e1   :  { %v3179_v59 = vmul.f32 1.442695, %v3176_v58  ;;  %v4262_v58 = vld [vmem:[%s6569_s12 + $0x188] sm:$0xff]  ;;  %4505 = vmatprep.subr.mxu0 %v4278_v57  ;;  %v4251_v57 = vld [vmem:[%s6569_s12 + $0x130] sm:$0xff] }
0x18e2   :  { %4506 = vmatpush3.msra.mxu0 %v4262_v58 }
0x18e3   :  { %5127 = vpow2.f32 %v3179_v59  ;;  %v4277_v59 = vld [vmem:[%s6569_s12 + $0x200] sm:$0xff] }
0x18e4   :  { %4507 = vmatprep.subr.mxu0 %v4277_v59 }
0x18ec   :  { %v5126_v60 = vpop.eup %5125 }
0x18ed   :  { %v3181_v28 = vsel %vm369_vm1, %v5126_v60, 0.0 }
0x18ee   :  { %3182 = vadd.xlane.f32.xlu1 %v3181_v28  ;;  %v4276_v28 = vld [vmem:[%s6569_s12 + $0x1f8] sm:$0xff] }
0x18f0   :  { %v5128_v0 = vpop.eup %5127 }
0x18f1   :  { %v3184_v56 = vsel %vm369_vm1, %v5128_v0, 0.0 }
0x18f2   :  { %3185 = vadd.xlane.f32.xlu0 %v3184_v56  ;;  %v4275_v56 = vld [vmem:[%s6569_s12 + $0x1f0] sm:$0xff] }
0x18ff   :  { %3195 = vrot.lane.b32.xlu1 %v6028_v53, %s5175_s2  ;;  %v4238_v53 = vld [vmem:[%s6565_s8 + $0x38] sm:$0xff] }
0x1903   :  { %2832 = vrot.lane.b32.xlu1 %v6089_v6, %s5176_s25 }
0x1907   :  { %2834 = vrot.lane.b32.xlu1 %v6087_v54, %s5176_s25 }
0x1908   :  { %3193 = vrot.lane.b32.xlu0 %v6033_v55, %s5175_s2 }
0x1977   :  { %v3183_v63 = vpop.xlane.xlu1 %3182 }
0x1978   :  { %5129 = vrcp.f32 %v3183_v63  ;;  %v4259_v63 = vld [vmem:[%s6569_s12 + $0x170] sm:$0xff] }
0x197b   :  { %v3196_v37 = vpop.permute.xlu1 %3195  ;;  %v3186_v7 = vpop.xlane.xlu0 %3185 }
0x197c   :  { %5131 = vrcp.f32 %v3186_v7  ;;  %4804 = vmatprep.subr.mxu1 %v3196_v37 }
0x197d   :  { %4805 = vmatpush3.msra.mxu1 %v3196_v37 }
0x197f   :  { %v3194_v12 = vpop.permute.xlu0 %3193  ;;  %v2833_v13 = vpop.permute.xlu1 %2832 }
0x1980   :  { %4806 = vmatprep.subr.mxu1 %v3194_v12  ;;  %v2838_v20 = vsel %vm369_vm1, %v6085_v51, %v2833_v13 }
0x1981   :  { %4807 = vmatpush3.msra.mxu1 %v3194_v12 }
0x1982   :  { %4811 = vmatprep.subr.mxu1 %v4238_v53 }
0x1983   :  { %v2835_v16 = vpop.permute.xlu1 %2834 }
0x1984   :  { %v2839_v51 = vsel %vm369_vm1, %v6083_v40, %v2835_v16 }
0x1985   :  { %v5130_v6 = vpop.eup %5129 }
0x1986   :  { %v3189_v54 = vmul.f32 %v5130_v6, %v5126_v60  ;;  %v4261_v60 = vld [vmem:[%s6569_s12 + $0x180] sm:$0xff] }
0x1987   :  { %4508 = vmatpush3.msra.mxu0 %v4261_v60 }
0x1988   :  { %4808 = vmatprep.mubr.msk.f32.mxu1 %vm369_vm1, %v3189_v54  ;;  %4509 = vmatprep.subr.mxu0 %v4276_v28 }
0x1989   :  { %v5132_v55 = vpop.eup %5131 }
0x198a   :  { %v3190_v15 = vmul.f32 %v5132_v55, %v5128_v0  ;;  %v4260_v0 = vld [vmem:[%s6569_s12 + $0x178] sm:$0xff] }
0x198b   :  { %4510 = vmatpush3.msra.mxu0 %v4260_v0  ;;  %v4266_v0 = vld [vmem:[%s6569_s12 + $0x1a8] sm:$0xff] }
0x198c   :  { %4809 = vmatmul.mubr.msk.f32.vlgmr.msra.gmra.mxu1 %vm369_vm1, %v3190_v15  ;;  %4511 = vmatprep.subr.mxu0 %v4275_v56 }
0x198d   :  { %4812 = vmatpush3.msra.mxu1 %v4238_v53  ;;  %4819 = vmatprep.mubr.msk.f32.mxu1 %vm79_vm0, %v2838_v20 }
0x198e   :  { %4813 = vmatprep.subr.mxu1 %v4237_v5  ;;  %4512 = vmatpush3.msra.mxu0 %v4259_v63 }
0x198f   :  { %4814 = vmatpush3.msra.mxu1 %v4237_v5 }
0x1990   :  { %4815 = vmatprep.subr.mxu1 %v4236_v48 }
0x1991   :  { %4816 = vmatpush3.msra.mxu1 %v4236_v48 }
0x1992   :  { %4817 = vmatprep.subr.mxu1 %v4235_v1 }
0x1993   :  { %4818 = vmatpush3.msra.mxu1 %v4235_v1 }
0x1994   :  { %4820 = vmatmul.mubr.msk.f32.vlgmr.msra.gmra.mxu1 %vm79_vm0, %v2839_v51 }
0x1a4c   :  { %v4810_v19 = vpop.f32.mrf.mxu1 }
0x1a4d   :  { %3284 = vrot.lane.b32.xlu1 %v4810_v19, %s5176_s25 }
0x1a4e   :  { %v3271_v4 = vpop.f32.mrf.mxu1 }
0x1a4f   :  { %3282 = vrot.lane.b32.xlu0 %v3271_v4, %s5176_s25 }
0x1a54   :  { %v4821_v21 = vpop.f32.mrf.mxu1 }
0x1a55   :  { %v3387_v25 = vadd.f32 %v4821_v21, %v4240_v30 }
0x1a56   :  { %v3381_v3 = vpop.f32.mrf.mxu1 }
0x1a57   :  { %v3382_v24 = vadd.f32 %v4240_v30, %v3381_v3  ;;  %v3401_v40 = vadd.f32 %v3387_v25, %v5939_v9  ;;  %v6244_v3 = vld [vmem:[%s6567_s10 + $0x1] ss:$0 sm:$0xff] }
0x1a59   :  { %v3400_v42 = vadd.f32 %v3382_v24, %v5936_v8  ;;  %v3411_v29 = vsel %vm79_vm0, %v3401_v40, 0.0  ;;  %v6250_v24 = vld [vmem:[%s6568_s11 + $0x1] ss:$0 sm:$0xff] }
0x1a5b   :  { %v3408_v17 = vsel %vm79_vm0, %v3400_v42, 0.0 }
0x1a6e   :  { %3409 = vadd.xlane.f32.xlu0 %v3408_v17  ;;  %v4273_v17 = vld [vmem:[%s6569_s12 + $0x1e0] sm:$0xff] }
0x1a71   :  { %3412 = vadd.xlane.f32.xlu1 %v3411_v29  ;;  %v6265_v29 = vld [vmem:[%s6588_s26] sm:$0xff] }
0x1abf   :  { %v3285_v10 = vpop.permute.xlu1 %3284 }
0x1ac0   :  { %v3289_v31 = vsel %vm369_vm1, %v6113_v26, %v3285_v10 }
0x1ac1   :  { %v3283_v14 = vpop.permute.xlu0 %3282 }
0x1ac2   :  { %v3288_v23 = vsel %vm369_vm1, %v6115_v27, %v3283_v14  ;;  %v4257_v14 = vld [vmem:[%s6569_s12 + $0x160] sm:$0xff] }
0x1ac3   :  { %4822 = vmatprep.mubr.msk.f32.mxu1 %vm79_vm0, %v3288_v23 }
0x1ac4   :  { %4823 = vmatmul.mubr.msk.f32.gmra.mxu1 %vm79_vm0, %v3289_v31  ;;  %v4272_v31 = vld [vmem:[%s6569_s12 + $0x1d8] sm:$0xff] }
0x1af7   :  { %v3410_v8 = vpop.xlane.xlu0 %3409 }
0x1af8   :  { %v3420_v9 = vmul.f32 0.03125, %v3410_v8 }
0x1afa   :  { %v6168_v36 = vsub.f32 %v3400_v42, %v3420_v9  ;;  %v3413_v43 = vpop.xlane.xlu1 %3412  ;;  %v4274_v42 = vld [vmem:[%s6569_s12 + $0x1e8] sm:$0xff]  ;;  %v4256_v9 = vld [vmem:[%s6569_s12 + $0x158] sm:$0xff] }
0x1afb   :  { %v3421_v45 = vmul.f32 0.03125, %v3413_v43  ;;  %4513 = vmatprep.subr.mxu0 %v4274_v42  ;;  %v4255_v43 = vld [vmem:[%s6569_s12 + $0x150] sm:$0xff] }
0x1afc   :  { %v3428_v33 = vmul.f32 %v6168_v36, %v6168_v36 }
0x1afd   :  { %v6174_v35 = vsub.f32 %v3401_v40, %v3421_v45  ;;  %v4258_v40 = vld [vmem:[%s6569_s12 + $0x168] sm:$0xff] }
0x1afe   :  { %v3432_v61 = vsel %vm79_vm0, %v3428_v33, 0.0  ;;  %4514 = vmatpush3.msra.mxu0 %v4258_v40  ;;  %v4254_v45 = vld [vmem:[%s6569_s12 + $0x148] sm:$0xff] }
0x1aff   :  { %3433 = vadd.xlane.f32.xlu1 %v3432_v61  ;;  %v3429_v32 = vmul.f32 %v6174_v35, %v6174_v35  ;;  %4515 = vmatprep.subr.mxu0 %v4273_v17 }
0x1b00   :  { %4516 = vmatpush3.msra.mxu0 %v4257_v14 }
0x1b01   :  { %v3435_v41 = vsel %vm79_vm0, %v3429_v32, 0.0  ;;  %4517 = vmatprep.subr.mxu0 %v4272_v31  ;;  %v4252_v32 = vld [vmem:[%s6569_s12 + $0x138] sm:$0xff] }
0x1b02   :  { %4518 = vmatpush3.msra.mxu0 %v4256_v9 }
0x1b84   :  { %v4824_v62 = vpop.f32.mrf.mxu1 }
0x1b85   :  { %v3397_v46 = vadd.f32 %v4824_v62, %v4240_v30  ;;  %v4270_v62 = vld [vmem:[%s6569_s12 + $0x1c8] sm:$0xff] }
0x1b86   :  { %v3391_v27 = vpop.f32.mrf.mxu1 }
0x1b87   :  { %v3392_v26 = vadd.f32 %v4240_v30, %v3391_v27  ;;  %v3403_v47 = vadd.f32 %v3397_v46, %v5969_v18  ;;  %v4283_v18 = vld [vmem:[%s6569_s12 + $0x230] sm:$0xff]  ;;  %v4269_v46 = vld [vmem:[%s6569_s12 + $0x1c0] sm:$0xff] }
0x1b88   :  { %v3434_v37 = vpop.xlane.xlu1 %3433 }
0x1b89   :  { %v3402_v2 = vadd.f32 %v3392_v26, %v5962_v11  ;;  %v3417_v22 = vsel %vm79_vm0, %v3403_v47, 0.0  ;;  %v4284_v11 = vld [vmem:[%s6569_s12 + $0x238] sm:$0xff]  ;;  %v3444_v7 = vmul.f32 0.03125, %v3434_v37 }
0x1b8a   :  { %4825 = vmatprep.subr.mxu1 %v4284_v11 }
0x1b8b   :  { %v3414_v38 = vsel %vm79_vm0, %v3402_v2, 0.0  ;;  %4826 = vmatpush3.msra.mxu1 %v4284_v11  ;;  %v3448_v12 = vadd.f32 1e-05, %v3444_v7 }
0x1b8c   :  { %3415 = vadd.xlane.f32.xlu0 %v3414_v38  ;;  %4827 = vmatprep.subr.mxu1 %v4283_v18  ;;  %v4268_v38 = vld [vmem:[%s6569_s12 + $0x1b8] sm:$0xff] }
0x1b8d   :  { %4828 = vmatpush3.msra.mxu1 %v4283_v18  ;;  %5133 = vrsqrt.f32 %v3448_v12  ;;  %v4250_v12 = vld [vmem:[%s6569_s12 + $0x128] sm:$0xff] }
0x1b8e   :  { %4829 = vmatprep.subr.mxu1 %v4282_v49 }
0x1b8f   :  { %4830 = vmatpush3.msra.mxu1 %v4282_v49 }
0x1b90   :  { %3418 = vadd.xlane.f32.xlu0 %v3417_v22  ;;  %4831 = vmatprep.subr.mxu1 %v4281_v34 }
0x1b91   :  { %4832 = vmatpush3.msra.mxu1 %v4281_v34  ;;  %v4267_v34 = vld [vmem:[%s6569_s12 + $0x1b0] sm:$0xff] }
0x1b94   :  { %3436 = vadd.xlane.f32.xlu0 %v3435_v41 }
0x1b9a   :  { %v5134_v51 = vpop.eup %5133 }
0x1b9b   :  { %v3456_v21 = vmul.f32 %v5134_v51, %v6168_v36  ;;  %v4271_v36 = vld [vmem:[%s6569_s12 + $0x1d0] sm:$0xff] }
0x1b9c   :  { %4519 = vmatprep.subr.mxu0 %v4271_v36 }
0x1b9d   :  { %v3466_v30 = vmul.f32 %v6244_v3, %v3456_v21  ;;  %4520 = vmatpush3.msra.mxu0 %v4255_v43 }
0x1b9e   :  { %4521 = vmatprep.subr.mxu0 %v4270_v62 }
0x1b9f   :  { %v3476_v25 = vadd.f32 %v6250_v24, %v3466_v30  ;;  %4522 = vmatpush3.msra.mxu0 %v4254_v45 }
0x1ba0   :  { %4523 = vmatprep.subr.mxu0 %v4269_v46 }
0x1ba1   :  { %v6268_v10 = vmul.f32 %v6265_v29, %v3476_v25 }
0x1ba3   :  { %v3486_v33 = vrot.slane %v6268_v10, 4 }
0x1ba5   :  { %v6299_v26 = vsel %vm1464_vm2, 0.0, %v3486_v33 }
0x1ba6   :  { %v3507_v41 = vrot.slane %v6299_v26, 2  ;;  %v3547_v11 = vrot.slane %v6299_v26, 6  ;;  %v3496_v18 = vrot.slane %v6299_v26, 1  ;;  %v3536_v49 = vrot.slane %v6299_v26, 5 }
0x1ba7   :  { %v3518_v39 = vrot.slane %v6299_v26, 3  ;;  %v3558_v44 = vrot.slane %v6299_v26, 7 }
0x1c15   :  { %v3416_v53 = vpop.xlane.xlu0 %3415 }
0x1c16   :  { %v3422_v6 = vmul.f32 0.03125, %v3416_v53 }
0x1c18   :  { %v6230_v54 = vsub.f32 %v3402_v2, %v3422_v6  ;;  %v6304_v2 = vld [vmem:[%s6588_s26 + $0x8] sm:$0xff] }
0x1c19   :  { %v3419_v55 = vpop.xlane.xlu0 %3418 }
0x1c1a   :  { %v3423_v13 = vmul.f32 0.03125, %v3419_v55  ;;  %v3430_v15 = vmul.f32 %v6230_v54, %v6230_v54 }
0x1c1c   :  { %v6234_v5 = vsub.f32 %v3403_v47, %v3423_v13  ;;  %v3438_v20 = vsel %vm79_vm0, %v3430_v15, 0.0  ;;  %v4253_v47 = vld [vmem:[%s6569_s12 + $0x140] sm:$0xff] }
0x1c1d   :  { %3439 = vadd.xlane.f32.xlu1 %v3438_v20  ;;  %v3437_v48 = vpop.xlane.xlu0 %3436  ;;  %4524 = vmatpush3.msra.mxu0 %v4253_v47  ;;  %v4265_v15 = vld [vmem:[%s6569_s12 + $0x1a0] sm:$0xff] }
0x1c1e   :  { %v3445_v1 = vmul.f32 0.03125, %v3437_v48  ;;  %v3431_v16 = vmul.f32 %v6234_v5, %v6234_v5  ;;  %4525 = vmatprep.subr.mxu0 %v4268_v38 }
0x1c1f   :  { %4526 = vmatpush3.msra.mxu0 %v4252_v32 }
0x1c20   :  { %v3449_v19 = vadd.f32 1e-05, %v3445_v1  ;;  %v3441_v4 = vsel %vm79_vm0, %v3431_v16, 0.0  ;;  %4527 = vmatprep.subr.mxu0 %v4267_v34  ;;  %v4249_v16 = vld [vmem:[%s6569_s12 + $0x120] sm:$0xff]  ;;  %s6590_s12 = smov 96  }
0x1c21   :  { %3442 = vadd.xlane.f32.xlu0 %v3441_v4  ;;  %4528 = vmatpush3.msra.mxu0 %v4251_v57 }
0x1c22   :  { %5135 = vrsqrt.f32 %v3449_v19  ;;  %4529 = vmatprep.subr.mxu0 %v4266_v0 }
0x1c23   :  { %4530 = vmatpush3.msra.mxu0 %v4250_v12 }
0x1c24   :  { %4531 = vmatprep.subr.mxu0 %v4265_v15 }
0x1c25   :  { %4532 = vmatpush3.msra.mxu0 %v4249_v16 }
0x1c2f   :  { %v5136_v23 = vpop.eup %5135 }
0x1c30   :  { %v3457_v8 = vmul.f32 %v5136_v23, %v6174_v35 }
0x1c32   :  { %v3467_v61 = vmul.f32 %v6244_v3, %v3457_v8 }
0x1c34   :  { %v3477_v27 = vadd.f32 %v6250_v24, %v3467_v61 }
0x1c36   :  { %v6307_v35 = vmul.f32 %v6304_v2, %v3477_v27 }
0x1c38   :  { %v3487_v22 = vrot.slane %v6307_v35, 4 }
0x1c3a   :  { %v6327_v50 = vsel %vm1464_vm2, %v3486_v33, %v3487_v22  ;;  %v6330_v52 = vsel %vm1464_vm2, %v3487_v22, 0.0  ;;  %v3529_v22 = vrot.slane %v6299_v26, 4 }
0x1c3b   :  { %4833 = vmatprep.mubr.msk.f32.mxu1 %vm79_vm0, %v6327_v50  ;;  %v3508_v58 = vrot.slane %v6327_v50, 2  ;;  %v3548_v59 = vrot.slane %v6327_v50, 6  ;;  %v3497_v60 = vrot.slane %v6327_v50, 1  ;;  %v3537_v28 = vrot.slane %v6327_v50, 5 }
0x1c3c   :  { %4834 = vmatmul.mubr.msk.f32.vlgmr.msra.gmra.mxu1 %vm79_vm0, %v6330_v52  ;;  %v3510_v56 = vrot.slane %v6330_v52, 2  ;;  %v3550_v63 = vrot.slane %v6330_v52, 6  ;;  %v3519_v37 = vrot.slane %v6327_v50, 3  ;;  %v3559_v7 = vrot.slane %v6327_v50, 7 }
0x1c3d   :  { %v3509_v53 = vsel %vm1487_vm3, %v3507_v41, %v3508_v58  ;;  %v3549_v6 = vsel %vm1530_vm4, %v3547_v11, %v3548_v59  ;;  %v3498_v55 = vsel %vm1475_vm5, %v3496_v18, %v3497_v60  ;;  %v3538_v13 = vsel %vm1518_vm6, %v3536_v49, %v3537_v28 }
0x1c3e   :  { %v4934_v20 = vpack.i.bf16 %v3509_v53, %v3549_v6  ;;  %v4929_v48 = vpack.i.bf16 %v3498_v55, %v3538_v13  ;;  %v3511_v1 = vsel %vm1487_vm3, %v3508_v58, %v3510_v56  ;;  %v3551_v51 = vsel %vm1530_vm4, %v3548_v59, %v3550_v63 }
0x1c3f   :  { %v3520_v19 = vsel %vm1499_vm7, %v3518_v39, %v3519_v37  ;;  %v3560_v4 = vsel %vm1542_vm8, %v3558_v44, %v3559_v7  ;;  %v3499_v21 = vrot.slane %v6330_v52, 1  ;;  %v3539_v30 = vrot.slane %v6330_v52, 5 }
0x1c40   :  { %4935 = vrot.lane.b32.xlu0 %v4934_v20, %s5177_s23  ;;  %4930 = vrot.lane.b32.xlu1 %v4929_v48, %s6589_s30  ;;  %v4949_v25 = vpack.i.bf16 %v3511_v1, %v3551_v51  ;;  %v4939_v42 = vpack.i.bf16 %v3520_v19, %v3560_v4  ;;  %v3521_v14 = vrot.slane %v6330_v52, 3  ;;  %v3561_v23 = vrot.slane %v6330_v52, 7  ;;  %v6405_v51 = vld [vmem:[%s6588_s26 + $0x10] sm:$0xff] }
0x1c41   :  { %v3500_v40 = vsel %vm1475_vm5, %v3497_v60, %v3499_v21  ;;  %v3540_v17 = vsel %vm1518_vm6, %v3537_v28, %v3539_v30  ;;  %v3530_v46 = vrot.slane %v6327_v50, 4  ;;  %v3532_v0 = vrot.slane %v6330_v52, 4 }
0x1c42   :  { %v4944_v31 = vpack.i.bf16 %v3500_v40, %v3540_v17  ;;  %v3522_v8 = vsel %vm1499_vm7, %v3519_v37, %v3521_v14  ;;  %v3562_v9 = vsel %vm1542_vm8, %v3559_v7, %v3561_v23 }
0x1c43   :  { %v4954_v36 = vpack.i.bf16 %v3522_v8, %v3562_v9  ;;  %v3531_v49 = vsel %vm1464_vm2, %v3529_v22, %v3530_v46  ;;  %v3533_v13 = vsel %vm1464_vm2, %v3530_v46, %v3532_v0 }
0x1c44   :  { %4950 = vrot.lane.b32.xlu0 %v4949_v25, %s5177_s23  ;;  %4940 = vrot.lane.b32.xlu1 %v4939_v42, %s6590_s12 }
0x1c48   :  { %4945 = vrot.lane.b32.xlu1 %v4944_v31, %s6589_s30 }
0x1c4c   :  { %4955 = vrot.lane.b32.xlu1 %v4954_v36, %s6590_s12 }
0x1ca6   :  { %v3440_v33 = vpop.xlane.xlu1 %3439 }
0x1ca7   :  { %v3446_v61 = vmul.f32 0.03125, %v3440_v33 }
0x1ca9   :  { %v3450_v43 = vadd.f32 1e-05, %v3446_v61 }
0x1caa   :  { %v3443_v62 = vpop.xlane.xlu0 %3442 }
0x1cab   :  { %5137 = vrsqrt.f32 %v3450_v43  ;;  %v3447_v27 = vmul.f32 0.03125, %v3443_v62 }
0x1cad   :  { %v3451_v45 = vadd.f32 1e-05, %v3447_v27 }
0x1caf   :  { %5139 = vrsqrt.f32 %v3451_v45 }
0x1cb2   :  { %v4931_v47 = vpop.permute.xlu1 %4930  ;;  %v4936_v38 = vpop.permute.xlu0 %4935 }
0x1cb3   :  { %v4933_v32 = vunpack.i.h.bf16 %v4931_v47  ;;  %v4932_v41 = vunpack.i.l.bf16 %v4931_v47  ;;  %v4938_v11 = vunpack.i.h.bf16 %v4936_v38  ;;  %v4937_v18 = vunpack.i.l.bf16 %v4936_v38 }
0x1cb5   :  { %v3569_v34 = vsel %vm79_vm0, %v6299_v26, %v4933_v32  ;;  %v3575_v39 = vsel %vm79_vm0, %v3531_v49, %v4932_v41 }
0x1cb6   :  { %v4941_v44 = vpop.permute.xlu1 %4940  ;;  %v3577_v60 = vsel %vm1556_vm9, %v3575_v39, %v4937_v18  ;;  %v3571_v28 = vsel %vm1556_vm9, %v3569_v34, %v4938_v11  ;;  %v4951_v12 = vpop.permute.xlu0 %4950 }
0x1cb7   :  { %v4943_v57 = vunpack.i.h.bf16 %v4941_v44  ;;  %v4942_v58 = vunpack.i.l.bf16 %v4941_v44  ;;  %v4953_v48 = vunpack.i.h.bf16 %v4951_v12  ;;  %v4952_v1 = vunpack.i.l.bf16 %v4951_v12 }
0x1cb8   :  { %v5138_v59 = vpop.eup %5137 }
0x1cb9   :  { %v3458_v56 = vmul.f32 %v5138_v59, %v6230_v54  ;;  %v3579_v63 = vsel %vm1559_vm10, %v3577_v60, %v4942_v58  ;;  %v3573_v37 = vsel %vm1559_vm10, %v3571_v28, %v4943_v57 }
0x1cba   :  { %v4946_v7 = vpop.permute.xlu1 %4945  ;;  %3795 = vmatprep.mubr.f32.mxu0 %v3579_v63 }
0x1cbb   :  { %v3468_v26 = vmul.f32 %v6244_v3, %v3458_v56  ;;  %v4948_v53 = vunpack.i.h.bf16 %v4946_v7  ;;  %v4947_v6 = vunpack.i.l.bf16 %v4946_v7  ;;  %3796 = vmatmul.mubr.f32.vlgmr.msra.gmra.mxu0 %v3573_v37 }
0x1cbc   :  { %v5140_v55 = vpop.eup %5139 }
0x1cbd   :  { %v3478_v15 = vadd.f32 %v6250_v24, %v3468_v26  ;;  %v3459_v52 = vmul.f32 %v5140_v55, %v6234_v5  ;;  %v3576_v54 = vsel %vm79_vm0, %v3533_v13, %v4947_v6  ;;  %v3570_v20 = vsel %vm79_vm0, %v6327_v50, %v4948_v53 }
0x1cbe   :  { %v4956_v16 = vpop.permute.xlu1 %4955  ;;  %v3578_v30 = vsel %vm1556_vm9, %v3576_v54, %v4952_v1  ;;  %v3572_v25 = vsel %vm1556_vm9, %v3570_v20, %v4953_v48  ;;  %v4296_v54 = vld [vmem:[%s6571_s14 + $0x68] sm:$0xff]  ;;  %v4295_v20 = vld [vmem:[%s6571_s14 + $0x60] sm:$0xff]  ;;  %v4294_v48 = vld [vmem:[%s6571_s14 + $0x58] sm:$0xff] }
0x1cbf   :  { %v6408_v19 = vmul.f32 %v6405_v51, %v3478_v15  ;;  %v3469_v4 = vmul.f32 %v6244_v3, %v3459_v52  ;;  %v4958_v21 = vunpack.i.h.bf16 %v4956_v16  ;;  %v4957_v5 = vunpack.i.l.bf16 %v4956_v16  ;;  %v6423_v3 = vld [vmem:[%s6588_s26 + $0x18] sm:$0xff]  ;;  %v4297_v52 = vld [vmem:[%s6571_s14 + $0x70] sm:$0xff]  ;;  %v4292_v16 = vld [vmem:[%s6571_s14 + $0x48] sm:$0xff] }
0x1cc0   :  { %v4298_v15 = vld [vmem:[%s6571_s14 + $0x78] sm:$0xff]  ;;  %v4293_v1 = vld [vmem:[%s6571_s14 + $0x50] sm:$0xff] }
0x1cc1   :  { %v3583_v50 = vrot.slane %v6408_v19, 4  ;;  %v3479_v42 = vadd.f32 %v6250_v24, %v3469_v4  ;;  %v3580_v40 = vsel %vm1559_vm10, %v3578_v30, %v4957_v5  ;;  %v3574_v17 = vsel %vm1559_vm10, %v3572_v25, %v4958_v21  ;;  %4839 = vmatprep.subr.mxu1 %v4298_v15  ;;  %v4291_v4 = vld [vmem:[%s6571_s14 + $0x40] sm:$0xff] }
0x1cc2   :  { %3800 = vmatprep.mubr.f32.mxu0 %v3580_v40  ;;  %4840 = vmatpush3.msra.mxu1 %v4298_v15 }
0x1cc3   :  { %v6418_v14 = vsel %vm1464_vm2, 0.0, %v3583_v50  ;;  %v6426_v23 = vmul.f32 %v6423_v3, %v3479_v42  ;;  %3801 = vmatmul.mubr.f32.gmra.mxu0 %v3574_v17  ;;  %4841 = vmatprep.subr.mxu1 %v4297_v52 }
0x1cc4   :  { %v3604_v24 = vrot.slane %v6418_v14, 2  ;;  %v3644_v8 = vrot.slane %v6418_v14, 6  ;;  %v3593_v9 = vrot.slane %v6418_v14, 1  ;;  %v3633_v36 = vrot.slane %v6418_v14, 5  ;;  %4842 = vmatpush3.msra.mxu1 %v4297_v52 }
0x1cc5   :  { %v3584_v31 = vrot.slane %v6426_v23, 4  ;;  %v3615_v43 = vrot.slane %v6418_v14, 3  ;;  %v3655_v62 = vrot.slane %v6418_v14, 7  ;;  %4843 = vmatprep.subr.mxu1 %v4296_v54  ;;  %v3626_v25 = vrot.slane %v6418_v14, 4 }
0x1cc6   :  { %4844 = vmatpush3.msra.mxu1 %v4296_v54 }
0x1cc7   :  { %v6434_v33 = vsel %vm1464_vm2, %v3583_v50, %v3584_v31  ;;  %v6437_v61 = vsel %vm1464_vm2, %v3584_v31, 0.0  ;;  %4845 = vmatprep.subr.mxu1 %v4295_v20 }
0x1cc8   :  { %4836 = vmatprep.mubr.msk.f32.mxu1 %vm79_vm0, %v6434_v33  ;;  %v3605_v27 = vrot.slane %v6434_v33, 2  ;;  %v3645_v45 = vrot.slane %v6434_v33, 6  ;;  %v3594_v46 = vrot.slane %v6434_v33, 1  ;;  %v3634_v47 = vrot.slane %v6434_v33, 5  ;;  %4846 = vmatpush3.msra.mxu1 %v4295_v20 }
0x1cc9   :  { %4837 = vmatmul.mubr.msk.f32.gmra.mxu1 %vm79_vm0, %v6437_v61  ;;  %v3596_v38 = vrot.slane %v6437_v61, 1  ;;  %v3636_v22 = vrot.slane %v6437_v61, 5  ;;  %v3616_v32 = vrot.slane %v6434_v33, 3  ;;  %v3656_v41 = vrot.slane %v6434_v33, 7  ;;  %4847 = vmatprep.subr.mxu1 %v4294_v48 }
0x1cca   :  { %v3606_v11 = vsel %vm1487_vm3, %v3604_v24, %v3605_v27  ;;  %v3646_v18 = vsel %vm1530_vm4, %v3644_v8, %v3645_v45  ;;  %v3595_v49 = vsel %vm1475_vm5, %v3593_v9, %v3594_v46  ;;  %v3635_v34 = vsel %vm1518_vm6, %v3633_v36, %v3634_v47  ;;  %4848 = vmatpush3.msra.mxu1 %v4294_v48 }
0x1ccb   :  { %v4964_v39 = vpack.i.bf16 %v3606_v11, %v3646_v18  ;;  %v4959_v44 = vpack.i.bf16 %v3595_v49, %v3635_v34  ;;  %v3597_v57 = vsel %vm1475_vm5, %v3594_v46, %v3596_v38  ;;  %v3637_v58 = vsel %vm1518_vm6, %v3634_v47, %v3636_v22  ;;  %4849 = vmatprep.subr.mxu1 %v4293_v1 }
0x1ccc   :  { %v3617_v59 = vsel %vm1499_vm7, %v3615_v43, %v3616_v32  ;;  %v3657_v60 = vsel %vm1542_vm8, %v3655_v62, %v3656_v41  ;;  %v3618_v28 = vrot.slane %v6437_v61, 3  ;;  %v3658_v0 = vrot.slane %v6437_v61, 7  ;;  %4850 = vmatpush3.msra.mxu1 %v4293_v1 }
0x1ccd   :  { %4965 = vrot.lane.b32.xlu1 %v4964_v39, %s5177_s23  ;;  %4960 = vrot.lane.b32.xlu0 %v4959_v44, %s6589_s30  ;;  %v3607_v56 = vrot.slane %v6437_v61, 2  ;;  %v3647_v63 = vrot.slane %v6437_v61, 6  ;;  %v4974_v37 = vpack.i.bf16 %v3597_v57, %v3637_v58  ;;  %v4969_v7 = vpack.i.bf16 %v3617_v59, %v3657_v60 }
0x1cce   :  { %v3619_v26 = vsel %vm1499_vm7, %v3616_v32, %v3618_v28  ;;  %v3659_v12 = vsel %vm1542_vm8, %v3656_v41, %v3658_v0  ;;  %4851 = vmatprep.subr.mxu1 %v4292_v16  ;;  %v3627_v21 = vrot.slane %v6434_v33, 4  ;;  %v3629_v43 = vrot.slane %v6437_v61, 4 }
0x1ccf   :  { %v3608_v53 = vsel %vm1487_vm3, %v3605_v27, %v3607_v56  ;;  %v3648_v6 = vsel %vm1530_vm4, %v3645_v45, %v3647_v63  ;;  %v4984_v55 = vpack.i.bf16 %v3619_v26, %v3659_v12  ;;  %4852 = vmatpush3.msra.mxu1 %v4292_v16  ;;  %v4286_v56 = vld [vmem:[%s6570_s13 + $0x1] ss:$0 sm:$0xff] }
0x1cd0   :  { %v4979_v13 = vpack.i.bf16 %v3608_v53, %v3648_v6  ;;  %4853 = vmatprep.subr.mxu1 %v4291_v4  ;;  %v3628_v31 = vsel %vm1464_vm2, %v3626_v25, %v3627_v21 }
0x1cd1   :  { %4975 = vrot.lane.b32.xlu1 %v4974_v37, %s6589_s30  ;;  %4970 = vrot.lane.b32.xlu0 %v4969_v7, %s6590_s12 }
0x1cd2   :  { %4854 = vmatpush3.msra.mxu1 %v4291_v4 }
0x1cd5   :  { %4985 = vrot.lane.b32.xlu1 %v4984_v55, %s6590_s12  ;;  %4980 = vrot.lane.b32.xlu0 %v4979_v13, %s5177_s23 }
0x1cfc   :  { %v4835_v0 = vpop.f32.mrf.mxu1 }
0x1d3f   :  { %v4966_v5 = vpop.permute.xlu1 %4965  ;;  %v4961_v30 = vpop.permute.xlu0 %4960 }
0x1d40   :  { %v4963_v50 = vunpack.i.h.bf16 %v4961_v30  ;;  %v4962_v42 = vunpack.i.l.bf16 %v4961_v30  ;;  %v4968_v40 = vunpack.i.h.bf16 %v4966_v5  ;;  %v4967_v17 = vunpack.i.l.bf16 %v4966_v5 }
0x1d42   :  { %v3672_v24 = vsel %vm79_vm0, %v3628_v31, %v4962_v42  ;;  %v3666_v8 = vsel %vm79_vm0, %v6418_v14, %v4963_v50  ;;  %v3630_v14 = vsel %vm1464_vm2, %v3627_v21, %v3629_v43  ;;  %v4300_v31 = vld [vmem:[%s6572_s15 + $0x1] ss:$0 sm:$0xff] }
0x1d43   :  { %v4976_v9 = vpop.permute.xlu1 %4975  ;;  %v4971_v36 = vpop.permute.xlu0 %4970  ;;  %v3674_v47 = vsel %vm1556_vm9, %v3672_v24, %v4967_v17  ;;  %v3668_v38 = vsel %vm1556_vm9, %v3666_v8, %v4968_v40 }
0x1d44   :  { %v4973_v62 = vunpack.i.h.bf16 %v4971_v36  ;;  %v4972_v27 = vunpack.i.l.bf16 %v4971_v36  ;;  %v4978_v45 = vunpack.i.h.bf16 %v4976_v9  ;;  %v4977_v46 = vunpack.i.l.bf16 %v4976_v9 }
0x1d46   :  { %v3676_v22 = vsel %vm1559_vm10, %v3674_v47, %v4972_v27  ;;  %v3670_v32 = vsel %vm1559_vm10, %v3668_v38, %v4973_v62  ;;  %v3673_v39 = vsel %vm79_vm0, %v3630_v14, %v4977_v46  ;;  %v3667_v44 = vsel %vm79_vm0, %v6434_v33, %v4978_v45  ;;  %v3882_v33 = vpop.f32.mrf.mxu1 }
0x1d47   :  { %v4986_v41 = vpop.permute.xlu1 %4985  ;;  %v4981_v11 = vpop.permute.xlu0 %4980  ;;  %3805 = vmatprep.mubr.f32.mxu0 %v3676_v22 }
0x1d48   :  { %v4988_v18 = vunpack.i.h.bf16 %v4986_v41  ;;  %v4987_v49 = vunpack.i.l.bf16 %v4986_v41  ;;  %v4983_v61 = vunpack.i.h.bf16 %v4981_v11  ;;  %v4982_v34 = vunpack.i.l.bf16 %v4981_v11  ;;  %3806 = vmatmul.mubr.f32.gmra.mxu0 %v3670_v32 }
0x1d4a   :  { %v3675_v57 = vsel %vm1556_vm9, %v3673_v39, %v4982_v34  ;;  %v3669_v58 = vsel %vm1556_vm9, %v3667_v44, %v4983_v61 }
0x1d4b   :  { %v3677_v59 = vsel %vm1559_vm10, %v3675_v57, %v4987_v49  ;;  %v3671_v60 = vsel %vm1559_vm10, %v3669_v58, %v4988_v18 }
0x1d4c   :  { %3810 = vmatprep.mubr.f32.mxu0 %v3677_v59 }
0x1d4d   :  { %3811 = vmatmul.mubr.f32.gmra.mxu0 %v3671_v60 }
0x1d7b   :  { %v4533_v28 = vpop.f32.mrf.mxu0 }
0x1d7d   :  { %v4534_v63 = vpop.f32.mrf.mxu0 }
0x1d7e   :  { %v4535_v37 = vadd.f32 %v4534_v63, %v4533_v28 }
0x1d80   :  { %v3798_v7 = vadd.f32 %v4535_v37, %v4286_v56 }
0x1d82   :  { %v3883_v26 = vadd.f32 %v3882_v33, %v3798_v7 }
0x1d83   :  { %v4536_v12 = vpop.f32.mrf.mxu0 }
0x1d84   :  { %v3901_v53 = vmax.f32 %v3883_v26, 0.0 }
0x1d85   :  { %v4537_v6 = vpop.f32.mrf.mxu0 }
0x1d86   :  { %v4538_v55 = vadd.f32 %v4537_v6, %v4536_v12  ;;  %4855 = vmatprep.mubr.msk.f32.mxu1 %vm1556_vm9, %v3901_v53 }
0x1d88   :  { %v3803_v13 = vadd.f32 %v4538_v55, %v4286_v56 }
0x1d89   :  { %v4838_v20 = vpop.f32.mrf.mxu1 }
0x1d8a   :  { %v3888_v15 = vadd.f32 %v4835_v0, %v3803_v13 }
0x1d8b   :  { %v3892_v21 = vpop.f32.mrf.mxu1 }
0x1d8c   :  { %v3902_v52 = vmax.f32 %v3888_v15, 0.0  ;;  %v4307_v15 = vld [vmem:[%s6573_s16 + $0x1] ss:$0 sm:$0xff]  ;;  %s5180_s16 = smov [#allocation2]  }
0x1d8e   :  { %4856 = vmatmul.mubr.msk.f32.vlgmr.msra.gmra.mxu1 %vm1556_vm9, %v3902_v52 }
0x1e08   :  { %v4539_v54 = vpop.f32.mrf.mxu0 }
0x1e0a   :  { %v4540_v48 = vpop.f32.mrf.mxu0 }
0x1e0b   :  { %v4541_v1 = vadd.f32 %v4540_v48, %v4539_v54  ;;  %v4308_v48 = vld [vmem:[%s6574_s17 + $0x1] ss:$0 sm:$0xff]  ;;  %s4112_s17 = sshll.u32 %s5180_s16, 4  ;;  %s4113_s17 = int_to_ptr.vmem [resolvable:$true] %s4112_s17 }
0x1e0c   :  { %s5153_s0 = scalar_lea.vmem %s4113_s17, 512  ;;  %p5158_p1 = scmp.lt.s32.totalorder %s4113_s17, %s4113_s17 }
0x1e0d   :  { %v3808_v16 = vadd.f32 %v4541_v1, %v4286_v56  ;;  %v4542_v4 = vpop.f32.mrf.mxu0  ;;  %p5154_p0 = scmp.ne.s32.totalorder %s4113_s17, %s5153_s0  ;;  %p5159_p2 = scmp.lt.s32.totalorder %s5153_s0, %s5153_s0 }
0x1e0f   :  { %v3893_v5 = vadd.f32 %v3892_v21, %v3808_v16  ;;  %v4543_v30 = vpop.f32.mrf.mxu0  ;;  %p5160_p3 = por %p5159_p2, %p5158_p1 }
0x1e10   :  { %v4544_v25 = vadd.f32 %v4543_v30, %v4542_v4 }
0x1e11   :  { %v3903_v50 = vmax.f32 %v3893_v5, 0.0  ;;  %p5161_p4 = pnand %p5160_p3, %p5154_p0 }
0x1e12   :  { %v3813_v42 = vadd.f32 %v4544_v25, %v4286_v56 }
0x1e13   :  { %4858 = vmatprep.mubr.msk.f32.mxu1 %vm1556_vm9, %v3903_v50 }
0x1e14   :  { %v3898_v40 = vadd.f32 %v4838_v20, %v3813_v42 }
0x1e16   :  { %v3904_v17 = vmax.f32 %v3898_v40, 0.0 }
0x1e18   :  { %4859 = vmatmul.mubr.msk.f32.gmra.mxu1 %vm1556_vm9, %v3904_v17 }
0x1e4e   :  { %v4857_v24 = vpop.f32.mrf.mxu1 }
0x1e4f   :  { %v4006_v8 = vadd.f32 %v4857_v24, %v4300_v31 }
0x1e50   :  { %v4000_v9 = vpop.f32.mrf.mxu1 }
0x1e51   :  { %v4020_v36 = vadd.f32 %v4006_v8, %v6307_v35  ;;  %v4001_v43 = vadd.f32 %v4300_v31, %v4000_v9 }
0x1e53   :  { %v4019_v62 = vadd.f32 %v4001_v43, %v6268_v10  ;;  %v4030_v27 = vsel %vm79_vm0, %v4020_v36, 0.0 }
0x1e54   :  { %4031 = vadd.xlane.f32.xlu1 %v4030_v27 }
0x1e55   :  { %v4027_v45 = vsel %vm79_vm0, %v4019_v62, 0.0 }
0x1e56   :  { %4028 = vadd.xlane.f32.xlu0 %v4027_v45 }
0x1ed8   :  { %v4860_v46 = vpop.f32.mrf.mxu1 }
0x1ed9   :  { %v4016_v38 = vadd.f32 %v4860_v46, %v4300_v31 }
0x1eda   :  { %v4010_v47 = vpop.f32.mrf.mxu1 }
0x1edb   :  { %v4011_v22 = vadd.f32 %v4300_v31, %v4010_v47  ;;  %v4022_v14 = vadd.f32 %v4016_v38, %v6426_v23 }
0x1edd   :  { %v4021_v32 = vadd.f32 %v4011_v22, %v6408_v19  ;;  %v4032_v41 = vpop.xlane.xlu1 %4031  ;;  %v4036_v34 = vsel %vm79_vm0, %v4022_v14, 0.0 }
0x1ede   :  { %v4040_v11 = vmul.f32 0.03125, %v4032_v41 }
0x1edf   :  { %v4029_v35 = vpop.xlane.xlu0 %4028  ;;  %v4033_v18 = vsel %vm79_vm0, %v4021_v32, 0.0 }
0x1ee0   :  { %v4044_v10 = vsub.f32 %v4020_v36, %v4040_v11  ;;  %v4039_v49 = vmul.f32 0.03125, %v4029_v35  ;;  %4034 = vadd.xlane.f32.xlu0 %v4033_v18 }
0x1ee2   :  { %v4043_v61 = vsub.f32 %v4019_v62, %v4039_v49  ;;  %v4048_v39 = vmul.f32 %v4044_v10, %v4044_v10 }
0x1ee4   :  { %4037 = vadd.xlane.f32.xlu0 %v4036_v34  ;;  %v4047_v44 = vmul.f32 %v4043_v61, %v4043_v61  ;;  %v4054_v19 = vsel %vm79_vm0, %v4048_v39, 0.0 }
0x1ee6   :  { %v4051_v57 = vsel %vm79_vm0, %v4047_v44, 0.0 }
0x1ee7   :  { %4052 = vadd.xlane.f32.xlu1 %v4051_v57 }
0x1ee8   :  { %4055 = vadd.xlane.f32.xlu0 %v4054_v19 }
0x1f69   :  { %v4035_v58 = vpop.xlane.xlu0 %4034 }
0x1f6a   :  { %v4041_v23 = vmul.f32 0.03125, %v4035_v58 }
0x1f6c   :  { %v4045_v59 = vsub.f32 %v4021_v32, %v4041_v23 }
0x1f6d   :  { %v4038_v60 = vpop.xlane.xlu0 %4037 }
0x1f6e   :  { %v4042_v28 = vmul.f32 0.03125, %v4038_v60  ;;  %v4049_v0 = vmul.f32 %v4045_v59, %v4045_v59 }
0x1f70   :  { %v4046_v56 = vsub.f32 %v4022_v14, %v4042_v28  ;;  %v4053_v63 = vpop.xlane.xlu1 %4052  ;;  %v4057_v37 = vsel %vm79_vm0, %v4049_v0, 0.0 }
0x1f71   :  { %v4063_v7 = vmul.f32 0.03125, %v4053_v63  ;;  %4058 = vadd.xlane.f32.xlu1 %v4057_v37  ;;  %v4056_v33 = vpop.xlane.xlu0 %4055 }
0x1f72   :  { %v4064_v26 = vmul.f32 0.03125, %v4056_v33  ;;  %v4050_v12 = vmul.f32 %v4046_v56, %v4046_v56 }
0x1f73   :  { %v4067_v53 = vadd.f32 1e-05, %v4063_v7 }
0x1f74   :  { %v4068_v6 = vadd.f32 1e-05, %v4064_v26  ;;  %v4060_v55 = vsel %vm79_vm0, %v4050_v12, 0.0 }
0x1f75   :  { %5141 = vrsqrt.f32 %v4067_v53  ;;  %4061 = vadd.xlane.f32.xlu0 %v4060_v55 }
0x1f76   :  { %5143 = vrsqrt.f32 %v4068_v6 }
0x1f82   :  { %v5142_v13 = vpop.eup %5141 }
0x1f83   :  { %v5144_v52 = vpop.eup %5143  ;;  %v4075_v54 = vmul.f32 %v5142_v13, %v4043_v61 }
0x1f84   :  { %v4076_v20 = vmul.f32 %v5144_v52, %v4044_v10 }
0x1f85   :  { %v4085_v1 = vmul.f32 %v4307_v15, %v4075_v54 }
0x1f86   :  { %v4086_v16 = vmul.f32 %v4307_v15, %v4076_v20 }
0x1f87   :  { %v4095_v4 = vadd.f32 %v4308_v48, %v4085_v1 }
0x1f88   :  { %v4096_v21 = vadd.f32 %v4308_v48, %v4086_v16 }
0x1f89   :  { %v4099_v5 = vmul.f32 %v6265_v29, %v4095_v4 }
0x1f8a   :  { %v4100_v30 = vmul.f32 %v6304_v2, %v4096_v21 }
0x1f8b   :  { %4103 = vst.msk [vmem:[#allocation2] sm:$0xff] %vm79_vm0, %v4099_v5 }
0x1f8c   :  { %4104 = vst.msk [vmem:[#allocation2 + $0x8] sm:$0xff] %vm79_vm0, %v4100_v30 }
0x1ffa   :  { %v4059_v25 = vpop.xlane.xlu1 %4058 }
0x1ffb   :  { %v4065_v50 = vmul.f32 0.03125, %v4059_v25 }
0x1ffd   :  { %v4069_v42 = vadd.f32 1e-05, %v4065_v50 }
0x1ffe   :  { %v4062_v40 = vpop.xlane.xlu0 %4061 }
0x1fff   :  { %5145 = vrsqrt.f32 %v4069_v42  ;;  %v4066_v17 = vmul.f32 0.03125, %v4062_v40 }
0x2001   :  { %v4070_v31 = vadd.f32 1e-05, %v4066_v17 }
0x2003   :  { %5147 = vrsqrt.f32 %v4070_v31 }
0x200c   :  { %v5146_v24 = vpop.eup %5145 }
0x200d   :  { %v4077_v8 = vmul.f32 %v5146_v24, %v4045_v59 }
0x200f   :  { %v4087_v9 = vmul.f32 %v4307_v15, %v4077_v8 }
0x2010   :  { %v5148_v36 = vpop.eup %5147 }
0x2011   :  { %v4097_v43 = vadd.f32 %v4308_v48, %v4087_v9  ;;  %v4078_v29 = vmul.f32 %v5148_v36, %v4046_v56 }
0x2013   :  { %v4088_v62 = vmul.f32 %v4307_v15, %v4078_v29  ;;  %v4101_v2 = vmul.f32 %v6405_v51, %v4097_v43 }
0x2015   :  { %v4098_v27 = vadd.f32 %v4308_v48, %v4088_v62  ;;  %4105 = vst.msk [vmem:[#allocation2 + $0x10] sm:$0xff] %vm79_vm0, %v4101_v2 }
0x2017   :  { %v4102_v45 = vmul.f32 %v6423_v3, %v4098_v27 }
0x2019   :  { %4106 = vst.msk [vmem:[#allocation2 + $0x18] sm:$0xff] %vm79_vm0, %v4102_v45 }
0x201a   :  { %5164 = shalt.err (!%p5161_p4)
}
0x201b   :  { %s5181_s19 = smov 128   ;;  %s5182_s8 = smov 8  }
0x201c   :  { %4118 = dma.vmem_to_hbm [thread:$0]  %s4113_s17, 512, %s6575_s18, [#allocation3], %s5181_s19, %s5181_s19, %s5182_s8  }
0x201d   :  { %5173 = dma.done.wait [#allocation3], 512  }
0x201e   :  { %5174 = vsyncadd [#allocation3], 4294966784 }
0x201f   :  { %4122 = vsyncpa [#allocation3], 1 }

</bundles_post_ra>
